<compile_context>
chip_gen: v7x
topology: tpu7x:2x2x1
jax: 0.10.0
libtpu: 0.0.40
codegen_flags: <defaults>
</compile_context>

<pallas_src>
from typing import List

import jax
import jax.numpy as jnp
from jax.experimental import pallas as pl
from jax.experimental.pallas import tpu as pltpu

BN_EPS = 1e-5
LANE = 128
HEAD_PAD = 128      # lane-aligned column offset of log_var inside the merged head
BIAS_COLS = 512     # widest padded layer -> one bias row per layer
BIAS_ROWS = 16      # 10 rows used, allocated as a full sublane tile


def _round_up(n: int, m: int = LANE) -> int:
    return ((n + m - 1) // m) * m


def _vmem_spec():
    # Whole-array blocks resident in VMEM (all tensors here are tiny).
    return pl.BlockSpec(memory_space=pltpu.MemorySpace.VMEM)


# ---------------------------------------------------------------------------
# Single fused kernel: encoder -> merged (mu, log_var) head -> reparameterize
#                      -> decoder -> final Linear + Sigmoid
# ---------------------------------------------------------------------------
def _make_fused_vae_kernel(n_enc: int, n_dec: int):
    def kernel(*refs):
        it = iter(refs)
        x_ref = next(it)            # (B, in_pad)
        eps_ref = next(it)          # (B, HEAD_PAD), padded cols are 0
        b_ref = next(it)            # (BIAS_ROWS, BIAS_COLS) packed bias slab
        enc_w = [next(it) for _ in range(n_enc)]
        w_head_ref = next(it)
        dec_w = [next(it) for _ in range(n_dec)]
        w_f_ref = next(it)
        xhat_ref = next(it)         # (B, in_pad)        lane-dense
        head_ref = next(it)         # (B, 2*HEAD_PAD)    lane-dense

        row = [0]                   # static (Python-time) bias-row counter

        def linear(h, w_ref):
            w = w_ref[...]
            r = row[0]
            row[0] += 1
            y = jnp.dot(h, w, preferred_element_type=jnp.float32)
            return y + b_ref[r, :w.shape[1]]        # static slice of bias slab

        def relu_bn(y):
            # ReLU -> BatchNorm1d (training-mode batch stats, biased variance).
            y = jnp.maximum(y, 0.0)
            inv_n = 1.0 / y.shape[0]                 # static scalar, hoisted
            mean = jnp.sum(y, axis=0, keepdims=True) * inv_n
            diff = y - mean
            var = jnp.sum(diff * diff, axis=0, keepdims=True) * inv_n
            # gamma=1, beta=0 for a fresh BatchNorm1d; a trained affine would
            # be folded as scale = g*rsqrt(var+eps), shift = beta - mean*scale.
            return diff * jax.lax.rsqrt(var + BN_EPS)

        # ---- encoder stack ----
        h = x_ref[...]
        for w in enc_w:
            h = relu_bn(linear(h, w))

        # ---- merged mu / log_var head (one MXU pass) + reparameterize ----
        head = linear(h, w_head_ref)                 # (B, 2*HEAD_PAD)
        head_ref[...] = head                         # lane-dense store; sliced outside
        mu = head[:, :HEAD_PAD]                      # cols >= latent_dim are 0
        log_var = head[:, HEAD_PAD:]                 # cols >= latent_dim are 0
        std = jnp.exp(0.5 * log_var)                 # padded cols -> exp(0) = 1
        z = eps_ref[...] * std + mu                  # eps padded cols are 0 -> z padded cols 0
        # TODO(synk): eps could be generated in-kernel (pltpu.prng_seed +
        # pltpu.stateful_normal, seed via SMEM scalar) to drop one input DMA;
        # kept as an input for determinism w.r.t. a jax PRNG key.

        # ---- decoder stack ----
        d = z
        for w in dec_w:
            d = relu_bn(linear(d, w))

        # ---- final Linear + Sigmoid ----
        y = linear(d, w_f_ref)
        xhat_ref[...] = jax.nn.sigmoid(y)

    return kernel


# ---------------------------------------------------------------------------
# Parameter construction (deterministic synthetic init, PyTorch-style uniform)
# All weights are zero-padded to 128-aligned shapes; biases are packed into
# one (BIAS_ROWS, BIAS_COLS) slab, one row per layer in forward order.
# ---------------------------------------------------------------------------
def init_vae_params(key, in_dim: int = 200, latent_dim: int = 20,
                    hidden_dims: List[int] = None):
    if hidden_dims is None:
        hidden_dims = [512, 256, 64, 32]
    hidden_dims = list(hidden_dims)
    assert latent_dim <= HEAD_PAD

    weights = []
    bias_rows = []

    def add_linear(k, din, dout):
        din_pad, dout_pad = _round_up(din), _round_up(dout)
        kw, kb = jax.random.split(k)
        scale = 1.0 / jnp.sqrt(jnp.float32(din))     # fan_in of the TRUE dims
        w = jax.random.uniform(kw, (din, dout), jnp.float32, -scale, scale)
        b = jax.random.uniform(kb, (dout,), jnp.float32, -scale, scale)
        weights.append(jnp.zeros((din_pad, dout_pad), jnp.float32)
                       .at[:din, :dout].set(w))
        bias_rows.append(jnp.zeros((dout_pad,), jnp.float32).at[:dout].set(b))

    # encoder: Linear -> ReLU -> BatchNorm1d, repeated
    last = in_dim
    for h in hidden_dims:
        key, k = jax.random.split(key)
        add_linear(k, last, h)
        last = h

    # merged latent head: mu in cols [0:L), log_var in cols [128:128+L)
    key, kmu = jax.random.split(key)
    key, kvar = jax.random.split(key)
    last_pad = _round_up(last)
    scale = 1.0 / jnp.sqrt(jnp.float32(last))
    kmw, kmb = jax.random.split(kmu)
    kvw, kvb = jax.random.split(kvar)
    w_mu = jax.random.uniform(kmw, (last, latent_dim), jnp.float32, -scale, scale)
    b_mu = jax.random.uniform(kmb, (latent_dim,), jnp.float32, -scale, scale)
    w_var = jax.random.uniform(kvw, (last, latent_dim), jnp.float32, -scale, scale)
    b_var = jax.random.uniform(kvb, (latent_dim,), jnp.float32, -scale, scale)
    w_head = jnp.zeros((last_pad, 2 * HEAD_PAD), jnp.float32)
    w_head = w_head.at[:last, :latent_dim].set(w_mu)
    w_head = w_head.at[:last, HEAD_PAD:HEAD_PAD + latent_dim].set(w_var)
    b_head = jnp.zeros((2 * HEAD_PAD,), jnp.float32)
    b_head = b_head.at[:latent_dim].set(b_mu)
    b_head = b_head.at[HEAD_PAD:HEAD_PAD + latent_dim].set(b_var)
    weights.append(w_head)
    bias_rows.append(b_head)

    # decoder: hidden_dims reversed (PyTorch code mutates the list with .reverse())
    dec_dims = list(reversed(hidden_dims))
    last = latent_dim
    for h in dec_dims:
        key, k = jax.random.split(key)
        add_linear(k, last, h)
        last = h

    # final Linear (+ Sigmoid applied in-kernel)
    key, kf = jax.random.split(key)
    add_linear(kf, last, in_dim)

    # pack all biases into one slab, one lane-padded row per layer
    bias_slab = jnp.zeros((BIAS_ROWS, BIAS_COLS), jnp.float32)
    for r, b in enumerate(bias_rows):
        bias_slab = bias_slab.at[r, :b.shape[0]].set(b)

    return {"weights": tuple(weights), "bias": bias_slab}


# ---------------------------------------------------------------------------
# Forward pass: one fused pallas_call; lane-dense outputs sliced here.
# ---------------------------------------------------------------------------
@jax.jit
def vae_forward(params, x, eps):
    weights = params["weights"]
    bias_slab = params["bias"]
    B, in_dim = x.shape
    latent_dim = eps.shape[1]
    in_pad = _round_up(in_dim)

    n_stack = (len(weights) - 2) // 2         # encoder depth == decoder depth

    # lane-dense, zero-padded inputs (zeros are exact through the padded net)
    x_pad = jnp.zeros((B, in_pad), jnp.float32).at[:, :in_dim].set(x)
    eps_pad = jnp.zeros((B, HEAD_PAD), jnp.float32).at[:, :latent_dim].set(eps)

    flat_inputs = [x_pad, eps_pad, bias_slab, *weights]

    out_shapes = (
        jax.ShapeDtypeStruct((B, in_pad), jnp.float32),        # x_hat (padded)
        jax.ShapeDtypeStruct((B, 2 * HEAD_PAD), jnp.float32),  # merged mu|log_var head
    )

    # advisory cost hint for XLA's scheduler
    flops = sum(2 * B * w.shape[0] * w.shape[1] for w in weights)
    n_trans = B * (2 * HEAD_PAD + in_pad) \
        + sum(w.shape[1] for w in weights[:n_stack] + weights[n_stack + 1:-1])
    bytes_accessed = 4 * (sum(int(a.size) for a in flat_inputs)
                          + B * (in_pad + 2 * HEAD_PAD))

    xhat_pad, head = pl.pallas_call(
        _make_fused_vae_kernel(n_stack, n_stack),
        out_shape=out_shapes,
        in_specs=[_vmem_spec()] * len(flat_inputs),
        out_specs=(_vmem_spec(), _vmem_spec()),
        compiler_params=pltpu.CompilerParams(vmem_limit_bytes=8 * 1024 * 1024),
        cost_estimate=pl.CostEstimate(
            flops=int(flops),
            transcendentals=int(n_trans),
            bytes_accessed=int(bytes_accessed)),
    )(*flat_inputs)

    x_hat = xhat_pad[:, :in_dim]
    mu = head[:, :latent_dim]
    log_var = head[:, HEAD_PAD:HEAD_PAD + latent_dim]
    return x_hat, x, mu, log_var


if __name__ == "__main__":
    IN_DIM, LATENT_DIM, BATCH = 200, 20, 8

    key = jax.random.PRNGKey(0)
    key, kp, kx, ke = jax.random.split(key, 4)

    params = init_vae_params(kp, in_dim=IN_DIM, latent_dim=LATENT_DIM)
    x = jax.random.normal(kx, (BATCH, IN_DIM), jnp.float32)
    # eps ~ N(0, 1) for the reparameterization trick (torch.randn_like analog)
    eps = jax.random.normal(ke, (BATCH, LATENT_DIM), jnp.float32)

    x_hat, x_out, mu, log_var = vae_forward(params, x, eps)
    jax.block_until_ready((x_hat, x_out, mu, log_var))

    assert x_hat.shape == (BATCH, IN_DIM)
    assert x_out.shape == (BATCH, IN_DIM)
    assert mu.shape == (BATCH, LATENT_DIM)
    assert log_var.shape == (BATCH, LATENT_DIM)
    assert bool(jnp.all(jnp.isfinite(x_hat)))
    assert bool(jnp.all(jnp.isfinite(mu)))
    assert bool(jnp.all(jnp.isfinite(log_var)))
    assert bool(jnp.all((x_hat >= 0.0) & (x_hat <= 1.0)))  # sigmoid output range

    print("KERNEL_OK")
</pallas_src>

<mosaic_0001>
module attributes {stable_mosaic.version = 11 : i64} {
  func.func @kernel(%arg0: memref<8x256xf32, #tpu.memory_space<vmem>>, %arg1: memref<8x128xf32, #tpu.memory_space<vmem>>, %arg2: memref<16x512xf32, #tpu.memory_space<vmem>>, %arg3: memref<256x512xf32, #tpu.memory_space<vmem>>, %arg4: memref<512x256xf32, #tpu.memory_space<vmem>>, %arg5: memref<256x128xf32, #tpu.memory_space<vmem>>, %arg6: memref<128x128xf32, #tpu.memory_space<vmem>>, %arg7: memref<128x256xf32, #tpu.memory_space<vmem>>, %arg8: memref<128x128xf32, #tpu.memory_space<vmem>>, %arg9: memref<128x128xf32, #tpu.memory_space<vmem>>, %arg10: memref<128x256xf32, #tpu.memory_space<vmem>>, %arg11: memref<256x512xf32, #tpu.memory_space<vmem>>, %arg12: memref<512x256xf32, #tpu.memory_space<vmem>>, %arg13: memref<8x256xf32, #tpu.memory_space<vmem>>, %arg14: memref<8x256xf32, #tpu.memory_space<vmem>>) attributes {dimension_semantics = [], scalar_prefetch = 0 : i64, scratch_operands = 0 : i64, tpu.core_type = #tpu.core_type<tc>} {
    %c0 = arith.constant 0 : index
    %c0_0 = arith.constant 0 : index
    %0 = vector.load %arg0[%c0, %c0_0] : memref<8x256xf32, #tpu.memory_space<vmem>>, vector<8x256xf32>
    %c0_1 = arith.constant 0 : index
    %c0_2 = arith.constant 0 : index
    %1 = vector.load %arg3[%c0_1, %c0_2] : memref<256x512xf32, #tpu.memory_space<vmem>>, vector<256x512xf32>
    %cst = arith.constant dense<0.000000e+00> : vector<8x512xf32>
    %2 = tpu.matmul %0, %1, %cst {dimension_numbers = #tpu.dot_dimension_numbers<[1], [0], [0], [1], [0, 0, 1, 1], [], []>} : vector<8x256xf32>, vector<256x512xf32>, vector<8x512xf32> -> vector<8x512xf32>
    %c0_3 = arith.constant 0 : index
    %c0_4 = arith.constant 0 : index
    %3 = vector.load %arg2[%c0_3, %c0_4] : memref<16x512xf32, #tpu.memory_space<vmem>>, vector<1x512xf32>
    %4 = vector.shape_cast %3 : vector<1x512xf32> to vector<512xf32>
    %5 = vector.shape_cast %4 : vector<512xf32> to vector<1x512xf32>
    %6 = vector.broadcast %5 : vector<1x512xf32> to vector<8x512xf32>
    %7 = arith.addf %2, %6 : vector<8x512xf32>
    %cst_5 = arith.constant 0.000000e+00 : f32
    %8 = vector.broadcast %cst_5 : f32 to vector<8x512xf32>
    %9 = arith.maximumf %7, %8 : vector<8x512xf32>
    %cst_6 = arith.constant dense<0.000000e+00> : vector<512xf32>
    %10 = vector.multi_reduction <add>, %9, %cst_6 [0] : vector<8x512xf32> to vector<512xf32>
    %11 = vector.shape_cast %10 : vector<512xf32> to vector<1x512xf32>
    %cst_7 = arith.constant 1.250000e-01 : f32
    %12 = vector.broadcast %cst_7 : f32 to vector<1x512xf32>
    %13 = arith.mulf %11, %12 : vector<1x512xf32>
    %14 = vector.broadcast %13 : vector<1x512xf32> to vector<8x512xf32>
    %15 = arith.subf %9, %14 : vector<8x512xf32>
    %16 = arith.mulf %15, %15 : vector<8x512xf32>
    %cst_8 = arith.constant dense<0.000000e+00> : vector<512xf32>
    %17 = vector.multi_reduction <add>, %16, %cst_8 [0] : vector<8x512xf32> to vector<512xf32>
    %18 = vector.shape_cast %17 : vector<512xf32> to vector<1x512xf32>
    %cst_9 = arith.constant 1.250000e-01 : f32
    %19 = vector.broadcast %cst_9 : f32 to vector<1x512xf32>
    %20 = arith.mulf %18, %19 : vector<1x512xf32>
    %cst_10 = arith.constant 9.99999974E-6 : f32
    %21 = vector.broadcast %cst_10 : f32 to vector<1x512xf32>
    %22 = arith.addf %20, %21 : vector<1x512xf32>
    %23 = math.rsqrt %22 : vector<1x512xf32>
    %24 = vector.broadcast %23 : vector<1x512xf32> to vector<8x512xf32>
    %25 = arith.mulf %15, %24 : vector<8x512xf32>
    %c0_11 = arith.constant 0 : index
    %c0_12 = arith.constant 0 : index
    %26 = vector.load %arg4[%c0_11, %c0_12] : memref<512x256xf32, #tpu.memory_space<vmem>>, vector<512x256xf32>
    %cst_13 = arith.constant dense<0.000000e+00> : vector<8x256xf32>
    %27 = tpu.matmul %25, %26, %cst_13 {dimension_numbers = #tpu.dot_dimension_numbers<[1], [0], [0], [1], [0, 0, 1, 1], [], []>} : vector<8x512xf32>, vector<512x256xf32>, vector<8x256xf32> -> vector<8x256xf32>
    %c1 = arith.constant 1 : index
    %c0_14 = arith.constant 0 : index
    %28 = vector.load %arg2[%c1, %c0_14] : memref<16x512xf32, #tpu.memory_space<vmem>>, vector<1x256xf32>
    %29 = vector.shape_cast %28 : vector<1x256xf32> to vector<256xf32>
    %30 = vector.shape_cast %29 : vector<256xf32> to vector<1x256xf32>
    %31 = vector.broadcast %30 : vector<1x256xf32> to vector<8x256xf32>
    %32 = arith.addf %27, %31 : vector<8x256xf32>
    %cst_15 = arith.constant 0.000000e+00 : f32
    %33 = vector.broadcast %cst_15 : f32 to vector<8x256xf32>
    %34 = arith.maximumf %32, %33 : vector<8x256xf32>
    %cst_16 = arith.constant dense<0.000000e+00> : vector<256xf32>
    %35 = vector.multi_reduction <add>, %34, %cst_16 [0] : vector<8x256xf32> to vector<256xf32>
    %36 = vector.shape_cast %35 : vector<256xf32> to vector<1x256xf32>
    %cst_17 = arith.constant 1.250000e-01 : f32
    %37 = vector.broadcast %cst_17 : f32 to vector<1x256xf32>
    %38 = arith.mulf %36, %37 : vector<1x256xf32>
    %39 = vector.broadcast %38 : vector<1x256xf32> to vector<8x256xf32>
    %40 = arith.subf %34, %39 : vector<8x256xf32>
    %41 = arith.mulf %40, %40 : vector<8x256xf32>
    %cst_18 = arith.constant dense<0.000000e+00> : vector<256xf32>
    %42 = vector.multi_reduction <add>, %41, %cst_18 [0] : vector<8x256xf32> to vector<256xf32>
    %43 = vector.shape_cast %42 : vector<256xf32> to vector<1x256xf32>
    %cst_19 = arith.constant 1.250000e-01 : f32
    %44 = vector.broadcast %cst_19 : f32 to vector<1x256xf32>
    %45 = arith.mulf %43, %44 : vector<1x256xf32>
    %cst_20 = arith.constant 9.99999974E-6 : f32
    %46 = vector.broadcast %cst_20 : f32 to vector<1x256xf32>
    %47 = arith.addf %45, %46 : vector<1x256xf32>
    %48 = math.rsqrt %47 : vector<1x256xf32>
    %49 = vector.broadcast %48 : vector<1x256xf32> to vector<8x256xf32>
    %50 = arith.mulf %40, %49 : vector<8x256xf32>
    %c0_21 = arith.constant 0 : index
    %c0_22 = arith.constant 0 : index
    %51 = vector.load %arg5[%c0_21, %c0_22] : memref<256x128xf32, #tpu.memory_space<vmem>>, vector<256x128xf32>
    %cst_23 = arith.constant dense<0.000000e+00> : vector<8x128xf32>
    %52 = tpu.matmul %50, %51, %cst_23 {dimension_numbers = #tpu.dot_dimension_numbers<[1], [0], [0], [1], [0, 0, 1, 1], [], []>} : vector<8x256xf32>, vector<256x128xf32>, vector<8x128xf32> -> vector<8x128xf32>
    %c2 = arith.constant 2 : index
    %c0_24 = arith.constant 0 : index
    %53 = vector.load %arg2[%c2, %c0_24] : memref<16x512xf32, #tpu.memory_space<vmem>>, vector<1x128xf32>
    %54 = vector.shape_cast %53 : vector<1x128xf32> to vector<128xf32>
    %55 = vector.shape_cast %54 : vector<128xf32> to vector<1x128xf32>
    %56 = vector.broadcast %55 : vector<1x128xf32> to vector<8x128xf32>
    %57 = arith.addf %52, %56 : vector<8x128xf32>
    %cst_25 = arith.constant 0.000000e+00 : f32
    %58 = vector.broadcast %cst_25 : f32 to vector<8x128xf32>
    %59 = arith.maximumf %57, %58 : vector<8x128xf32>
    %cst_26 = arith.constant dense<0.000000e+00> : vector<128xf32>
    %60 = vector.multi_reduction <add>, %59, %cst_26 [0] : vector<8x128xf32> to vector<128xf32>
    %61 = vector.shape_cast %60 : vector<128xf32> to vector<1x128xf32>
    %cst_27 = arith.constant 1.250000e-01 : f32
    %62 = vector.broadcast %cst_27 : f32 to vector<1x128xf32>
    %63 = arith.mulf %61, %62 : vector<1x128xf32>
    %64 = vector.broadcast %63 : vector<1x128xf32> to vector<8x128xf32>
    %65 = arith.subf %59, %64 : vector<8x128xf32>
    %66 = arith.mulf %65, %65 : vector<8x128xf32>
    %cst_28 = arith.constant dense<0.000000e+00> : vector<128xf32>
    %67 = vector.multi_reduction <add>, %66, %cst_28 [0] : vector<8x128xf32> to vector<128xf32>
    %68 = vector.shape_cast %67 : vector<128xf32> to vector<1x128xf32>
    %cst_29 = arith.constant 1.250000e-01 : f32
    %69 = vector.broadcast %cst_29 : f32 to vector<1x128xf32>
    %70 = arith.mulf %68, %69 : vector<1x128xf32>
    %cst_30 = arith.constant 9.99999974E-6 : f32
    %71 = vector.broadcast %cst_30 : f32 to vector<1x128xf32>
    %72 = arith.addf %70, %71 : vector<1x128xf32>
    %73 = math.rsqrt %72 : vector<1x128xf32>
    %74 = vector.broadcast %73 : vector<1x128xf32> to vector<8x128xf32>
    %75 = arith.mulf %65, %74 : vector<8x128xf32>
    %c0_31 = arith.constant 0 : index
    %c0_32 = arith.constant 0 : index
    %76 = vector.load %arg6[%c0_31, %c0_32] : memref<128x128xf32, #tpu.memory_space<vmem>>, vector<128x128xf32>
    %cst_33 = arith.constant dense<0.000000e+00> : vector<8x128xf32>
    %77 = tpu.matmul %75, %76, %cst_33 {dimension_numbers = #tpu.dot_dimension_numbers<[1], [0], [0], [1], [0, 0, 1, 1], [], []>} : vector<8x128xf32>, vector<128x128xf32>, vector<8x128xf32> -> vector<8x128xf32>
    %c3 = arith.constant 3 : index
    %c0_34 = arith.constant 0 : index
    %78 = vector.load %arg2[%c3, %c0_34] : memref<16x512xf32, #tpu.memory_space<vmem>>, vector<1x128xf32>
    %79 = vector.shape_cast %78 : vector<1x128xf32> to vector<128xf32>
    %80 = vector.shape_cast %79 : vector<128xf32> to vector<1x128xf32>
    %81 = vector.broadcast %80 : vector<1x128xf32> to vector<8x128xf32>
    %82 = arith.addf %77, %81 : vector<8x128xf32>
    %cst_35 = arith.constant 0.000000e+00 : f32
    %83 = vector.broadcast %cst_35 : f32 to vector<8x128xf32>
    %84 = arith.maximumf %82, %83 : vector<8x128xf32>
    %cst_36 = arith.constant dense<0.000000e+00> : vector<128xf32>
    %85 = vector.multi_reduction <add>, %84, %cst_36 [0] : vector<8x128xf32> to vector<128xf32>
    %86 = vector.shape_cast %85 : vector<128xf32> to vector<1x128xf32>
    %cst_37 = arith.constant 1.250000e-01 : f32
    %87 = vector.broadcast %cst_37 : f32 to vector<1x128xf32>
    %88 = arith.mulf %86, %87 : vector<1x128xf32>
    %89 = vector.broadcast %88 : vector<1x128xf32> to vector<8x128xf32>
    %90 = arith.subf %84, %89 : vector<8x128xf32>
    %91 = arith.mulf %90, %90 : vector<8x128xf32>
    %cst_38 = arith.constant dense<0.000000e+00> : vector<128xf32>
    %92 = vector.multi_reduction <add>, %91, %cst_38 [0] : vector<8x128xf32> to vector<128xf32>
    %93 = vector.shape_cast %92 : vector<128xf32> to vector<1x128xf32>
    %cst_39 = arith.constant 1.250000e-01 : f32
    %94 = vector.broadcast %cst_39 : f32 to vector<1x128xf32>
    %95 = arith.mulf %93, %94 : vector<1x128xf32>
    %cst_40 = arith.constant 9.99999974E-6 : f32
    %96 = vector.broadcast %cst_40 : f32 to vector<1x128xf32>
    %97 = arith.addf %95, %96 : vector<1x128xf32>
    %98 = math.rsqrt %97 : vector<1x128xf32>
    %99 = vector.broadcast %98 : vector<1x128xf32> to vector<8x128xf32>
    %100 = arith.mulf %90, %99 : vector<8x128xf32>
    %c0_41 = arith.constant 0 : index
    %c0_42 = arith.constant 0 : index
    %101 = vector.load %arg7[%c0_41, %c0_42] : memref<128x256xf32, #tpu.memory_space<vmem>>, vector<128x256xf32>
    %cst_43 = arith.constant dense<0.000000e+00> : vector<8x256xf32>
    %102 = tpu.matmul %100, %101, %cst_43 {dimension_numbers = #tpu.dot_dimension_numbers<[1], [0], [0], [1], [0, 0, 1, 1], [], []>} : vector<8x128xf32>, vector<128x256xf32>, vector<8x256xf32> -> vector<8x256xf32>
    %c4 = arith.constant 4 : index
    %c0_44 = arith.constant 0 : index
    %103 = vector.load %arg2[%c4, %c0_44] : memref<16x512xf32, #tpu.memory_space<vmem>>, vector<1x256xf32>
    %104 = vector.shape_cast %103 : vector<1x256xf32> to vector<256xf32>
    %105 = vector.shape_cast %104 : vector<256xf32> to vector<1x256xf32>
    %106 = vector.broadcast %105 : vector<1x256xf32> to vector<8x256xf32>
    %107 = arith.addf %102, %106 : vector<8x256xf32>
    %c0_45 = arith.constant 0 : index
    %c0_46 = arith.constant 0 : index
    %108 = vector.load %arg14[%c0_45, %c0_46] : memref<8x256xf32, #tpu.memory_space<vmem>>, vector<8x256xf32>
    tpu.vector_store %arg14[%c0_45, %c0_46], %107 {strides = array<i32>} : memref<8x256xf32, #tpu.memory_space<vmem>>, vector<8x256xf32>,
    %109 = vector.extract_strided_slice %107 {offsets = [0, 0], sizes = [8, 128], strides = [1, 1]} : vector<8x256xf32> to vector<8x128xf32>
    %110 = vector.extract_strided_slice %107 {offsets = [0, 128], sizes = [8, 128], strides = [1, 1]} : vector<8x256xf32> to vector<8x128xf32>
    %cst_47 = arith.constant 5.000000e-01 : f32
    %111 = vector.broadcast %cst_47 : f32 to vector<8x128xf32>
    %112 = arith.mulf %111, %110 : vector<8x128xf32>
    %113 = math.exp %112 : vector<8x128xf32>
    %c0_48 = arith.constant 0 : index
    %c0_49 = arith.constant 0 : index
    %114 = vector.load %arg1[%c0_48, %c0_49] : memref<8x128xf32, #tpu.memory_space<vmem>>, vector<8x128xf32>
    %115 = arith.mulf %114, %113 : vector<8x128xf32>
    %116 = arith.addf %115, %109 : vector<8x128xf32>
    %c0_50 = arith.constant 0 : index
    %c0_51 = arith.constant 0 : index
    %117 = vector.load %arg8[%c0_50, %c0_51] : memref<128x128xf32, #tpu.memory_space<vmem>>, vector<128x128xf32>
    %cst_52 = arith.constant dense<0.000000e+00> : vector<8x128xf32>
    %118 = tpu.matmul %116, %117, %cst_52 {dimension_numbers = #tpu.dot_dimension_numbers<[1], [0], [0], [1], [0, 0, 1, 1], [], []>} : vector<8x128xf32>, vector<128x128xf32>, vector<8x128xf32> -> vector<8x128xf32>
    %c5 = arith.constant 5 : index
    %c0_53 = arith.constant 0 : index
    %119 = vector.load %arg2[%c5, %c0_53] : memref<16x512xf32, #tpu.memory_space<vmem>>, vector<1x128xf32>
    %120 = vector.shape_cast %119 : vector<1x128xf32> to vector<128xf32>
    %121 = vector.shape_cast %120 : vector<128xf32> to vector<1x128xf32>
    %122 = vector.broadcast %121 : vector<1x128xf32> to vector<8x128xf32>
    %123 = arith.addf %118, %122 : vector<8x128xf32>
    %cst_54 = arith.constant 0.000000e+00 : f32
    %124 = vector.broadcast %cst_54 : f32 to vector<8x128xf32>
    %125 = arith.maximumf %123, %124 : vector<8x128xf32>
    %cst_55 = arith.constant dense<0.000000e+00> : vector<128xf32>
    %126 = vector.multi_reduction <add>, %125, %cst_55 [0] : vector<8x128xf32> to vector<128xf32>
    %127 = vector.shape_cast %126 : vector<128xf32> to vector<1x128xf32>
    %cst_56 = arith.constant 1.250000e-01 : f32
    %128 = vector.broadcast %cst_56 : f32 to vector<1x128xf32>
    %129 = arith.mulf %127, %128 : vector<1x128xf32>
    %130 = vector.broadcast %129 : vector<1x128xf32> to vector<8x128xf32>
    %131 = arith.subf %125, %130 : vector<8x128xf32>
    %132 = arith.mulf %131, %131 : vector<8x128xf32>
    %cst_57 = arith.constant dense<0.000000e+00> : vector<128xf32>
    %133 = vector.multi_reduction <add>, %132, %cst_57 [0] : vector<8x128xf32> to vector<128xf32>
    %134 = vector.shape_cast %133 : vector<128xf32> to vector<1x128xf32>
    %cst_58 = arith.constant 1.250000e-01 : f32
    %135 = vector.broadcast %cst_58 : f32 to vector<1x128xf32>
    %136 = arith.mulf %134, %135 : vector<1x128xf32>
    %cst_59 = arith.constant 9.99999974E-6 : f32
    %137 = vector.broadcast %cst_59 : f32 to vector<1x128xf32>
    %138 = arith.addf %136, %137 : vector<1x128xf32>
    %139 = math.rsqrt %138 : vector<1x128xf32>
    %140 = vector.broadcast %139 : vector<1x128xf32> to vector<8x128xf32>
    %141 = arith.mulf %131, %140 : vector<8x128xf32>
    %c0_60 = arith.constant 0 : index
    %c0_61 = arith.constant 0 : index
    %142 = vector.load %arg9[%c0_60, %c0_61] : memref<128x128xf32, #tpu.memory_space<vmem>>, vector<128x128xf32>
    %cst_62 = arith.constant dense<0.000000e+00> : vector<8x128xf32>
    %143 = tpu.matmul %141, %142, %cst_62 {dimension_numbers = #tpu.dot_dimension_numbers<[1], [0], [0], [1], [0, 0, 1, 1], [], []>} : vector<8x128xf32>, vector<128x128xf32>, vector<8x128xf32> -> vector<8x128xf32>
    %c6 = arith.constant 6 : index
    %c0_63 = arith.constant 0 : index
    %144 = vector.load %arg2[%c6, %c0_63] : memref<16x512xf32, #tpu.memory_space<vmem>>, vector<1x128xf32>
    %145 = vector.shape_cast %144 : vector<1x128xf32> to vector<128xf32>
    %146 = vector.shape_cast %145 : vector<128xf32> to vector<1x128xf32>
    %147 = vector.broadcast %146 : vector<1x128xf32> to vector<8x128xf32>
    %148 = arith.addf %143, %147 : vector<8x128xf32>
    %cst_64 = arith.constant 0.000000e+00 : f32
    %149 = vector.broadcast %cst_64 : f32 to vector<8x128xf32>
    %150 = arith.maximumf %148, %149 : vector<8x128xf32>
    %cst_65 = arith.constant dense<0.000000e+00> : vector<128xf32>
    %151 = vector.multi_reduction <add>, %150, %cst_65 [0] : vector<8x128xf32> to vector<128xf32>
    %152 = vector.shape_cast %151 : vector<128xf32> to vector<1x128xf32>
    %cst_66 = arith.constant 1.250000e-01 : f32
    %153 = vector.broadcast %cst_66 : f32 to vector<1x128xf32>
    %154 = arith.mulf %152, %153 : vector<1x128xf32>
    %155 = vector.broadcast %154 : vector<1x128xf32> to vector<8x128xf32>
    %156 = arith.subf %150, %155 : vector<8x128xf32>
    %157 = arith.mulf %156, %156 : vector<8x128xf32>
    %cst_67 = arith.constant dense<0.000000e+00> : vector<128xf32>
    %158 = vector.multi_reduction <add>, %157, %cst_67 [0] : vector<8x128xf32> to vector<128xf32>
    %159 = vector.shape_cast %158 : vector<128xf32> to vector<1x128xf32>
    %cst_68 = arith.constant 1.250000e-01 : f32
    %160 = vector.broadcast %cst_68 : f32 to vector<1x128xf32>
    %161 = arith.mulf %159, %160 : vector<1x128xf32>
    %cst_69 = arith.constant 9.99999974E-6 : f32
    %162 = vector.broadcast %cst_69 : f32 to vector<1x128xf32>
    %163 = arith.addf %161, %162 : vector<1x128xf32>
    %164 = math.rsqrt %163 : vector<1x128xf32>
    %165 = vector.broadcast %164 : vector<1x128xf32> to vector<8x128xf32>
    %166 = arith.mulf %156, %165 : vector<8x128xf32>
    %c0_70 = arith.constant 0 : index
    %c0_71 = arith.constant 0 : index
    %167 = vector.load %arg10[%c0_70, %c0_71] : memref<128x256xf32, #tpu.memory_space<vmem>>, vector<128x256xf32>
    %cst_72 = arith.constant dense<0.000000e+00> : vector<8x256xf32>
    %168 = tpu.matmul %166, %167, %cst_72 {dimension_numbers = #tpu.dot_dimension_numbers<[1], [0], [0], [1], [0, 0, 1, 1], [], []>} : vector<8x128xf32>, vector<128x256xf32>, vector<8x256xf32> -> vector<8x256xf32>
    %c7 = arith.constant 7 : index
    %c0_73 = arith.constant 0 : index
    %169 = vector.load %arg2[%c7, %c0_73] : memref<16x512xf32, #tpu.memory_space<vmem>>, vector<1x256xf32>
    %170 = vector.shape_cast %169 : vector<1x256xf32> to vector<256xf32>
    %171 = vector.shape_cast %170 : vector<256xf32> to vector<1x256xf32>
    %172 = vector.broadcast %171 : vector<1x256xf32> to vector<8x256xf32>
    %173 = arith.addf %168, %172 : vector<8x256xf32>
    %cst_74 = arith.constant 0.000000e+00 : f32
    %174 = vector.broadcast %cst_74 : f32 to vector<8x256xf32>
    %175 = arith.maximumf %173, %174 : vector<8x256xf32>
    %cst_75 = arith.constant dense<0.000000e+00> : vector<256xf32>
    %176 = vector.multi_reduction <add>, %175, %cst_75 [0] : vector<8x256xf32> to vector<256xf32>
    %177 = vector.shape_cast %176 : vector<256xf32> to vector<1x256xf32>
    %cst_76 = arith.constant 1.250000e-01 : f32
    %178 = vector.broadcast %cst_76 : f32 to vector<1x256xf32>
    %179 = arith.mulf %177, %178 : vector<1x256xf32>
    %180 = vector.broadcast %179 : vector<1x256xf32> to vector<8x256xf32>
    %181 = arith.subf %175, %180 : vector<8x256xf32>
    %182 = arith.mulf %181, %181 : vector<8x256xf32>
    %cst_77 = arith.constant dense<0.000000e+00> : vector<256xf32>
    %183 = vector.multi_reduction <add>, %182, %cst_77 [0] : vector<8x256xf32> to vector<256xf32>
    %184 = vector.shape_cast %183 : vector<256xf32> to vector<1x256xf32>
    %cst_78 = arith.constant 1.250000e-01 : f32
    %185 = vector.broadcast %cst_78 : f32 to vector<1x256xf32>
    %186 = arith.mulf %184, %185 : vector<1x256xf32>
    %cst_79 = arith.constant 9.99999974E-6 : f32
    %187 = vector.broadcast %cst_79 : f32 to vector<1x256xf32>
    %188 = arith.addf %186, %187 : vector<1x256xf32>
    %189 = math.rsqrt %188 : vector<1x256xf32>
    %190 = vector.broadcast %189 : vector<1x256xf32> to vector<8x256xf32>
    %191 = arith.mulf %181, %190 : vector<8x256xf32>
    %c0_80 = arith.constant 0 : index
    %c0_81 = arith.constant 0 : index
    %192 = vector.load %arg11[%c0_80, %c0_81] : memref<256x512xf32, #tpu.memory_space<vmem>>, vector<256x512xf32>
    %cst_82 = arith.constant dense<0.000000e+00> : vector<8x512xf32>
    %193 = tpu.matmul %191, %192, %cst_82 {dimension_numbers = #tpu.dot_dimension_numbers<[1], [0], [0], [1], [0, 0, 1, 1], [], []>} : vector<8x256xf32>, vector<256x512xf32>, vector<8x512xf32> -> vector<8x512xf32>
    %c8 = arith.constant 8 : index
    %c0_83 = arith.constant 0 : index
    %194 = vector.load %arg2[%c8, %c0_83] : memref<16x512xf32, #tpu.memory_space<vmem>>, vector<1x512xf32>
    %195 = vector.shape_cast %194 : vector<1x512xf32> to vector<512xf32>
    %196 = vector.shape_cast %195 : vector<512xf32> to vector<1x512xf32>
    %197 = vector.broadcast %196 : vector<1x512xf32> to vector<8x512xf32>
    %198 = arith.addf %193, %197 : vector<8x512xf32>
    %cst_84 = arith.constant 0.000000e+00 : f32
    %199 = vector.broadcast %cst_84 : f32 to vector<8x512xf32>
    %200 = arith.maximumf %198, %199 : vector<8x512xf32>
    %cst_85 = arith.constant dense<0.000000e+00> : vector<512xf32>
    %201 = vector.multi_reduction <add>, %200, %cst_85 [0] : vector<8x512xf32> to vector<512xf32>
    %202 = vector.shape_cast %201 : vector<512xf32> to vector<1x512xf32>
    %cst_86 = arith.constant 1.250000e-01 : f32
    %203 = vector.broadcast %cst_86 : f32 to vector<1x512xf32>
    %204 = arith.mulf %202, %203 : vector<1x512xf32>
    %205 = vector.broadcast %204 : vector<1x512xf32> to vector<8x512xf32>
    %206 = arith.subf %200, %205 : vector<8x512xf32>
    %207 = arith.mulf %206, %206 : vector<8x512xf32>
    %cst_87 = arith.constant dense<0.000000e+00> : vector<512xf32>
    %208 = vector.multi_reduction <add>, %207, %cst_87 [0] : vector<8x512xf32> to vector<512xf32>
    %209 = vector.shape_cast %208 : vector<512xf32> to vector<1x512xf32>
    %cst_88 = arith.constant 1.250000e-01 : f32
    %210 = vector.broadcast %cst_88 : f32 to vector<1x512xf32>
    %211 = arith.mulf %209, %210 : vector<1x512xf32>
    %cst_89 = arith.constant 9.99999974E-6 : f32
    %212 = vector.broadcast %cst_89 : f32 to vector<1x512xf32>
    %213 = arith.addf %211, %212 : vector<1x512xf32>
    %214 = math.rsqrt %213 : vector<1x512xf32>
    %215 = vector.broadcast %214 : vector<1x512xf32> to vector<8x512xf32>
    %216 = arith.mulf %206, %215 : vector<8x512xf32>
    %c0_90 = arith.constant 0 : index
    %c0_91 = arith.constant 0 : index
    %217 = vector.load %arg12[%c0_90, %c0_91] : memref<512x256xf32, #tpu.memory_space<vmem>>, vector<512x256xf32>
    %cst_92 = arith.constant dense<0.000000e+00> : vector<8x256xf32>
    %218 = tpu.matmul %216, %217, %cst_92 {dimension_numbers = #tpu.dot_dimension_numbers<[1], [0], [0], [1], [0, 0, 1, 1], [], []>} : vector<8x512xf32>, vector<512x256xf32>, vector<8x256xf32> -> vector<8x256xf32>
    %c9 = arith.constant 9 : index
    %c0_93 = arith.constant 0 : index
    %219 = vector.load %arg2[%c9, %c0_93] : memref<16x512xf32, #tpu.memory_space<vmem>>, vector<1x256xf32>
    %220 = vector.shape_cast %219 : vector<1x256xf32> to vector<256xf32>
    %221 = vector.shape_cast %220 : vector<256xf32> to vector<1x256xf32>
    %222 = vector.broadcast %221 : vector<1x256xf32> to vector<8x256xf32>
    %223 = arith.addf %218, %222 : vector<8x256xf32>
    %224 = arith.negf %223 : vector<8x256xf32>
    %225 = math.exp %224 : vector<8x256xf32>
    %cst_94 = arith.constant 1.000000e+00 : f32
    %226 = vector.broadcast %cst_94 : f32 to vector<8x256xf32>
    %227 = arith.addf %226, %225 : vector<8x256xf32>
    %228 = arith.divf %226, %227 : vector<8x256xf32>
    %c0_95 = arith.constant 0 : index
    %c0_96 = arith.constant 0 : index
    %229 = vector.load %arg13[%c0_95, %c0_96] : memref<8x256xf32, #tpu.memory_space<vmem>>, vector<8x256xf32>
    tpu.vector_store %arg13[%c0_95, %c0_96], %228 {strides = array<i32>} : memref<8x256xf32, #tpu.memory_space<vmem>>, vector<8x256xf32>,
    return
  }
}

</mosaic_0001>

<bundles_post_ra>
// kernel: vae_forward.1
= control target key start
LH: loop header
LB: loop body
LE: loop exit
PB: predicated region body
PF: predicated region fallthrough
CT: control target
= control target key end

     0   :  { %20 = vsyncpa [#allocation3], 0  ;;  %s3915_s0 = inlined_call_operand.vmem [shape: f32[8,256], index: 0, kind: input, shape index: {}]   ;;  %s3916_s1 = inlined_call_operand.vmem [shape: f32[8,128], index: 1, kind: input, shape index: {}]   ;;  %s3917_s2 = inlined_call_operand.hbm [shape: f32[16,512], index: 2, kind: input, shape index: {}]   ;;  %s3918_s3 = inlined_call_operand.hbm [shape: f32[256,512], index: 3, kind: input, shape index: {}]   ;;  %s3919_s4 = inlined_call_operand.hbm [shape: f32[512,256], index: 4, kind: input, shape index: {}]   ;;  %s3920_s5 = inlined_call_operand.hbm [shape: f32[256,128], index: 5, kind: input, shape index: {}]   ;;  %s3921_s6 = inlined_call_operand.vmem [shape: f32[128,128], index: 6, kind: input, shape index: {}]   ;;  %s3922_s7 = inlined_call_operand.hbm [shape: f32[128,256], index: 7, kind: input, shape index: {}]   ;;  %s3923_s8 = inlined_call_operand.hbm [shape: f32[128,128], index: 8, kind: input, shape index: {}]   ;;  %s3924_s9 = inlined_call_operand.hbm [shape: f32[128,128], index: 9, kind: input, shape index: {}]   ;;  %s3925_s10 = inlined_call_operand.hbm [shape: f32[128,256], index: 10, kind: input, shape index: {}]   ;;  %s3926_s11 = inlined_call_operand.hbm [shape: f32[256,512], index: 11, kind: input, shape index: {}]   ;;  %s3927_s12 = inlined_call_operand.hbm [shape: f32[512,256], index: 12, kind: input, shape index: {}]   ;;  %s3928_s13 = inlined_call_operand.hbm [shape: f32[8,256], index: 13, kind: output, shape index: {0}]   ;;  %s3929_s14 = inlined_call_operand.vmem [shape: f32[8,256], index: 14, kind: output, shape index: {1}]  }
   0x1   :  { %21 = vsyncpa [#allocation6], 0 }
   0x2   :  { %22 = vsyncpa [#allocation9], 0 }
   0x3   :  { %23 = vsyncpa [#allocation12], 0 }
   0x4   :  { %24 = vsyncpa [#allocation15], 0 }
   0x5   :  { %25 = vsyncpa [#allocation18], 0 }
   0x6   :  { %26 = vsyncpa [#allocation4], 0  ;;  %s3497_s29 = smov [#allocation5]   ;;  %s3498_s15 = smov [#allocation8]  }
   0x7   :  { %s48_s30 = sshll.u32 %s3497_s29, 4  ;;  %s72_s16 = sshll.u32 %s3498_s15, 4  ;;  %s49_s30 = int_to_ptr.vmem [resolvable:$true] %s48_s30  ;;  %s3592_s16 = int_to_ptr.vmem [resolvable:$true] %s72_s16 }
   0x8   :  { %s3241_s19 = scalar_lea.hbm %s3918_s3, 16384 }
   0x9   :  { %p3242_p0 = scmp.ne.s32.totalorder %s3918_s3, %s3241_s19  ;;  %p3245_p1 = scmp.lt.u32.totalorder %s3241_s19, %s3918_s3 }
   0xb   :  { %p3247_p2 = pnand %p3245_p1, %p3242_p0 }
   0xd   :  { %3250 = shalt.err (!%p3247_p2)
}
   0xe   :  { %s3251_s24 = scalar_lea.vmem %s49_s30, 16384  ;;  %p3256_p4 = scmp.lt.s32.totalorder %s49_s30, %s49_s30 }
   0xf   :  { %p3252_p3 = scmp.ne.s32.totalorder %s49_s30, %s3251_s24  ;;  %p3257_p5 = scmp.lt.s32.totalorder %s3251_s24, %s3251_s24 }
  0x11   :  { %p3258_p6 = por %p3257_p5, %p3256_p4 }
  0x13   :  { %p3259_p7 = pnand %p3258_p6, %p3252_p3 }
  0x15   :  { %3262 = shalt.err (!%p3259_p7)
}
  0x16   :  { %s3499_s25 = smov 512   ;;  %s3500_s26 = smov 32  }
  0x17   :  { %54 = dma.hbm_to_vmem [thread:$0]  %s3918_s3, 16384, %s49_s30, [#allocation6], %s3499_s25, %s3499_s25, %s3500_s26  }
  0x18   :  { %s3263_s17 = scalar_lea.hbm %s3920_s5, 4096 }
  0x19   :  { %p3264_p8 = scmp.ne.s32.totalorder %s3920_s5, %s3263_s17  ;;  %p3267_p9 = scmp.lt.u32.totalorder %s3263_s17, %s3920_s5 }
  0x1b   :  { %p3269_p10 = pnand %p3267_p9, %p3264_p8 }
  0x1d   :  { %3272 = shalt.err (!%p3269_p10)
}
  0x1e   :  { %s3273_s22 = scalar_lea.vmem %s3592_s16, 4096  ;;  %p3278_p12 = scmp.lt.s32.totalorder %s3592_s16, %s3592_s16 }
  0x1f   :  { %p3274_p11 = scmp.ne.s32.totalorder %s3592_s16, %s3273_s22  ;;  %p3279_p13 = scmp.lt.s32.totalorder %s3273_s22, %s3273_s22 }
  0x21   :  { %p3280_p0 = por %p3279_p13, %p3278_p12 }
  0x23   :  { %p3281_p1 = pnand %p3280_p0, %p3274_p11 }
  0x25   :  { %3284 = shalt.err (!%p3281_p1)
}
  0x26   :  { %s3501_s3 = smov 128   ;;  %s3502_s30 = smov 8  }
  0x27   :  { %78 = dma.hbm_to_vmem [thread:$0]  %s3920_s5, 4096, %s3592_s16, [#allocation9], %s3501_s3, %s3501_s3, %s3502_s30  }
  0x28   :  { %s3503_s27 = smov [#allocation11]   ;;  %s3285_s17 = scalar_lea.hbm %s3923_s8, 2048 }
  0x29   :  { %s98_s28 = sshll.u32 %s3503_s27, 4  ;;  %p3286_p2 = scmp.ne.s32.totalorder %s3923_s8, %s3285_s17  ;;  %s99_s28 = int_to_ptr.vmem [resolvable:$true] %s98_s28 }
  0x2a   :  { %p3289_p3 = scmp.lt.u32.totalorder %s3285_s17, %s3923_s8 }
  0x2c   :  { %p3291_p4 = pnand %p3289_p3, %p3286_p2 }
  0x2e   :  { %3294 = shalt.err (!%p3291_p4)
}
  0x2f   :  { %s3295_s22 = scalar_lea.vmem %s99_s28, 2048  ;;  %p3300_p6 = scmp.lt.s32.totalorder %s99_s28, %s99_s28 }
  0x30   :  { %p3296_p5 = scmp.ne.s32.totalorder %s99_s28, %s3295_s22  ;;  %p3301_p7 = scmp.lt.s32.totalorder %s3295_s22, %s3295_s22 }
  0x32   :  { %p3302_p8 = por %p3301_p7, %p3300_p6 }
  0x34   :  { %p3303_p9 = pnand %p3302_p8, %p3296_p5 }
  0x36   :  { %3306 = shalt.err (!%p3303_p9)
}
  0x37   :  { %104 = dma.hbm_to_vmem [thread:$0]  %s3923_s8, 2048, %s99_s28, [#allocation12], %s3501_s3, %s3501_s3, %s3502_s30  }
  0x38   :  { %s3504_s23 = smov [#allocation14]   ;;  %s3505_s27 = smov [#allocation2]  }
  0x39   :  { %s122_s24 = sshll.u32 %s3504_s23, 4  ;;  %s36_s29 = sshll.u32 %s3505_s27, 4  ;;  %s123_s24 = int_to_ptr.vmem [resolvable:$true] %s122_s24  ;;  %s37_s29 = int_to_ptr.vmem [resolvable:$true] %s36_s29 }
  0x3a   :  { %s3307_s18 = scalar_lea.hbm %s3925_s10, 4096 }
  0x3b   :  { %p3308_p10 = scmp.ne.s32.totalorder %s3925_s10, %s3307_s18  ;;  %p3311_p11 = scmp.lt.u32.totalorder %s3307_s18, %s3925_s10 }
  0x3d   :  { %p3313_p12 = pnand %p3311_p11, %p3308_p10 }
  0x3f   :  { %3316 = shalt.err (!%p3313_p12)
}
  0x40   :  { %s3317_s8 = scalar_lea.vmem %s123_s24, 4096  ;;  %p3322_p0 = scmp.lt.s32.totalorder %s123_s24, %s123_s24 }
  0x41   :  { %p3318_p13 = scmp.ne.s32.totalorder %s123_s24, %s3317_s8  ;;  %p3323_p1 = scmp.lt.s32.totalorder %s3317_s8, %s3317_s8 }
  0x43   :  { %p3324_p2 = por %p3323_p1, %p3322_p0 }
  0x45   :  { %p3325_p3 = pnand %p3324_p2, %p3318_p13 }
  0x47   :  { %3328 = shalt.err (!%p3325_p3)
}
  0x48   :  { %s3506_s28 = smov 256   ;;  %s3507_s5 = smov 16  }
  0x49   :  { %128 = dma.hbm_to_vmem [thread:$0]  %s3925_s10, 4096, %s123_s24, [#allocation15], %s3506_s28, %s3506_s28, %s3507_s5  }
  0x4a   :  { %s3329_s17 = scalar_lea.hbm %s3917_s2, 1024 }
  0x4b   :  { %p3330_p4 = scmp.ne.s32.totalorder %s3917_s2, %s3329_s17  ;;  %p3333_p5 = scmp.lt.u32.totalorder %s3329_s17, %s3917_s2 }
  0x4d   :  { %p3335_p6 = pnand %p3333_p5, %p3330_p4 }
  0x4f   :  { %3338 = shalt.err (!%p3335_p6)
}
  0x50   :  { %s3339_s22 = scalar_lea.vmem %s37_s29, 1024  ;;  %p3344_p8 = scmp.lt.s32.totalorder %s37_s29, %s37_s29 }
  0x51   :  { %p3340_p7 = scmp.ne.s32.totalorder %s37_s29, %s3339_s22  ;;  %p3345_p9 = scmp.lt.s32.totalorder %s3339_s22, %s3339_s22 }
  0x53   :  { %p3346_p10 = por %p3345_p9, %p3344_p8 }
  0x55   :  { %p3347_p11 = pnand %p3346_p10, %p3340_p7 }
  0x57   :  { %3350 = shalt.err (!%p3347_p11)
}
  0x58   :  { %42 = dma.hbm_to_vmem [thread:$0]  %s3917_s2, 1024, %s37_s29, [#allocation3], %s3499_s25, %s3499_s25, %s3500_s26  }
  0x59   :  { %s3508_s8 = smov [#allocation7]   ;;  %s3509_s23 = smov [#allocation10]  }
  0x5a   :  { %s60_s16 = sshll.u32 %s3508_s8, 4  ;;  %s86_s27 = sshll.u32 %s3509_s23, 4  ;;  %s61_s16 = int_to_ptr.vmem [resolvable:$true] %s60_s16  ;;  %s87_s27 = int_to_ptr.vmem [resolvable:$true] %s86_s27 }
  0x5b   :  { %s3351_s18 = scalar_lea.hbm %s3919_s4, 16384 }
  0x5c   :  { %p3352_p12 = scmp.ne.s32.totalorder %s3919_s4, %s3351_s18  ;;  %p3355_p13 = scmp.lt.u32.totalorder %s3351_s18, %s3919_s4 }
  0x5e   :  { %p3357_p0 = pnand %p3355_p13, %p3352_p12 }
  0x60   :  { %3360 = shalt.err (!%p3357_p0)
}
  0x61   :  { %s3361_s2 = scalar_lea.vmem %s61_s16, 16384  ;;  %p3366_p2 = scmp.lt.s32.totalorder %s61_s16, %s61_s16 }
  0x62   :  { %p3362_p1 = scmp.ne.s32.totalorder %s61_s16, %s3361_s2  ;;  %p3367_p3 = scmp.lt.s32.totalorder %s3361_s2, %s3361_s2 }
  0x64   :  { %p3368_p4 = por %p3367_p3, %p3366_p2 }
  0x66   :  { %p3369_p5 = pnand %p3368_p4, %p3362_p1 }
  0x68   :  { %3372 = shalt.err (!%p3369_p5)
}
  0x69   :  { %66 = dma.hbm_to_vmem [thread:$0]  %s3919_s4, 16384, %s61_s16, [#allocation6], %s3506_s28, %s3506_s28, %s3507_s5  }
  0x6a   :  { %s3373_s23 = scalar_lea.hbm %s3922_s7, 4096 }
  0x6b   :  { %p3374_p6 = scmp.ne.s32.totalorder %s3922_s7, %s3373_s23  ;;  %p3377_p7 = scmp.lt.u32.totalorder %s3373_s23, %s3922_s7 }
  0x6d   :  { %p3379_p8 = pnand %p3377_p7, %p3374_p6 }
  0x6f   :  { %3382 = shalt.err (!%p3379_p8)
}
  0x70   :  { %s3383_s20 = scalar_lea.vmem %s87_s27, 4096  ;;  %p3388_p10 = scmp.lt.s32.totalorder %s87_s27, %s87_s27 }
  0x71   :  { %p3384_p9 = scmp.ne.s32.totalorder %s87_s27, %s3383_s20  ;;  %p3389_p11 = scmp.lt.s32.totalorder %s3383_s20, %s3383_s20 }
  0x73   :  { %p3390_p12 = por %p3389_p11, %p3388_p10 }
  0x75   :  { %p3391_p13 = pnand %p3390_p12, %p3384_p9 }
  0x77   :  { %3394 = shalt.err (!%p3391_p13)
}
  0x78   :  { %92 = dma.hbm_to_vmem [thread:$0]  %s3922_s7, 4096, %s87_s27, [#allocation9], %s3506_s28, %s3506_s28, %s3507_s5  }
  0x79   :  { %s3510_s21 = smov [#allocation13]   ;;  %s3511_s2 = smov [#allocation16]  }
  0x7a   :  { %s110_s22 = sshll.u32 %s3510_s21, 4  ;;  %s134_s29 = sshll.u32 %s3511_s2, 4  ;;  %s111_s22 = int_to_ptr.vmem [resolvable:$true] %s110_s22  ;;  %s135_s29 = int_to_ptr.vmem [resolvable:$true] %s134_s29 }
  0x7b   :  { %s3395_s8 = scalar_lea.hbm %s3924_s9, 2048 }
  0x7c   :  { %p3396_p0 = scmp.ne.s32.totalorder %s3924_s9, %s3395_s8  ;;  %p3399_p1 = scmp.lt.u32.totalorder %s3395_s8, %s3924_s9 }
  0x7e   :  { %p3401_p2 = pnand %p3399_p1, %p3396_p0 }
  0x80   :  { %3404 = shalt.err (!%p3401_p2)
}
  0x81   :  { %s3405_s7 = scalar_lea.vmem %s111_s22, 2048  ;;  %p3410_p4 = scmp.lt.s32.totalorder %s111_s22, %s111_s22 }
  0x82   :  { %p3406_p3 = scmp.ne.s32.totalorder %s111_s22, %s3405_s7  ;;  %p3411_p5 = scmp.lt.s32.totalorder %s3405_s7, %s3405_s7 }
  0x84   :  { %p3412_p6 = por %p3411_p5, %p3410_p4 }
  0x86   :  { %p3413_p7 = pnand %p3412_p6, %p3406_p3 }
  0x88   :  { %3416 = shalt.err (!%p3413_p7)
}
  0x89   :  { %116 = dma.hbm_to_vmem [thread:$0]  %s3924_s9, 2048, %s111_s22, [#allocation12], %s3501_s3, %s3501_s3, %s3502_s30  }
  0x8a   :  { %s3417_s16 = scalar_lea.hbm %s3926_s11, 16384 }
  0x8b   :  { %p3418_p8 = scmp.ne.s32.totalorder %s3926_s11, %s3417_s16  ;;  %p3421_p9 = scmp.lt.u32.totalorder %s3417_s16, %s3926_s11 }
  0x8d   :  { %p3423_p10 = pnand %p3421_p9, %p3418_p8 }
  0x8f   :  { %3426 = shalt.err (!%p3423_p10)
}
  0x90   :  { %s3427_s8 = scalar_lea.vmem %s135_s29, 16384  ;;  %p3432_p12 = scmp.lt.s32.totalorder %s135_s29, %s135_s29 }
  0x91   :  { %p3428_p11 = scmp.ne.s32.totalorder %s135_s29, %s3427_s8  ;;  %p3433_p13 = scmp.lt.s32.totalorder %s3427_s8, %s3427_s8 }
  0x93   :  { %p3434_p0 = por %p3433_p13, %p3432_p12 }
  0x95   :  { %p3435_p1 = pnand %p3434_p0, %p3428_p11 }
  0x97   :  { %3438 = shalt.err (!%p3435_p1)
}
  0x98   :  { %140 = dma.hbm_to_vmem [thread:$0]  %s3926_s11, 16384, %s135_s29, [#allocation15], %s3499_s25, %s3499_s25, %s3500_s26  }
  0x99   :  { %s3512_s30 = smov [#allocation17]   ;;  %s3439_s17 = scalar_lea.hbm %s3927_s12, 16384 }
  0x9a   :  { %s146_s22 = sshll.u32 %s3512_s30, 4  ;;  %p3440_p2 = scmp.ne.s32.totalorder %s3927_s12, %s3439_s17  ;;  %s147_s22 = int_to_ptr.vmem [resolvable:$true] %s146_s22 }
  0x9b   :  { %p3443_p3 = scmp.lt.u32.totalorder %s3439_s17, %s3927_s12 }
  0x9d   :  { %p3445_p4 = pnand %p3443_p3, %p3440_p2 }
  0x9f   :  { %3448 = shalt.err (!%p3445_p4)
}
  0xa0   :  { %s3449_s20 = scalar_lea.vmem %s147_s22, 16384  ;;  %p3454_p6 = scmp.lt.s32.totalorder %s147_s22, %s147_s22 }
  0xa1   :  { %p3450_p5 = scmp.ne.s32.totalorder %s147_s22, %s3449_s20  ;;  %p3455_p7 = scmp.lt.s32.totalorder %s3449_s20, %s3449_s20 }
  0xa3   :  { %p3456_p8 = por %p3455_p7, %p3454_p6 }
  0xa5   :  { %p3457_p9 = pnand %p3456_p8, %p3450_p5 }
  0xa7   :  { %3460 = shalt.err (!%p3457_p9)
}
  0xa8   :  { %152 = dma.hbm_to_vmem [thread:$0]  %s3927_s12, 16384, %s147_s22, [#allocation18], %s3506_s28, %s3506_s28, %s3507_s5  }
  0xa9   :  { %3483 = dma.done.wait [#allocation3], 1024  }
  0xaa   :  { %3484 = vsyncadd [#allocation3], 4294966272 }
  0xab   :  { %3485 = dma.done.wait [#allocation6], 32768  }
  0xac   :  { %3486 = vsyncadd [#allocation6], 4294934528 }
  0xad   :  { %3487 = dma.done.wait [#allocation9], 8192  }
  0xae   :  { %3488 = vsyncadd [#allocation9], 4294959104 }
  0xaf   :  { %3489 = dma.done.wait [#allocation12], 4096  }
  0xb0   :  { %3490 = vsyncadd [#allocation12], 4294963200 }
  0xb1   :  { %3491 = dma.done.wait [#allocation15], 20480  }
  0xb2   :  { %3492 = vsyncadd [#allocation15], 4294946816 }
  0xb3   :  { %3493 = dma.done.wait [#allocation18], 16384  }
  0xb4   :  { %3494 = vsyncadd [#allocation18], 4294950912  ;;  %v186_v0 = vld [vmem:[#allocation5 + $0x8] sm:$0xff]  ;;  %v185_v2 = vld [vmem:[#allocation5] sm:$0xff]  ;;  %vm3514_vm0 = vmmov 0  }
  0xb5   :  { %v190_v1 = vld [vmem:[#allocation5 + $0x28] sm:$0xff]  ;;  %v189_v4 = vld [vmem:[#allocation5 + $0x20] sm:$0xff] }
  0xb6   :  { %v2491_v3 = vpack.c.bf16 %v190_v1, %v186_v0  ;;  %v194_v5 = vld [vmem:[#allocation5 + $0x48] sm:$0xff]  ;;  %v2493_v7 = vpack.c.bf16 %v189_v4, %v185_v2  ;;  %v193_v9 = vld [vmem:[#allocation5 + $0x40] sm:$0xff] }
  0xb7   :  { %v198_v6 = vld [vmem:[#allocation5 + $0x68] sm:$0xff]  ;;  %v197_v10 = vld [vmem:[#allocation5 + $0x60] sm:$0xff] }
  0xb8   :  { %v2495_v8 = vpack.c.bf16 %v198_v6, %v194_v5  ;;  %v202_v11 = vld [vmem:[#allocation5 + $0x88] sm:$0xff]  ;;  %2492 = vmatprep.subr.bf16.mxu1 %v2491_v3  ;;  %v2497_v13 = vpack.c.bf16 %v197_v10, %v193_v9  ;;  %v201_v15 = vld [vmem:[#allocation5 + $0x80] sm:$0xff] }
  0xb9   :  { %v206_v12 = vld [vmem:[#allocation5 + $0xa8] sm:$0xff]  ;;  %2494 = vmatpush1.bf16.msra.mxu1 %v2493_v7  ;;  %v205_v16 = vld [vmem:[#allocation5 + $0xa0] sm:$0xff] }
  0xba   :  { %2496 = vmatprep.subr.bf16.mxu1 %v2495_v8  ;;  %v2499_v14 = vpack.c.bf16 %v206_v12, %v202_v11  ;;  %v210_v17 = vld [vmem:[#allocation5 + $0xc8] sm:$0xff]  ;;  %v2501_v19 = vpack.c.bf16 %v205_v16, %v201_v15  ;;  %v209_v21 = vld [vmem:[#allocation5 + $0xc0] sm:$0xff] }
  0xbb   :  { %v214_v18 = vld [vmem:[#allocation5 + $0xe8] sm:$0xff]  ;;  %v213_v22 = vld [vmem:[#allocation5 + $0xe0] sm:$0xff] }
  0xbc   :  { %v2503_v20 = vpack.c.bf16 %v214_v18, %v210_v17  ;;  %v218_v23 = vld [vmem:[#allocation5 + $0x108] sm:$0xff]  ;;  %v2505_v25 = vpack.c.bf16 %v213_v22, %v209_v21  ;;  %v217_v27 = vld [vmem:[#allocation5 + $0x100] sm:$0xff]  ;;  %v559_v18 = vld [vmem:[#allocation7 + $0x10] sm:$0xff] }
  0xbd   :  { %2498 = vmatpush1.bf16.msra.mxu1 %v2497_v13  ;;  %v222_v24 = vld [vmem:[#allocation5 + $0x128] sm:$0xff]  ;;  %v221_v28 = vld [vmem:[#allocation5 + $0x120] sm:$0xff]  ;;  %v560_v13 = vld [vmem:[#allocation7 + $0x18] sm:$0xff] }
  0xbe   :  { %2500 = vmatprep.subr.bf16.mxu1 %v2499_v14  ;;  %v2507_v26 = vpack.c.bf16 %v222_v24, %v218_v23  ;;  %v226_v29 = vld [vmem:[#allocation5 + $0x148] sm:$0xff]  ;;  %v2509_v31 = vpack.c.bf16 %v221_v28, %v217_v27  ;;  %v225_v33 = vld [vmem:[#allocation5 + $0x140] sm:$0xff]  ;;  %v564_v22 = vld [vmem:[#allocation7 + $0x38] sm:$0xff] }
  0xbf   :  { %v230_v30 = vld [vmem:[#allocation5 + $0x168] sm:$0xff]  ;;  %v229_v34 = vld [vmem:[#allocation5 + $0x160] sm:$0xff]  ;;  %v563_v24 = vld [vmem:[#allocation7 + $0x30] sm:$0xff] }
  0xc0   :  { %v2511_v32 = vpack.c.bf16 %v230_v30, %v226_v29  ;;  %v234_v35 = vld [vmem:[#allocation5 + $0x188] sm:$0xff]  ;;  %v2513_v37 = vpack.c.bf16 %v229_v34, %v225_v33  ;;  %v233_v39 = vld [vmem:[#allocation5 + $0x180] sm:$0xff]  ;;  %v568_v28 = vld [vmem:[#allocation7 + $0x58] sm:$0xff] }
  0xc1   :  { %2502 = vmatpush1.bf16.msra.mxu1 %v2501_v19  ;;  %v238_v36 = vld [vmem:[#allocation5 + $0x1a8] sm:$0xff]  ;;  %v237_v40 = vld [vmem:[#allocation5 + $0x1a0] sm:$0xff]  ;;  %v567_v33 = vld [vmem:[#allocation7 + $0x50] sm:$0xff] }
  0xc2   :  { %2504 = vmatprep.subr.bf16.mxu1 %v2503_v20  ;;  %v2515_v38 = vpack.c.bf16 %v238_v36, %v234_v35  ;;  %v3752_v41 = vld [vmem:[%s3915_s0 + $0x8] sm:$0xff]  ;;  %v2517_v44 = vpack.c.bf16 %v237_v40, %v233_v39  ;;  %v241_v46 = vld [vmem:[#allocation5 + $0x1c0] sm:$0xff] }
  0xc3   :  { %v242_v42 = vld [vmem:[#allocation5 + $0x1c8] sm:$0xff]  ;;  %399 = vmatprep.mubr.f32.mxu1 %v3752_v41  ;;  %v245_v47 = vld [vmem:[#allocation5 + $0x1e0] sm:$0xff] }
  0xc4   :  { %v246_v43 = vld [vmem:[#allocation5 + $0x1e8] sm:$0xff]  ;;  %v2521_v50 = vpack.c.bf16 %v245_v47, %v241_v46  ;;  %v249_v52 = vld [vmem:[#allocation5 + $0x200] sm:$0xff] }
  0xc5   :  { %2506 = vmatpush1.bf16.msra.mxu1 %v2505_v25  ;;  %v2519_v45 = vpack.c.bf16 %v246_v43, %v242_v42  ;;  %v250_v48 = vld [vmem:[#allocation5 + $0x208] sm:$0xff]  ;;  %v253_v53 = vld [vmem:[#allocation5 + $0x220] sm:$0xff] }
  0xc6   :  { %2508 = vmatprep.subr.bf16.mxu1 %v2507_v26  ;;  %v254_v49 = vld [vmem:[#allocation5 + $0x228] sm:$0xff]  ;;  %v2525_v56 = vpack.c.bf16 %v253_v53, %v249_v52  ;;  %v257_v58 = vld [vmem:[#allocation5 + $0x240] sm:$0xff]  ;;  %v192_v52 = vld [vmem:[#allocation5 + $0x38] sm:$0xff] }
  0xc7   :  { %v2523_v51 = vpack.c.bf16 %v254_v49, %v250_v48  ;;  %v258_v54 = vld [vmem:[#allocation5 + $0x248] sm:$0xff]  ;;  %v261_v59 = vld [vmem:[#allocation5 + $0x260] sm:$0xff] }
  0xc8   :  { %v262_v55 = vld [vmem:[#allocation5 + $0x268] sm:$0xff]  ;;  %v2529_v62 = vpack.c.bf16 %v261_v59, %v257_v58  ;;  %v265_v0 = vld [vmem:[#allocation5 + $0x280] sm:$0xff]  ;;  %v200_v58 = vld [vmem:[#allocation5 + $0x78] sm:$0xff] }
  0xc9   :  { %2510 = vmatpush1.bf16.msra.mxu1 %v2509_v31  ;;  %v2527_v57 = vpack.c.bf16 %v262_v55, %v258_v54  ;;  %v266_v60 = vld [vmem:[#allocation5 + $0x288] sm:$0xff]  ;;  %v269_v1 = vld [vmem:[#allocation5 + $0x2a0] sm:$0xff]  ;;  %v187_v55 = vld [vmem:[#allocation5 + $0x10] sm:$0xff] }
  0xca   :  { %2512 = vmatprep.subr.bf16.mxu1 %v2511_v32  ;;  %v270_v61 = vld [vmem:[#allocation5 + $0x2a8] sm:$0xff]  ;;  %v2533_v4 = vpack.c.bf16 %v269_v1, %v265_v0  ;;  %v273_v6 = vld [vmem:[#allocation5 + $0x2c0] sm:$0xff]  ;;  %v204_v0 = vld [vmem:[#allocation5 + $0x98] sm:$0xff] }
  0xcb   :  { %v2531_v63 = vpack.c.bf16 %v270_v61, %v266_v60  ;;  %v274_v2 = vld [vmem:[#allocation5 + $0x2c8] sm:$0xff]  ;;  %v277_v7 = vld [vmem:[#allocation5 + $0x2e0] sm:$0xff]  ;;  %v208_v1 = vld [vmem:[#allocation5 + $0xb8] sm:$0xff] }
  0xcc   :  { %v278_v3 = vld [vmem:[#allocation5 + $0x2e8] sm:$0xff]  ;;  %v281_v10 = vld [vmem:[#allocation5 + $0x300] sm:$0xff]  ;;  %v2537_v14 = vpack.c.bf16 %v277_v7, %v273_v6  ;;  %v212_v6 = vld [vmem:[#allocation5 + $0xd8] sm:$0xff] }
  0xcd   :  { %2514 = vmatpush1.bf16.msra.mxu1 %v2513_v37  ;;  %v2535_v5 = vpack.c.bf16 %v278_v3, %v274_v2  ;;  %v282_v8 = vld [vmem:[#allocation5 + $0x308] sm:$0xff]  ;;  %v285_v11 = vld [vmem:[#allocation5 + $0x320] sm:$0xff]  ;;  %v2563_v3 = vpack.c.bf16 %v208_v1, %v204_v0  ;;  %v216_v7 = vld [vmem:[#allocation5 + $0xf8] sm:$0xff] }
  0xce   :  { %2516 = vmatprep.subr.bf16.mxu1 %v2515_v38  ;;  %v286_v9 = vld [vmem:[#allocation5 + $0x328] sm:$0xff]  ;;  %v557_v17 = vld [vmem:[#allocation7] sm:$0xff]  ;;  %v2541_v30 = vpack.c.bf16 %v285_v11, %v281_v10  ;;  %v211_v10 = vld [vmem:[#allocation5 + $0xd0] sm:$0xff] }
  0xcf   :  { %v558_v12 = vld [vmem:[#allocation7 + $0x8] sm:$0xff]  ;;  %v2539_v20 = vpack.c.bf16 %v286_v9, %v282_v8  ;;  %v2621_v21 = vpack.c.bf16 %v559_v18, %v557_v17  ;;  %v561_v23 = vld [vmem:[#allocation7 + $0x20] sm:$0xff]  ;;  %v2567_v9 = vpack.c.bf16 %v216_v7, %v212_v6  ;;  %v215_v11 = vld [vmem:[#allocation5 + $0xf0] sm:$0xff] }
  0xd0   :  { %v290_v15 = vld [vmem:[#allocation5 + $0x348] sm:$0xff]  ;;  %v2619_v16 = vpack.c.bf16 %v560_v13, %v558_v12  ;;  %v2625_v29 = vpack.c.bf16 %v563_v24, %v561_v23  ;;  %v565_v32 = vld [vmem:[#allocation7 + $0x40] sm:$0xff]  ;;  %v220_v12 = vld [vmem:[#allocation5 + $0x118] sm:$0xff] }
  0xd1   :  { %2518 = vmatpush1.bf16.msra.mxu1 %v2517_v44  ;;  %v562_v19 = vld [vmem:[#allocation7 + $0x28] sm:$0xff]  ;;  %v289_v35 = vld [vmem:[#allocation5 + $0x340] sm:$0xff]  ;;  %v2629_v39 = vpack.c.bf16 %v567_v33, %v565_v32  ;;  %v224_v13 = vld [vmem:[#allocation5 + $0x138] sm:$0xff] }
  0xd2   :  { %2520 = vmatprep.subr.bf16.mxu1 %v2519_v45  ;;  %v294_v25 = vld [vmem:[#allocation5 + $0x368] sm:$0xff]  ;;  %2620 = vmatprep.subr.bf16.mxu0 %v2619_v16  ;;  %v2623_v26 = vpack.c.bf16 %v564_v22, %v562_v19  ;;  %v293_v36 = vld [vmem:[#allocation5 + $0x360] sm:$0xff]  ;;  %v219_v16 = vld [vmem:[#allocation5 + $0x110] sm:$0xff] }
  0xd3   :  { %v566_v27 = vld [vmem:[#allocation7 + $0x48] sm:$0xff]  ;;  %2622 = vmatpush1.bf16.msra.mxu0 %v2621_v21  ;;  %v2543_v34 = vpack.c.bf16 %v294_v25, %v290_v15  ;;  %v2545_v40 = vpack.c.bf16 %v293_v36, %v289_v35  ;;  %v297_v43 = vld [vmem:[#allocation5 + $0x380] sm:$0xff]  ;;  %v2571_v15 = vpack.c.bf16 %v224_v13, %v220_v12  ;;  %v228_v17 = vld [vmem:[#allocation5 + $0x158] sm:$0xff] }
  0xd4   :  { %2624 = vmatprep.subr.bf16.mxu0 %v2623_v26  ;;  %v2627_v31 = vpack.c.bf16 %v568_v28, %v566_v27  ;;  %v298_v37 = vld [vmem:[#allocation5 + $0x388] sm:$0xff]  ;;  %v301_v44 = vld [vmem:[#allocation5 + $0x3a0] sm:$0xff]  ;;  %v232_v18 = vld [vmem:[#allocation5 + $0x178] sm:$0xff] }
  0xd5   :  { %2522 = vmatpush1.bf16.msra.mxu1 %v2521_v50  ;;  %v302_v38 = vld [vmem:[#allocation5 + $0x3a8] sm:$0xff]  ;;  %v2549_v47 = vpack.c.bf16 %v301_v44, %v297_v43  ;;  %v305_v49 = vld [vmem:[#allocation5 + $0x3c0] sm:$0xff]  ;;  %v227_v21 = vld [vmem:[#allocation5 + $0x150] sm:$0xff] }
  0xd6   :  { %2524 = vmatprep.subr.bf16.mxu1 %v2523_v51  ;;  %v2547_v42 = vpack.c.bf16 %v302_v38, %v298_v37  ;;  %v306_v45 = vld [vmem:[#allocation5 + $0x3c8] sm:$0xff]  ;;  %v309_v50 = vld [vmem:[#allocation5 + $0x3e0] sm:$0xff]  ;;  %v188_v51 = vld [vmem:[#allocation5 + $0x18] sm:$0xff] }
  0xd7   :  { %2626 = vmatpush1.bf16.msra.mxu0 %v2625_v29  ;;  %v310_v46 = vld [vmem:[#allocation5 + $0x3e8] sm:$0xff]  ;;  %v2553_v53 = vpack.c.bf16 %v309_v50, %v305_v49  ;;  %v2555_v54 = vpack.c.bf16 %v192_v52, %v188_v51  ;;  %v3758_v59 = vld [vmem:[%s3915_s0] sm:$0xff]  ;;  %v231_v22 = vld [vmem:[#allocation5 + $0x170] sm:$0xff] }
  0xd8   :  { %2628 = vmatprep.subr.bf16.mxu0 %v2627_v31  ;;  %v2551_v48 = vpack.c.bf16 %v310_v46, %v306_v45  ;;  %v236_v23 = vld [vmem:[#allocation5 + $0x198] sm:$0xff]  ;;  %v2577_v25 = vpack.c.bf16 %v231_v22, %v227_v21  ;;  %v235_v27 = vld [vmem:[#allocation5 + $0x190] sm:$0xff]  ;;  %v570_v21 = vld [vmem:[#allocation7 + $0x68] sm:$0xff] }
  0xd9   :  { %2526 = vmatpush1.bf16.msra.mxu1 %v2525_v56  ;;  %v191_v56 = vld [vmem:[#allocation5 + $0x30] sm:$0xff]  ;;  %v240_v24 = vld [vmem:[#allocation5 + $0x1b8] sm:$0xff] }
  0xda   :  { %2528 = vmatprep.subr.bf16.mxu1 %v2527_v57  ;;  %v196_v57 = vld [vmem:[#allocation5 + $0x58] sm:$0xff]  ;;  %v2557_v60 = vpack.c.bf16 %v191_v56, %v187_v55  ;;  %v2579_v26 = vpack.c.bf16 %v240_v24, %v236_v23  ;;  %v239_v28 = vld [vmem:[#allocation5 + $0x1b0] sm:$0xff]  ;;  %v569_v24 = vld [vmem:[#allocation7 + $0x60] sm:$0xff] }
  0xdb   :  { %2630 = vmatpush1.bf16.msra.mxu0 %v2629_v39  ;;  %v2559_v61 = vpack.c.bf16 %v200_v58, %v196_v57  ;;  %v244_v29 = vld [vmem:[#allocation5 + $0x1d8] sm:$0xff]  ;;  %v2581_v31 = vpack.c.bf16 %v239_v28, %v235_v27  ;;  %v243_v33 = vld [vmem:[#allocation5 + $0x1d0] sm:$0xff]  ;;  %v574_v27 = vld [vmem:[#allocation7 + $0x88] sm:$0xff] }
  0xdc   :  { %v252_v35 = vld [vmem:[#allocation5 + $0x218] sm:$0xff]  ;;  %v251_v39 = vld [vmem:[#allocation5 + $0x210] sm:$0xff] }
  0xdd   :  { %2530 = vmatpush1.bf16.msra.mxu1 %v2529_v62  ;;  %v195_v62 = vld [vmem:[#allocation5 + $0x50] sm:$0xff]  ;;  %v256_v36 = vld [vmem:[#allocation5 + $0x238] sm:$0xff] }
  0xde   :  { %2532 = vmatprep.subr.bf16.mxu1 %v2531_v63  ;;  %v199_v63 = vld [vmem:[#allocation5 + $0x70] sm:$0xff]  ;;  %v2587_v38 = vpack.c.bf16 %v256_v36, %v252_v35  ;;  %v264_v43 = vld [vmem:[#allocation5 + $0x278] sm:$0xff] }
  0xdf   :  { %v2561_v2 = vpack.c.bf16 %v199_v63, %v195_v62  ;;  %v259_v46 = vld [vmem:[#allocation5 + $0x250] sm:$0xff]  ;;  %v272_v49 = vld [vmem:[#allocation5 + $0x2b8] sm:$0xff] }
  0xe0   :  { %v267_v52 = vld [vmem:[#allocation5 + $0x290] sm:$0xff]  ;;  %v280_v55 = vld [vmem:[#allocation5 + $0x2f8] sm:$0xff] }
  0xe1   :  { %2534 = vmatpush1.bf16.msra.mxu1 %v2533_v4  ;;  %v203_v4 = vld [vmem:[#allocation5 + $0x90] sm:$0xff]  ;;  %v288_v62 = vld [vmem:[#allocation5 + $0x338] sm:$0xff] }
  0xe2   :  { %2536 = vmatprep.subr.bf16.mxu1 %v2535_v5  ;;  %v207_v5 = vld [vmem:[#allocation5 + $0xb0] sm:$0xff]  ;;  %v572_v22 = vld [vmem:[#allocation7 + $0x78] sm:$0xff] }
  0xe3   :  { %v2565_v8 = vpack.c.bf16 %v207_v5, %v203_v4  ;;  %v275_v58 = vld [vmem:[#allocation5 + $0x2d0] sm:$0xff]  ;;  %v296_v4 = vld [vmem:[#allocation5 + $0x378] sm:$0xff]  ;;  %v2631_v23 = vpack.c.bf16 %v572_v22, %v570_v21  ;;  %v614_v22 = vld [vmem:[#allocation7 + $0x1c8] sm:$0xff] }
  0xe4   :  { %v283_v1 = vld [vmem:[#allocation5 + $0x310] sm:$0xff]  ;;  %v576_v28 = vld [vmem:[#allocation7 + $0x98] sm:$0xff] }
  0xe5   :  { %2538 = vmatpush1.bf16.msra.mxu1 %v2537_v14  ;;  %v2569_v14 = vpack.c.bf16 %v215_v11, %v211_v10  ;;  %v291_v7 = vld [vmem:[#allocation5 + $0x350] sm:$0xff]  ;;  %v304_v10 = vld [vmem:[#allocation5 + $0x3b8] sm:$0xff]  ;;  %2632 = vmatprep.subr.bf16.mxu0 %v2631_v23 }
  0xe6   :  { %2540 = vmatprep.subr.bf16.mxu1 %v2539_v20  ;;  %v2575_v20 = vpack.c.bf16 %v232_v18, %v228_v17  ;;  %v299_v13 = vld [vmem:[#allocation5 + $0x390] sm:$0xff]  ;;  %v616_v23 = vld [vmem:[#allocation7 + $0x1d8] sm:$0xff] }
  0xe7   :  { %v307_v18 = vld [vmem:[#allocation5 + $0x3d0] sm:$0xff] }
  0xe8   :  { %v579_v36 = vld [vmem:[#allocation7 + $0xb0] sm:$0xff] }
  0xe9   :  { %2542 = vmatpush1.bf16.msra.mxu1 %v2541_v30  ;;  %v248_v30 = vld [vmem:[#allocation5 + $0x1f8] sm:$0xff]  ;;  %v611_v21 = vld [vmem:[#allocation7 + $0x1b0] sm:$0xff] }
  0xea   :  { %2544 = vmatprep.subr.bf16.mxu1 %v2543_v34  ;;  %v2583_v32 = vpack.c.bf16 %v248_v30, %v244_v29  ;;  %v247_v34 = vld [vmem:[#allocation5 + $0x1f0] sm:$0xff]  ;;  %v2635_v29 = vpack.c.bf16 %v576_v28, %v574_v27  ;;  %v573_v30 = vld [vmem:[#allocation7 + $0x80] sm:$0xff]  ;;  %v618_v28 = vld [vmem:[#allocation7 + $0x1e8] sm:$0xff] }
  0xeb   :  { %v2585_v37 = vpack.c.bf16 %v247_v34, %v243_v33  ;;  %v578_v33 = vld [vmem:[#allocation7 + $0xa8] sm:$0xff]  ;;  %v580_v34 = vld [vmem:[#allocation7 + $0xb8] sm:$0xff]  ;;  %v615_v27 = vld [vmem:[#allocation7 + $0x1d0] sm:$0xff] }
  0xec   :  { %v2639_v35 = vpack.c.bf16 %v580_v34, %v578_v33  ;;  %v619_v33 = vld [vmem:[#allocation7 + $0x1f0] sm:$0xff] }
  0xed   :  { %2546 = vmatpush1.bf16.msra.mxu1 %v2545_v40  ;;  %v255_v40 = vld [vmem:[#allocation5 + $0x230] sm:$0xff] }
  0xee   :  { %2548 = vmatprep.subr.bf16.mxu1 %v2547_v42  ;;  %v260_v42 = vld [vmem:[#allocation5 + $0x258] sm:$0xff]  ;;  %v2589_v44 = vpack.c.bf16 %v255_v40, %v251_v39 }
  0xef   :  { %v2591_v45 = vpack.c.bf16 %v264_v43, %v260_v42  ;;  %v584_v39 = vld [vmem:[#allocation7 + $0xd8] sm:$0xff]  ;;  %v581_v42 = vld [vmem:[#allocation7 + $0xc0] sm:$0xff]  ;;  %v583_v43 = vld [vmem:[#allocation7 + $0xd0] sm:$0xff] }
  0xf1   :  { %2550 = vmatpush1.bf16.msra.mxu1 %v2549_v47  ;;  %v263_v47 = vld [vmem:[#allocation5 + $0x270] sm:$0xff] }
  0xf2   :  { %2552 = vmatprep.subr.bf16.mxu1 %v2551_v48  ;;  %v268_v48 = vld [vmem:[#allocation5 + $0x298] sm:$0xff]  ;;  %v2593_v50 = vpack.c.bf16 %v263_v47, %v259_v46 }
  0xf3   :  { %v2595_v51 = vpack.c.bf16 %v272_v49, %v268_v48  ;;  %v588_v46 = vld [vmem:[#allocation7 + $0xf8] sm:$0xff]  ;;  %v585_v48 = vld [vmem:[#allocation7 + $0xe0] sm:$0xff]  ;;  %v587_v49 = vld [vmem:[#allocation7 + $0xf0] sm:$0xff] }
  0xf5   :  { %2554 = vmatpush1.bf16.msra.mxu1 %v2553_v53  ;;  %v271_v53 = vld [vmem:[#allocation5 + $0x2b0] sm:$0xff] }
  0xf6   :  { %2556 = vmatprep.subr.bf16.mxu1 %v2555_v54  ;;  %v276_v54 = vld [vmem:[#allocation5 + $0x2d8] sm:$0xff]  ;;  %v2597_v56 = vpack.c.bf16 %v271_v53, %v267_v52 }
  0xf7   :  { %v2599_v57 = vpack.c.bf16 %v280_v55, %v276_v54  ;;  %v592_v52 = vld [vmem:[#allocation7 + $0x118] sm:$0xff]  ;;  %v589_v54 = vld [vmem:[#allocation7 + $0x100] sm:$0xff]  ;;  %v591_v55 = vld [vmem:[#allocation7 + $0x110] sm:$0xff] }
  0xf8   :  { %400 = vmatmul.mubr.f32.vlgmr.msra.gmra.mrb[0].mxu1 %v3758_v59 }
  0xf9   :  { %2558 = vmatpush1.bf16.msra.mxu1 %v2557_v60  ;;  %470 = vmatprep.mubr.f32.mxu1 %v3752_v41  ;;  %v223_v41 = vld [vmem:[#allocation5 + $0x130] sm:$0xff] }
  0xfa   :  { %2560 = vmatprep.subr.bf16.mxu1 %v2559_v61  ;;  %v2573_v19 = vpack.c.bf16 %v223_v41, %v219_v16  ;;  %v279_v60 = vld [vmem:[#allocation5 + $0x2f0] sm:$0xff]  ;;  %v284_v61 = vld [vmem:[#allocation5 + $0x318] sm:$0xff] }
  0xfb   :  { %v2601_v63 = vpack.c.bf16 %v279_v60, %v275_v58  ;;  %v2603_v0 = vpack.c.bf16 %v288_v62, %v284_v61  ;;  %v312_v16 = vld [vmem:[#allocation5 + $0x3f8] sm:$0xff]  ;;  %v593_v61 = vld [vmem:[#allocation7 + $0x120] sm:$0xff]  ;;  %v595_v62 = vld [vmem:[#allocation7 + $0x130] sm:$0xff] }
  0xfc   :  { %v596_v58 = vld [vmem:[#allocation7 + $0x138] sm:$0xff] }
  0xfd   :  { %2562 = vmatpush1.bf16.msra.mxu1 %v2561_v2  ;;  %v287_v2 = vld [vmem:[#allocation5 + $0x330] sm:$0xff] }
  0xfe   :  { %2564 = vmatprep.subr.bf16.mxu1 %v2563_v3  ;;  %v292_v3 = vld [vmem:[#allocation5 + $0x358] sm:$0xff]  ;;  %v2605_v5 = vpack.c.bf16 %v287_v2, %v283_v1 }
  0xff   :  { %v2607_v6 = vpack.c.bf16 %v296_v4, %v292_v3  ;;  %v600_v1 = vld [vmem:[#allocation7 + $0x158] sm:$0xff]  ;;  %v597_v3 = vld [vmem:[#allocation7 + $0x140] sm:$0xff]  ;;  %v599_v4 = vld [vmem:[#allocation7 + $0x150] sm:$0xff] }
 0x101   :  { %2566 = vmatpush1.bf16.msra.mxu1 %v2565_v8  ;;  %v295_v8 = vld [vmem:[#allocation5 + $0x370] sm:$0xff] }
 0x102   :  { %2568 = vmatprep.subr.bf16.mxu1 %v2567_v9  ;;  %v300_v9 = vld [vmem:[#allocation5 + $0x398] sm:$0xff]  ;;  %v2609_v11 = vpack.c.bf16 %v295_v8, %v291_v7 }
 0x103   :  { %v2611_v12 = vpack.c.bf16 %v304_v10, %v300_v9  ;;  %v604_v7 = vld [vmem:[#allocation7 + $0x178] sm:$0xff]  ;;  %v601_v9 = vld [vmem:[#allocation7 + $0x160] sm:$0xff]  ;;  %v603_v10 = vld [vmem:[#allocation7 + $0x170] sm:$0xff] }
 0x105   :  { %2570 = vmatpush1.bf16.msra.mxu1 %v2569_v14  ;;  %v303_v14 = vld [vmem:[#allocation5 + $0x3b0] sm:$0xff] }
 0x106   :  { %2572 = vmatprep.subr.bf16.mxu1 %v2571_v15  ;;  %v308_v15 = vld [vmem:[#allocation5 + $0x3d8] sm:$0xff]  ;;  %v2613_v41 = vpack.c.bf16 %v303_v14, %v299_v13 }
 0x107   :  { %v2615_v17 = vpack.c.bf16 %v312_v16, %v308_v15  ;;  %v608_v13 = vld [vmem:[#allocation7 + $0x198] sm:$0xff]  ;;  %v605_v15 = vld [vmem:[#allocation7 + $0x180] sm:$0xff]  ;;  %v607_v16 = vld [vmem:[#allocation7 + $0x190] sm:$0xff] }
 0x109   :  { %2574 = vmatpush1.bf16.msra.mxu1 %v2573_v19  ;;  %v311_v19 = vld [vmem:[#allocation5 + $0x3f0] sm:$0xff] }
 0x10a   :  { %2576 = vmatprep.subr.bf16.mxu1 %v2575_v20  ;;  %v2617_v20 = vpack.c.bf16 %v311_v19, %v307_v18  ;;  %v612_v18 = vld [vmem:[#allocation7 + $0x1b8] sm:$0xff]  ;;  %v609_v19 = vld [vmem:[#allocation7 + $0x1a0] sm:$0xff] }
 0x10d   :  { %2578 = vmatpush1.bf16.msra.mxu1 %v2577_v25  ;;  %v571_v25 = vld [vmem:[#allocation7 + $0x70] sm:$0xff] }
 0x10e   :  { %2580 = vmatprep.subr.bf16.mxu1 %v2579_v26  ;;  %v2633_v26 = vpack.c.bf16 %v571_v25, %v569_v24  ;;  %v2673_v24 = vpack.c.bf16 %v611_v21, %v609_v19  ;;  %v2675_v25 = vpack.c.bf16 %v616_v23, %v614_v22  ;;  %v621_v21 = vld [vmem:[#allocation7 + $0x200] sm:$0xff]  ;;  %v623_v22 = vld [vmem:[#allocation7 + $0x210] sm:$0xff] }
 0x110   :  { %2634 = vmatpush1.bf16.msra.mxu0 %v2633_v26  ;;  %v613_v26 = vld [vmem:[#allocation7 + $0x1c0] sm:$0xff] }
 0x111   :  { %2582 = vmatpush1.bf16.msra.mxu1 %v2581_v31  ;;  %v575_v31 = vld [vmem:[#allocation7 + $0x90] sm:$0xff]  ;;  %2636 = vmatprep.subr.bf16.mxu0 %v2635_v29  ;;  %v620_v29 = vld [vmem:[#allocation7 + $0x1f8] sm:$0xff] }
 0x112   :  { %2584 = vmatprep.subr.bf16.mxu1 %v2583_v32  ;;  %v2637_v32 = vpack.c.bf16 %v575_v31, %v573_v30  ;;  %v2677_v30 = vpack.c.bf16 %v615_v27, %v613_v26  ;;  %v2679_v31 = vpack.c.bf16 %v620_v29, %v618_v28  ;;  %v2685_v28 = vpack.c.bf16 %v623_v22, %v621_v21 }
 0x114   :  { %2638 = vmatpush1.bf16.msra.mxu0 %v2637_v32  ;;  %v617_v32 = vld [vmem:[#allocation7 + $0x1e0] sm:$0xff] }
 0x115   :  { %2586 = vmatpush1.bf16.msra.mxu1 %v2585_v37  ;;  %2640 = vmatprep.subr.bf16.mxu0 %v2639_v35  ;;  %v2681_v34 = vpack.c.bf16 %v619_v33, %v617_v32  ;;  %v622_v35 = vld [vmem:[#allocation7 + $0x208] sm:$0xff]  ;;  %v627_v32 = vld [vmem:[#allocation7 + $0x230] sm:$0xff] }
 0x116   :  { %2588 = vmatprep.subr.bf16.mxu1 %v2587_v38  ;;  %v582_v38 = vld [vmem:[#allocation7 + $0xc8] sm:$0xff] }
 0x117   :  { %v2643_v40 = vpack.c.bf16 %v584_v39, %v582_v38  ;;  %v630_v33 = vld [vmem:[#allocation7 + $0x248] sm:$0xff] }
 0x119   :  { %2590 = vmatpush1.bf16.msra.mxu1 %v2589_v44  ;;  %v2645_v44 = vpack.c.bf16 %v583_v43, %v581_v42 }
 0x11a   :  { %2592 = vmatprep.subr.bf16.mxu1 %v2591_v45  ;;  %v586_v45 = vld [vmem:[#allocation7 + $0xe8] sm:$0xff] }
 0x11b   :  { %v2647_v47 = vpack.c.bf16 %v588_v46, %v586_v45 }
 0x11d   :  { %2594 = vmatpush1.bf16.msra.mxu1 %v2593_v50  ;;  %v2649_v50 = vpack.c.bf16 %v587_v49, %v585_v48 }
 0x11e   :  { %2596 = vmatprep.subr.bf16.mxu1 %v2595_v51  ;;  %v590_v51 = vld [vmem:[#allocation7 + $0x108] sm:$0xff] }
 0x11f   :  { %v2651_v53 = vpack.c.bf16 %v592_v52, %v590_v51 }
 0x121   :  { %2598 = vmatpush1.bf16.msra.mxu1 %v2597_v56  ;;  %v2653_v56 = vpack.c.bf16 %v591_v55, %v589_v54 }
 0x122   :  { %2600 = vmatprep.subr.bf16.mxu1 %v2599_v57  ;;  %v594_v57 = vld [vmem:[#allocation7 + $0x128] sm:$0xff] }
 0x123   :  { %v2655_v60 = vpack.c.bf16 %v596_v58, %v594_v57 }
 0x125   :  { %2602 = vmatpush1.bf16.msra.mxu1 %v2601_v63  ;;  %v2657_v63 = vpack.c.bf16 %v595_v62, %v593_v61 }
 0x126   :  { %2604 = vmatprep.subr.bf16.mxu1 %v2603_v0  ;;  %v598_v0 = vld [vmem:[#allocation7 + $0x148] sm:$0xff] }
 0x127   :  { %v2659_v2 = vpack.c.bf16 %v600_v1, %v598_v0 }
 0x129   :  { %2606 = vmatpush1.bf16.msra.mxu1 %v2605_v5  ;;  %v2661_v5 = vpack.c.bf16 %v599_v4, %v597_v3 }
 0x12a   :  { %2608 = vmatprep.subr.bf16.mxu1 %v2607_v6  ;;  %v602_v6 = vld [vmem:[#allocation7 + $0x168] sm:$0xff] }
 0x12b   :  { %v2663_v8 = vpack.c.bf16 %v604_v7, %v602_v6 }
 0x12d   :  { %2610 = vmatpush1.bf16.msra.mxu1 %v2609_v11  ;;  %v2665_v11 = vpack.c.bf16 %v603_v10, %v601_v9 }
 0x12e   :  { %2612 = vmatprep.subr.bf16.mxu1 %v2611_v12  ;;  %v606_v12 = vld [vmem:[#allocation7 + $0x188] sm:$0xff] }
 0x12f   :  { %v2667_v14 = vpack.c.bf16 %v608_v13, %v606_v12 }
 0x131   :  { %2614 = vmatpush1.bf16.msra.mxu1 %v2613_v41  ;;  %v2669_v41 = vpack.c.bf16 %v607_v16, %v605_v15 }
 0x132   :  { %2616 = vmatprep.subr.bf16.mxu1 %v2615_v17  ;;  %v610_v17 = vld [vmem:[#allocation7 + $0x1a8] sm:$0xff] }
 0x135   :  { %2618 = vmatpush1.bf16.msra.mxu1 %v2617_v20  ;;  %v2671_v20 = vpack.c.bf16 %v612_v18, %v610_v17 }
 0x138   :  { %471 = vmatmul.mubr.f32.vlgmr.msra.gmra.mrb[2].mxu1 %v3758_v59  ;;  %v577_v59 = vld [vmem:[#allocation7 + $0xa0] sm:$0xff] }
 0x139   :  { %v2641_v37 = vpack.c.bf16 %v579_v36, %v577_v59  ;;  %v624_v59 = vld [vmem:[#allocation7 + $0x218] sm:$0xff] }
 0x13a   :  { %v2683_v36 = vpack.c.bf16 %v624_v59, %v622_v35 }
 0x13b   :  { %2642 = vmatpush1.bf16.msra.mxu0 %v2641_v37  ;;  %v315_v37 = vlaneseq }
 0x13c   :  { %2644 = vmatprep.subr.bf16.mxu0 %v2643_v40  ;;  %v3768_v40 = vld [vmem:[#allocation2] ss:$8 sm:$0xf] }
 0x13d   :  { %v3763_v38 = vshrl.u32 %v315_v37, 7  ;;  %v631_v37 = vld [vmem:[#allocation7 + $0x250] sm:$0xff] }
 0x13f   :  { %2646 = vmatpush1.bf16.msra.mxu0 %v2645_v44  ;;  %v3766_v39 = vsub.s32 0, %v3763_v38  ;;  %v3771_v42 = vsub.s32 1, %v3763_v38 }
 0x140   :  { %2648 = vmatprep.subr.bf16.mxu0 %v2647_v47 }
 0x141   :  { %v318_v43 = vrot.slane %v3768_v40, %v3766_v39  ;;  %v322_v44 = vrot.slane %v3768_v40, %v3771_v42 }
 0x143   :  { %2650 = vmatpush1.bf16.msra.mxu0 %v2649_v50 }
 0x144   :  { %2652 = vmatprep.subr.bf16.mxu0 %v2651_v53 }
 0x147   :  { %2654 = vmatpush1.bf16.msra.mxu0 %v2653_v56 }
 0x148   :  { %2656 = vmatprep.subr.bf16.mxu0 %v2655_v60 }
 0x14b   :  { %2658 = vmatpush1.bf16.msra.mxu0 %v2657_v63 }
 0x14c   :  { %2660 = vmatprep.subr.bf16.mxu0 %v2659_v2 }
 0x14f   :  { %2662 = vmatpush1.bf16.msra.mxu0 %v2661_v5 }
 0x150   :  { %2664 = vmatprep.subr.bf16.mxu0 %v2663_v8 }
 0x153   :  { %2666 = vmatpush1.bf16.msra.mxu0 %v2665_v11 }
 0x154   :  { %2668 = vmatprep.subr.bf16.mxu0 %v2667_v14 }
 0x157   :  { %2670 = vmatpush1.bf16.msra.mxu0 %v2669_v41 }
 0x158   :  { %2672 = vmatprep.subr.bf16.mxu0 %v2671_v20 }
 0x15b   :  { %2674 = vmatpush1.bf16.msra.mxu0 %v2673_v24  ;;  %v626_v24 = vld [vmem:[#allocation7 + $0x228] sm:$0xff] }
 0x15c   :  { %2676 = vmatprep.subr.bf16.mxu0 %v2675_v25  ;;  %v628_v25 = vld [vmem:[#allocation7 + $0x238] sm:$0xff] }
 0x15f   :  { %2678 = vmatpush1.bf16.msra.mxu0 %v2677_v30  ;;  %v2687_v30 = vpack.c.bf16 %v628_v25, %v626_v24  ;;  %v649_v24 = vld [vmem:[#allocation7 + $0x2e0] sm:$0xff]  ;;  %v651_v25 = vld [vmem:[#allocation7 + $0x2f0] sm:$0xff] }
 0x160   :  { %2680 = vmatprep.subr.bf16.mxu0 %v2679_v31  ;;  %v625_v31 = vld [vmem:[#allocation7 + $0x220] sm:$0xff] }
 0x161   :  { %v2689_v35 = vpack.c.bf16 %v627_v32, %v625_v31  ;;  %v2713_v31 = vpack.c.bf16 %v651_v25, %v649_v24  ;;  %v673_v25 = vld [vmem:[#allocation7 + $0x3a0] sm:$0xff] }
 0x163   :  { %2682 = vmatpush1.bf16.msra.mxu0 %v2681_v34  ;;  %v632_v34 = vld [vmem:[#allocation7 + $0x258] sm:$0xff] }
 0x164   :  { %2684 = vmatprep.subr.bf16.mxu0 %v2683_v36  ;;  %v2691_v59 = vpack.c.bf16 %v632_v34, %v630_v33  ;;  %v629_v36 = vld [vmem:[#allocation7 + $0x240] sm:$0xff] }
 0x165   :  { %v653_v34 = vld [vmem:[#allocation7 + $0x300] sm:$0xff] }
 0x1cb   :  { %v401_v45 = vpop.f32.mrb[0].mxu1 }
 0x1cc   :  { %v402_v46 = vadd.f32 %v401_v45, %v318_v43  ;;  %v403_v47 = vpop.f32.mrb[1].mxu1  ;;  %v325_v43 = vsub.s32 2, %v3763_v38  ;;  %v636_v45 = vld [vmem:[#allocation7 + $0x278] sm:$0xff] }
 0x1cd   :  { %v404_v48 = vadd.f32 %v403_v47, %v322_v44  ;;  %v634_v44 = vld [vmem:[#allocation7 + $0x268] sm:$0xff]  ;;  %v2693_v47 = vpack.c.bf16 %v631_v37, %v629_v36  ;;  %v660_v37 = vld [vmem:[#allocation7 + $0x338] sm:$0xff] }
 0x1ce   :  { %v477_v49 = vmax.f32 %v402_v46, 0.0  ;;  %v329_v46 = vsub.s32 3, %v3763_v38  ;;  %v658_v36 = vld [vmem:[#allocation7 + $0x328] sm:$0xff] }
 0x1cf   :  { %v478_v50 = vmax.f32 %v404_v48, 0.0  ;;  %v2695_v48 = vpack.c.bf16 %v636_v45, %v634_v44 }
 0x1d0   :  { %v481_v51 = vrot.slane %v477_v49, 4 }
 0x1d1   :  { %v487_v52 = vrot.slane %v478_v50, 4 }
 0x1d2   :  { %v482_v53 = vadd.f32 %v481_v51, %v477_v49  ;;  %v326_v51 = vrot.slane %v3768_v40, %v325_v43 }
 0x1d3   :  { %v488_v54 = vadd.f32 %v487_v52, %v478_v50  ;;  %v638_v52 = vld [vmem:[#allocation7 + $0x288] sm:$0xff] }
 0x1d4   :  { %v483_v55 = vrot.slane %v482_v53, 2 }
 0x1d5   :  { %v489_v56 = vrot.slane %v488_v54, 2 }
 0x1d6   :  { %v484_v57 = vadd.f32 %v483_v55, %v482_v53  ;;  %v640_v53 = vld [vmem:[#allocation7 + $0x298] sm:$0xff] }
 0x1d7   :  { %v490_v58 = vadd.f32 %v489_v56, %v488_v54  ;;  %v330_v54 = vrot.slane %v3768_v40, %v329_v46  ;;  %v643_v40 = vld [vmem:[#allocation7 + $0x2b0] sm:$0xff] }
 0x1d8   :  { %v485_v60 = vrot.slane %v484_v57, 1 }
 0x1d9   :  { %v491_v61 = vrot.slane %v490_v58, 1 }
 0x1da   :  { %v486_v62 = vadd.f32 %v485_v60, %v484_v57  ;;  %v2699_v57 = vpack.c.bf16 %v640_v53, %v638_v52  ;;  %v639_v60 = vld [vmem:[#allocation7 + $0x290] sm:$0xff]  ;;  %v662_v53 = vld [vmem:[#allocation7 + $0x348] sm:$0xff] }
 0x1db   :  { %v492_v63 = vadd.f32 %v491_v61, %v490_v58  ;;  %v637_v58 = vld [vmem:[#allocation7 + $0x280] sm:$0xff] }
 0x1dc   :  { %v505_v0 = vmul.f32 0.125, %v486_v62 }
 0x1dd   :  { %v506_v1 = vmul.f32 0.125, %v492_v63  ;;  %v642_v63 = vld [vmem:[#allocation7 + $0x2a8] sm:$0xff] }
 0x1de   :  { %v509_v2 = vsub.f32 %v477_v49, %v505_v0  ;;  %v633_v49 = vld [vmem:[#allocation7 + $0x260] sm:$0xff]  ;;  %v644_v0 = vld [vmem:[#allocation7 + $0x2b8] sm:$0xff] }
 0x1df   :  { %v510_v3 = vsub.f32 %v478_v50, %v506_v1  ;;  %v635_v50 = vld [vmem:[#allocation7 + $0x270] sm:$0xff] }
 0x1e0   :  { %v513_v4 = vmul.f32 %v509_v2, %v509_v2  ;;  %v2697_v55 = vpack.c.bf16 %v635_v50, %v633_v49  ;;  %v2719_v49 = vpack.c.bf16 %v660_v37, %v658_v36  ;;  %v657_v50 = vld [vmem:[#allocation7 + $0x320] sm:$0xff] }
 0x1e1   :  { %v514_v5 = vmul.f32 %v510_v3, %v510_v3 }
 0x1e2   :  { %v517_v6 = vrot.slane %v513_v4, 4 }
 0x1e3   :  { %v523_v7 = vrot.slane %v514_v5, 4 }
 0x1e4   :  { %v518_v8 = vadd.f32 %v517_v6, %v513_v4  ;;  %v641_v6 = vld [vmem:[#allocation7 + $0x2a0] sm:$0xff] }
 0x1e5   :  { %v524_v9 = vadd.f32 %v523_v7, %v514_v5  ;;  %v2703_v5 = vpack.c.bf16 %v644_v0, %v642_v63  ;;  %v666_v0 = vld [vmem:[#allocation7 + $0x368] sm:$0xff] }
 0x1e6   :  { %v519_v10 = vrot.slane %v518_v8, 2 }
 0x1e7   :  { %v525_v11 = vrot.slane %v524_v9, 2 }
 0x1e8   :  { %v520_v12 = vadd.f32 %v519_v10, %v518_v8  ;;  %v646_v8 = vld [vmem:[#allocation7 + $0x2c8] sm:$0xff] }
 0x1e9   :  { %v526_v13 = vadd.f32 %v525_v11, %v524_v9  ;;  %v648_v9 = vld [vmem:[#allocation7 + $0x2d8] sm:$0xff] }
 0x1ea   :  { %v521_v14 = vrot.slane %v520_v12, 1 }
 0x1eb   :  { %v527_v15 = vrot.slane %v526_v13, 1 }
 0x1ec   :  { %v522_v16 = vadd.f32 %v521_v14, %v520_v12  ;;  %v2705_v12 = vpack.c.bf16 %v643_v40, %v641_v6  ;;  %v2707_v14 = vpack.c.bf16 %v648_v9, %v646_v8  ;;  %v665_v40 = vld [vmem:[#allocation7 + $0x360] sm:$0xff]  ;;  %v670_v9 = vld [vmem:[#allocation7 + $0x388] sm:$0xff] }
 0x1ed   :  { %v528_v41 = vadd.f32 %v527_v15, %v526_v13  ;;  %v645_v15 = vld [vmem:[#allocation7 + $0x2c0] sm:$0xff] }
 0x1ee   :  { %v541_v17 = vmul.f32 0.125, %v522_v16  ;;  %v647_v16 = vld [vmem:[#allocation7 + $0x2d0] sm:$0xff] }
 0x1ef   :  { %v542_v18 = vmul.f32 0.125, %v528_v41  ;;  %v2709_v21 = vpack.c.bf16 %v647_v16, %v645_v15  ;;  %v669_v16 = vld [vmem:[#allocation7 + $0x380] sm:$0xff] }
 0x1f0   :  { %v545_v19 = vadd.f32 1e-05, %v541_v17  ;;  %v650_v17 = vld [vmem:[#allocation7 + $0x2e8] sm:$0xff] }
 0x1f1   :  { %v546_v20 = vadd.f32 1e-05, %v542_v18  ;;  %v652_v18 = vld [vmem:[#allocation7 + $0x2f8] sm:$0xff] }
 0x1f2   :  { %3199 = vrsqrt.f32 %v545_v19 }
 0x1f3   :  { %3201 = vrsqrt.f32 %v546_v20 }
 0x1fc   :  { %v3200_v23 = vpop.eup %3199 }
 0x1fd   :  { %v3202_v26 = vpop.eup %3201  ;;  %v553_v29 = vmul.f32 %v3200_v23, %v509_v2  ;;  %v2711_v23 = vpack.c.bf16 %v652_v18, %v650_v17  ;;  %v674_v18 = vld [vmem:[#allocation7 + $0x3a8] sm:$0xff] }
 0x1fe   :  { %v554_v27 = vmul.f32 %v3202_v26, %v510_v3  ;;  %v2701_v3 = vpack.c.bf16 %v639_v60, %v637_v58 }
 0x200   :  { %762 = vmatprep.mubr.f32.mxu0 %v554_v27  ;;  %v654_v27 = vld [vmem:[#allocation7 + $0x308] sm:$0xff] }
 0x201   :  { %763 = vmatmul.mubr.f32.vlgmr.msra.gmra.mrb[0].mxu0 %v553_v29 }
 0x202   :  { %2686 = vmatpush1.bf16.msra.mxu0 %v2685_v28  ;;  %v656_v28 = vld [vmem:[#allocation7 + $0x318] sm:$0xff] }
 0x203   :  { %2688 = vmatprep.subr.bf16.mxu0 %v2687_v30  ;;  %v2715_v33 = vpack.c.bf16 %v656_v28, %v654_v27  ;;  %v678_v28 = vld [vmem:[#allocation7 + $0x3c8] sm:$0xff] }
 0x206   :  { %2690 = vmatpush1.bf16.msra.mxu0 %v2689_v35  ;;  %v655_v35 = vld [vmem:[#allocation7 + $0x310] sm:$0xff] }
 0x207   :  { %2692 = vmatprep.subr.bf16.mxu0 %v2691_v59 }
 0x20a   :  { %2694 = vmatpush1.bf16.msra.mxu0 %v2693_v47  ;;  %v2717_v47 = vpack.c.bf16 %v655_v35, %v653_v34  ;;  %v679_v34 = vld [vmem:[#allocation7 + $0x3d0] sm:$0xff]  ;;  %v682_v35 = vld [vmem:[#allocation7 + $0x3e8] sm:$0xff] }
 0x20b   :  { %v472_v56 = vpop.f32.mrb[2].mxu1  ;;  %2696 = vmatprep.subr.bf16.mxu0 %v2695_v48 }
 0x20c   :  { %v473_v61 = vadd.f32 %v472_v56, %v326_v51  ;;  %v474_v62 = vpop.f32.mrb[3].mxu1  ;;  %v659_v51 = vld [vmem:[#allocation7 + $0x330] sm:$0xff] }
 0x20d   :  { %v475_v1 = vadd.f32 %v474_v62, %v330_v54  ;;  %v664_v54 = vld [vmem:[#allocation7 + $0x358] sm:$0xff]  ;;  %v663_v62 = vld [vmem:[#allocation7 + $0x350] sm:$0xff] }
 0x20e   :  { %v479_v2 = vmax.f32 %v473_v61, 0.0  ;;  %2698 = vmatpush1.bf16.msra.mxu0 %v2697_v55  ;;  %v2723_v60 = vpack.c.bf16 %v664_v54, %v662_v53  ;;  %v661_v61 = vld [vmem:[#allocation7 + $0x340] sm:$0xff] }
 0x20f   :  { %v480_v4 = vmax.f32 %v475_v1, 0.0  ;;  %2700 = vmatprep.subr.bf16.mxu0 %v2699_v57  ;;  %v2721_v57 = vpack.c.bf16 %v659_v51, %v657_v50  ;;  %v668_v1 = vld [vmem:[#allocation7 + $0x378] sm:$0xff]  ;;  %v896_v54 = vld [vmem:[#allocation8 + $0x80] sm:$0xff] }
 0x210   :  { %v493_v7 = vrot.slane %v479_v2, 4  ;;  %v2727_v6 = vpack.c.bf16 %v668_v1, %v666_v0  ;;  %v882_v0 = vld [vmem:[#allocation8 + $0x10] sm:$0xff]  ;;  %v883_v1 = vld [vmem:[#allocation8 + $0x18] sm:$0xff] }
 0x211   :  { %v499_v10 = vrot.slane %v480_v4, 4 }
 0x212   :  { %v494_v11 = vadd.f32 %v493_v7, %v479_v2  ;;  %2702 = vmatpush1.bf16.msra.mxu0 %v2701_v3  ;;  %v667_v7 = vld [vmem:[#allocation7 + $0x370] sm:$0xff] }
 0x213   :  { %v500_v13 = vadd.f32 %v499_v10, %v480_v4  ;;  %2704 = vmatprep.subr.bf16.mxu0 %v2703_v5  ;;  %v672_v10 = vld [vmem:[#allocation7 + $0x398] sm:$0xff] }
 0x214   :  { %v495_v41 = vrot.slane %v494_v11, 2  ;;  %v2731_v15 = vpack.c.bf16 %v672_v10, %v670_v9  ;;  %v886_v9 = vld [vmem:[#allocation8 + $0x30] sm:$0xff]  ;;  %v887_v10 = vld [vmem:[#allocation8 + $0x38] sm:$0xff] }
 0x215   :  { %v501_v19 = vrot.slane %v500_v13, 2 }
 0x216   :  { %v496_v20 = vadd.f32 %v495_v41, %v494_v11  ;;  %2706 = vmatpush1.bf16.msra.mxu0 %v2705_v12  ;;  %v671_v41 = vld [vmem:[#allocation7 + $0x390] sm:$0xff] }
 0x217   :  { %v502_v22 = vadd.f32 %v501_v19, %v500_v13  ;;  %2708 = vmatprep.subr.bf16.mxu0 %v2707_v14  ;;  %v2729_v13 = vpack.c.bf16 %v667_v7, %v665_v40  ;;  %v676_v19 = vld [vmem:[#allocation7 + $0x3b8] sm:$0xff]  ;;  %v902_v40 = vld [vmem:[#allocation8 + $0xb0] sm:$0xff] }
 0x218   :  { %v497_v26 = vrot.slane %v496_v20, 1  ;;  %v2735_v24 = vpack.c.bf16 %v676_v19, %v674_v18  ;;  %v903_v7 = vld [vmem:[#allocation8 + $0xb8] sm:$0xff]  ;;  %v890_v19 = vld [vmem:[#allocation8 + $0x50] sm:$0xff] }
 0x219   :  { %v503_v29 = vrot.slane %v502_v22, 1  ;;  %v907_v18 = vld [vmem:[#allocation8 + $0xd8] sm:$0xff] }
 0x21a   :  { %v498_v30 = vadd.f32 %v497_v26, %v496_v20  ;;  %2710 = vmatpush1.bf16.msra.mxu0 %v2709_v21  ;;  %v675_v26 = vld [vmem:[#allocation7 + $0x3b0] sm:$0xff] }
 0x21b   :  { %v504_v32 = vadd.f32 %v503_v29, %v502_v22  ;;  %2712 = vmatprep.subr.bf16.mxu0 %v2711_v23  ;;  %v2733_v22 = vpack.c.bf16 %v671_v41, %v669_v16  ;;  %v680_v29 = vld [vmem:[#allocation7 + $0x3d8] sm:$0xff]  ;;  %v889_v16 = vld [vmem:[#allocation8 + $0x48] sm:$0xff] }
 0x21c   :  { %v507_v59 = vmul.f32 0.125, %v498_v30 }
 0x21d   :  { %v508_v44 = vmul.f32 0.125, %v504_v32  ;;  %v2739_v32 = vpack.c.bf16 %v680_v29, %v678_v28  ;;  %v910_v28 = vld [vmem:[#allocation8 + $0xf0] sm:$0xff]  ;;  %v911_v29 = vld [vmem:[#allocation8 + $0xf8] sm:$0xff] }
 0x21e   :  { %v3785_v45 = vsub.f32 %v479_v2, %v507_v59  ;;  %2714 = vmatpush1.bf16.msra.mxu0 %v2713_v31  ;;  %v2737_v31 = vpack.c.bf16 %v675_v26, %v673_v25  ;;  %v684_v59 = vld [vmem:[#allocation7 + $0x3f8] sm:$0xff]  ;;  %v892_v26 = vld [vmem:[#allocation8 + $0x60] sm:$0xff] }
 0x21f   :  { %v3787_v48 = vsub.f32 %v480_v4, %v508_v44  ;;  %2716 = vmatprep.subr.bf16.mxu0 %v2715_v33  ;;  %v2725_v4 = vpack.c.bf16 %v663_v62, %v661_v61  ;;  %v677_v33 = vld [vmem:[#allocation7 + $0x3c0] sm:$0xff]  ;;  %v2743_v37 = vpack.c.bf16 %v684_v59, %v682_v35  ;;  %v898_v61 = vld [vmem:[#allocation8 + $0x90] sm:$0xff]  ;;  %v899_v62 = vld [vmem:[#allocation8 + $0x98] sm:$0xff] }
 0x220   :  { %v515_v52 = vmul.f32 %v3785_v45, %v3785_v45  ;;  %v2741_v36 = vpack.c.bf16 %v679_v34, %v677_v33  ;;  %v681_v44 = vld [vmem:[#allocation7 + $0x3e0] sm:$0xff]  ;;  %v895_v33 = vld [vmem:[#allocation8 + $0x78] sm:$0xff] }
 0x221   :  { %v516_v55 = vmul.f32 %v3787_v48, %v3787_v48  ;;  %v686_v35 = vld [vmem:[#allocation2 + $0x1] ss:$8 sm:$0x3] }
 0x222   :  { %v529_v56 = vrot.slane %v515_v52, 4  ;;  %2718 = vmatpush1.bf16.msra.mxu0 %v2717_v47  ;;  %v683_v47 = vld [vmem:[#allocation7 + $0x3f0] sm:$0xff]  ;;  %v691_v59 = vrot.slane %v686_v35, %v3766_v39 }
 0x223   :  { %v535_v58 = vrot.slane %v516_v55, 4  ;;  %2720 = vmatprep.subr.bf16.mxu0 %v2719_v49  ;;  %v2745_v49 = vpack.c.bf16 %v683_v47, %v681_v44 }
 0x224   :  { %v530_v63 = vadd.f32 %v529_v56, %v515_v52 }
 0x225   :  { %v536_v2 = vadd.f32 %v535_v58, %v516_v55  ;;  %v897_v55 = vld [vmem:[#allocation8 + $0x88] sm:$0xff] }
 0x226   :  { %v531_v3 = vrot.slane %v530_v63, 2  ;;  %2722 = vmatpush1.bf16.msra.mxu0 %v2721_v57  ;;  %v2747_v56 = vpack.c.bf16 %v897_v55, %v896_v54  ;;  %v880_v57 = vld [vmem:[#allocation8] sm:$0xff]  ;;  %v881_v58 = vld [vmem:[#allocation8 + $0x8] sm:$0xff] }
 0x227   :  { %v537_v5 = vrot.slane %v536_v2, 2  ;;  %2724 = vmatprep.subr.bf16.mxu0 %v2723_v60  ;;  %v2749_v60 = vpack.c.bf16 %v881_v58, %v880_v57 }
 0x228   :  { %v532_v8 = vadd.f32 %v531_v3, %v530_v63  ;;  %2748 = vmatprep.subr.bf16.mxu1 %v2747_v56  ;;  %v2751_v63 = vpack.c.bf16 %v899_v62, %v898_v61 }
 0x229   :  { %v538_v11 = vadd.f32 %v537_v5, %v536_v2  ;;  %2750 = vmatpush3.bf16.msra.mxu1 %v2749_v60  ;;  %v2753_v2 = vpack.c.bf16 %v883_v1, %v882_v0  ;;  %v885_v5 = vld [vmem:[#allocation8 + $0x28] sm:$0xff] }
 0x22a   :  { %v533_v12 = vrot.slane %v532_v8, 1  ;;  %2726 = vmatpush1.bf16.msra.mxu0 %v2725_v4  ;;  %2752 = vmatprep.subr.bf16.mxu1 %v2751_v63  ;;  %v884_v4 = vld [vmem:[#allocation8 + $0x20] sm:$0xff] }
 0x22b   :  { %v539_v14 = vrot.slane %v538_v11, 1  ;;  %2728 = vmatprep.subr.bf16.mxu0 %v2727_v6  ;;  %v2757_v6 = vpack.c.bf16 %v885_v5, %v884_v4 }
 0x22c   :  { %v534_v17 = vadd.f32 %v533_v12, %v532_v8  ;;  %v2759_v8 = vpack.c.bf16 %v903_v7, %v902_v40  ;;  %v904_v12 = vld [vmem:[#allocation8 + $0xc0] sm:$0xff] }
 0x22d   :  { %v540_v20 = vadd.f32 %v539_v14, %v538_v11  ;;  %2754 = vmatpush3.bf16.msra.mxu1 %v2753_v2  ;;  %v2761_v11 = vpack.c.bf16 %v887_v10, %v886_v9 }
 0x22e   :  { %v543_v21 = vmul.f32 0.125, %v534_v17  ;;  %2730 = vmatpush1.bf16.msra.mxu0 %v2729_v13  ;;  %v905_v13 = vld [vmem:[#allocation8 + $0xc8] sm:$0xff]  ;;  %v906_v17 = vld [vmem:[#allocation8 + $0xd0] sm:$0xff] }
 0x22f   :  { %v544_v23 = vmul.f32 0.125, %v540_v20  ;;  %2732 = vmatprep.subr.bf16.mxu0 %v2731_v15  ;;  %v2763_v14 = vpack.c.bf16 %v905_v13, %v904_v12  ;;  %v888_v15 = vld [vmem:[#allocation8 + $0x40] sm:$0xff]  ;;  %v2767_v20 = vpack.c.bf16 %v907_v18, %v906_v17 }
 0x230   :  { %v547_v27 = vadd.f32 1e-05, %v543_v21  ;;  %v2765_v41 = vpack.c.bf16 %v889_v16, %v888_v15  ;;  %v891_v21 = vld [vmem:[#allocation8 + $0x58] sm:$0xff] }
 0x231   :  { %v548_v30 = vadd.f32 1e-05, %v544_v23  ;;  %v909_v23 = vld [vmem:[#allocation8 + $0xe8] sm:$0xff] }
 0x232   :  { %3203 = vrsqrt.f32 %v547_v27  ;;  %2734 = vmatpush1.bf16.msra.mxu0 %v2733_v22  ;;  %v908_v22 = vld [vmem:[#allocation8 + $0xe0] sm:$0xff]  ;;  %v893_v27 = vld [vmem:[#allocation8 + $0x68] sm:$0xff] }
 0x233   :  { %2736 = vmatprep.subr.bf16.mxu0 %v2735_v24  ;;  %3205 = vrsqrt.f32 %v548_v30  ;;  %v2769_v24 = vpack.c.bf16 %v891_v21, %v890_v19  ;;  %v2771_v25 = vpack.c.bf16 %v909_v23, %v908_v22  ;;  %v2773_v30 = vpack.c.bf16 %v893_v27, %v892_v26  ;;  %v1003_v23 = vld [vmem:[%s3921_s6] sm:$0xff]  ;;  %v1005_v27 = vld [vmem:[%s3921_s6 + $0x10] sm:$0xff] }
 0x234   :  { %v3513_v26 = vmov 0.0|0.0  }
 0x236   :  { %2738 = vmatpush1.bf16.msra.mxu0 %v2737_v31  ;;  %v2775_v31 = vpack.c.bf16 %v911_v29, %v910_v28  ;;  %v1006_v28 = vld [vmem:[%s3921_s6 + $0x18] sm:$0xff] }
 0x237   :  { %2740 = vmatprep.subr.bf16.mxu0 %v2739_v32  ;;  %v894_v32 = vld [vmem:[#allocation8 + $0x70] sm:$0xff]  ;;  %v2783_v29 = vpack.c.bf16 %v1006_v28, %v1005_v27  ;;  %v1119_v28 = vld [vmem:[#allocation10 + $0x48] sm:$0xff] }
 0x238   :  { %v2777_v34 = vpack.c.bf16 %v895_v33, %v894_v32  ;;  %v1009_v33 = vld [vmem:[%s3921_s6 + $0x30] sm:$0xff] }
 0x23a   :  { %2742 = vmatpush1.bf16.msra.mxu0 %v2741_v36  ;;  %v695_v36 = vrot.slane %v686_v35, %v3771_v42 }
 0x23b   :  { %2744 = vmatprep.subr.bf16.mxu0 %v2743_v37 }
 0x23c   :  { %v3204_v50 = vpop.eup %3203 }
 0x23d   :  { %v3206_v51 = vpop.eup %3205  ;;  %v555_v53 = vmul.f32 %v3204_v50, %v3785_v45  ;;  %v901_v45 = vld [vmem:[#allocation8 + $0xa8] sm:$0xff] }
 0x23e   :  { %2746 = vmatpush1.bf16.msra.mxu0 %v2745_v49  ;;  %v556_v52 = vmul.f32 %v3206_v51, %v3787_v48  ;;  %v900_v48 = vld [vmem:[#allocation8 + $0xa0] sm:$0xff] }
 0x23f   :  { %v2755_v3 = vpack.c.bf16 %v901_v45, %v900_v48  ;;  %2859 = vmatprep.subr.bf16.mxu0 %v3513_v26 }
 0x240   :  { %833 = vmatprep.mubr.f32.mxu0 %v556_v52 }
 0x241   :  { %834 = vmatmul.mubr.f32.vlgmr.msra.gmra.mrb[0].mxu0 %v555_v53  ;;  %2756 = vmatprep.subr.bf16.mxu1 %v2755_v3 }
 0x242   :  { %2758 = vmatpush3.bf16.msra.mxu1 %v2757_v6 }
 0x243   :  { %2760 = vmatprep.subr.bf16.mxu1 %v2759_v8 }
 0x246   :  { %2762 = vmatpush3.bf16.msra.mxu1 %v2761_v11 }
 0x247   :  { %2764 = vmatprep.subr.bf16.mxu1 %v2763_v14 }
 0x24a   :  { %2766 = vmatpush3.bf16.msra.mxu1 %v2765_v41 }
 0x24b   :  { %2768 = vmatprep.subr.bf16.mxu1 %v2767_v20 }
 0x24e   :  { %2770 = vmatpush3.bf16.msra.mxu1 %v2769_v24  ;;  %v1004_v24 = vld [vmem:[%s3921_s6 + $0x8] sm:$0xff] }
 0x24f   :  { %2772 = vmatprep.subr.bf16.mxu1 %v2771_v25  ;;  %v2780_v25 = vpack.c.bf16 %v1004_v24, %v1003_v23  ;;  %v1114_v24 = vld [vmem:[#allocation10 + $0x20] sm:$0xff] }
 0x252   :  { %2774 = vmatpush3.bf16.msra.mxu1 %v2773_v30  ;;  %v1007_v30 = vld [vmem:[%s3921_s6 + $0x20] sm:$0xff] }
 0x253   :  { %2776 = vmatprep.subr.bf16.mxu1 %v2775_v31  ;;  %v1008_v31 = vld [vmem:[%s3921_s6 + $0x28] sm:$0xff] }
 0x254   :  { %v2786_v32 = vpack.c.bf16 %v1008_v31, %v1007_v30  ;;  %v1118_v31 = vld [vmem:[#allocation10 + $0x40] sm:$0xff] }
 0x256   :  { %2778 = vmatpush3.bf16.msra.mxu1 %v2777_v34  ;;  %v1010_v34 = vld [vmem:[%s3921_s6 + $0x38] sm:$0xff] }
 0x257   :  { %2779 = vmatprep.subr.bf16.mxu1 %v3513_v26  ;;  %v2789_v35 = vpack.c.bf16 %v1010_v34, %v1009_v33  ;;  %v1123_v34 = vld [vmem:[#allocation10 + $0x68] sm:$0xff] }
 0x314   :  { %v835_v37 = vpop.f32.mrb[0].mxu0 }
 0x315   :  { %v3171_v44 = vadd.f32 %v835_v37, %v691_v59  ;;  %v837_v47 = vpop.f32.mrb[1].mxu0  ;;  %v1011_v59 = vld [vmem:[%s3921_s6 + $0x40] sm:$0xff] }
 0x316   :  { %v3172_v49 = vadd.f32 %v837_v47, %v695_v36  ;;  %v1012_v36 = vld [vmem:[%s3921_s6 + $0x48] sm:$0xff]  ;;  %v1014_v47 = vld [vmem:[%s3921_s6 + $0x58] sm:$0xff] }
 0x317   :  { %v840_v50 = vmax.f32 %v3171_v44, 0.0  ;;  %v2792_v37 = vpack.c.bf16 %v1012_v36, %v1011_v59  ;;  %v1013_v44 = vld [vmem:[%s3921_s6 + $0x50] sm:$0xff]  ;;  %v1122_v36 = vld [vmem:[#allocation10 + $0x60] sm:$0xff] }
 0x318   :  { %v841_v51 = vmax.f32 %v3172_v49, 0.0  ;;  %v2795_v49 = vpack.c.bf16 %v1014_v47, %v1013_v44  ;;  %v1127_v47 = vld [vmem:[#allocation10 + $0x88] sm:$0xff] }
 0x319   :  { %v842_v52 = vrot.slane %v840_v50, 4 }
 0x31a   :  { %v848_v53 = vrot.slane %v841_v51, 4 }
 0x31b   :  { %v843_v54 = vadd.f32 %v842_v52, %v840_v50  ;;  %v3515_v52 = vmov 0.0  }
 0x31c   :  { %v849_v55 = vadd.f32 %v848_v53, %v841_v51  ;;  %2488 = vmatprep.mubr.msk.f32.mxu0 %vm3514_vm0, %v3515_v52 }
 0x31d   :  { %v844_v56 = vrot.slane %v843_v54, 2 }
 0x31e   :  { %v850_v57 = vrot.slane %v849_v55, 2 }
 0x31f   :  { %v845_v58 = vadd.f32 %v844_v56, %v843_v54  ;;  %v1017_v54 = vld [vmem:[%s3921_s6 + $0x70] sm:$0xff] }
 0x320   :  { %v851_v60 = vadd.f32 %v850_v57, %v849_v55  ;;  %v1018_v55 = vld [vmem:[%s3921_s6 + $0x78] sm:$0xff] }
 0x321   :  { %v846_v61 = vrot.slane %v845_v58, 1  ;;  %v2801_v56 = vpack.c.bf16 %v1018_v55, %v1017_v54  ;;  %v1131_v55 = vld [vmem:[#allocation10 + $0xa8] sm:$0xff] }
 0x322   :  { %v852_v62 = vrot.slane %v851_v60, 1 }
 0x323   :  { %v847_v63 = vadd.f32 %v846_v61, %v845_v58  ;;  %v912_v58 = vld [vmem:[#allocation2 + $0x2] ss:$0 sm:$0xff] }
 0x324   :  { %v853_v0 = vadd.f32 %v852_v62, %v851_v60 }
 0x325   :  { %v854_v1 = vmul.f32 0.125, %v847_v63 }
 0x326   :  { %v855_v2 = vmul.f32 0.125, %v853_v0 }
 0x327   :  { %v856_v48 = vsub.f32 %v840_v50, %v854_v1  ;;  %v1015_v50 = vld [vmem:[%s3921_s6 + $0x60] sm:$0xff] }
 0x328   :  { %v857_v45 = vsub.f32 %v841_v51, %v855_v2  ;;  %v1016_v51 = vld [vmem:[%s3921_s6 + $0x68] sm:$0xff] }
 0x329   :  { %v858_v3 = vmul.f32 %v856_v48, %v856_v48  ;;  %v2798_v53 = vpack.c.bf16 %v1016_v51, %v1015_v50  ;;  %v1126_v51 = vld [vmem:[#allocation10 + $0x80] sm:$0xff] }
 0x32a   :  { %v859_v4 = vmul.f32 %v857_v45, %v857_v45 }
 0x32b   :  { %v860_v5 = vrot.slane %v858_v3, 4 }
 0x32c   :  { %v866_v6 = vrot.slane %v859_v4, 4 }
 0x32d   :  { %v861_v40 = vadd.f32 %v860_v5, %v858_v3 }
 0x32e   :  { %v867_v7 = vadd.f32 %v866_v6, %v859_v4 }
 0x32f   :  { %v862_v8 = vrot.slane %v861_v40, 2 }
 0x330   :  { %v868_v9 = vrot.slane %v867_v7, 2 }
 0x331   :  { %v863_v10 = vadd.f32 %v862_v8, %v861_v40 }
 0x332   :  { %v869_v11 = vadd.f32 %v868_v9, %v867_v7 }
 0x333   :  { %v864_v12 = vrot.slane %v863_v10, 1 }
 0x334   :  { %v870_v13 = vrot.slane %v869_v11, 1 }
 0x335   :  { %v865_v14 = vadd.f32 %v864_v12, %v863_v10 }
 0x336   :  { %v871_v15 = vadd.f32 %v870_v13, %v869_v11 }
 0x337   :  { %v872_v16 = vmul.f32 0.125, %v865_v14 }
 0x338   :  { %v873_v41 = vmul.f32 0.125, %v871_v15 }
 0x339   :  { %v874_v17 = vadd.f32 1e-05, %v872_v16  ;;  %v1111_v16 = vld [vmem:[#allocation10 + $0x8] sm:$0xff] }
 0x33a   :  { %v875_v18 = vadd.f32 1e-05, %v873_v41  ;;  %v1113_v41 = vld [vmem:[#allocation10 + $0x18] sm:$0xff] }
 0x33b   :  { %3207 = vrsqrt.f32 %v874_v17  ;;  %v2803_v17 = vpack.c.bf16 %v1113_v41, %v1111_v16 }
 0x33c   :  { %3209 = vrsqrt.f32 %v875_v18  ;;  %v1110_v18 = vld [vmem:[#allocation10] sm:$0xff] }
 0x345   :  { %v3208_v19 = vpop.eup %3207 }
 0x346   :  { %v3210_v20 = vpop.eup %3209  ;;  %v878_v22 = vmul.f32 %v3208_v19, %v856_v48  ;;  %v1112_v19 = vld [vmem:[#allocation10 + $0x10] sm:$0xff] }
 0x347   :  { %v879_v21 = vmul.f32 %v3210_v20, %v857_v45  ;;  %v2805_v20 = vpack.c.bf16 %v1112_v19, %v1110_v18 }
 0x349   :  { %977 = vmatprep.mubr.f32.mxu1 %v879_v21  ;;  %v1115_v21 = vld [vmem:[#allocation10 + $0x28] sm:$0xff] }
 0x34a   :  { %978 = vmatmul.mubr.f32.vlgmr.msra.gmra.mrb[4].mxu1 %v878_v22  ;;  %v1117_v22 = vld [vmem:[#allocation10 + $0x38] sm:$0xff] }
 0x34b   :  { %2781 = vmatpush3.bf16.msra.mxu1 %v2780_v25  ;;  %2418 = vmatprep.mubr.msk.f32.mxu1 %vm3514_vm0, %v3515_v52  ;;  %v2807_v23 = vpack.c.bf16 %v1117_v22, %v1115_v21  ;;  %v1116_v25 = vld [vmem:[#allocation10 + $0x30] sm:$0xff] }
 0x34c   :  { %2782 = vmatprep.subr.bf16.mxu1 %v3513_v26  ;;  %v2809_v27 = vpack.c.bf16 %v1116_v25, %v1114_v24 }
 0x34f   :  { %2784 = vmatpush3.bf16.msra.mxu1 %v2783_v29  ;;  %v1121_v29 = vld [vmem:[#allocation10 + $0x58] sm:$0xff] }
 0x350   :  { %2785 = vmatprep.subr.bf16.mxu1 %v3513_v26  ;;  %v2811_v30 = vpack.c.bf16 %v1121_v29, %v1119_v28  ;;  %v1234_v29 = vld [vmem:[#allocation11] sm:$0xff] }
 0x353   :  { %2787 = vmatpush3.bf16.msra.mxu1 %v2786_v32  ;;  %v1120_v32 = vld [vmem:[#allocation10 + $0x50] sm:$0xff] }
 0x354   :  { %2788 = vmatprep.subr.bf16.mxu1 %v3513_v26  ;;  %v2813_v33 = vpack.c.bf16 %v1120_v32, %v1118_v31 }
 0x357   :  { %2790 = vmatpush3.bf16.msra.mxu1 %v2789_v35  ;;  %v1125_v35 = vld [vmem:[#allocation10 + $0x78] sm:$0xff] }
 0x358   :  { %2791 = vmatprep.subr.bf16.mxu1 %v3513_v26  ;;  %v2815_v59 = vpack.c.bf16 %v1125_v35, %v1123_v34  ;;  %v1236_v34 = vld [vmem:[#allocation11 + $0x10] sm:$0xff]  ;;  %v1237_v35 = vld [vmem:[#allocation11 + $0x18] sm:$0xff] }
 0x35b   :  { %2793 = vmatpush3.bf16.msra.mxu1 %v2792_v37  ;;  %v1124_v37 = vld [vmem:[#allocation10 + $0x70] sm:$0xff] }
 0x35c   :  { %2794 = vmatprep.subr.bf16.mxu1 %v3513_v26  ;;  %v2817_v44 = vpack.c.bf16 %v1124_v37, %v1122_v36  ;;  %v1238_v36 = vld [vmem:[#allocation11 + $0x20] sm:$0xff]  ;;  %v1239_v37 = vld [vmem:[#allocation11 + $0x28] sm:$0xff] }
 0x35f   :  { %2796 = vmatpush3.bf16.msra.mxu1 %v2795_v49  ;;  %v1129_v49 = vld [vmem:[#allocation10 + $0x98] sm:$0xff] }
 0x360   :  { %2797 = vmatprep.subr.bf16.mxu1 %v3513_v26  ;;  %v2819_v50 = vpack.c.bf16 %v1129_v49, %v1127_v47  ;;  %v1240_v47 = vld [vmem:[#allocation11 + $0x30] sm:$0xff]  ;;  %v1241_v49 = vld [vmem:[#allocation11 + $0x38] sm:$0xff] }
 0x363   :  { %2799 = vmatpush3.bf16.msra.mxu1 %v2798_v53  ;;  %v1128_v53 = vld [vmem:[#allocation10 + $0x90] sm:$0xff] }
 0x364   :  { %2800 = vmatprep.subr.bf16.mxu1 %v3513_v26  ;;  %v2821_v54 = vpack.c.bf16 %v1128_v53, %v1126_v51  ;;  %v1242_v51 = vld [vmem:[#allocation11 + $0x40] sm:$0xff]  ;;  %v1243_v53 = vld [vmem:[#allocation11 + $0x48] sm:$0xff] }
 0x367   :  { %2802 = vmatpush3.bf16.msra.mxu1 %v2801_v56  ;;  %v1133_v56 = vld [vmem:[#allocation10 + $0xb8] sm:$0xff] }
 0x368   :  { %2804 = vmatprep.subr.bf16.mxu1 %v2803_v17 }
 0x41d   :  { %v2332_v57 = vpop.f32.mrb[4].mxu1 }
 0x41e   :  { %v2333_v60 = vpop.f32.mrb[5].mxu1 }
 0x41f   :  { %v2334_v61 = vadd.f32 %v2333_v60, %v2332_v57  ;;  %v2823_v57 = vpack.c.bf16 %v1133_v56, %v1131_v55  ;;  %v1132_v60 = vld [vmem:[#allocation10 + $0xb0] sm:$0xff]  ;;  %v1245_v56 = vld [vmem:[#allocation11 + $0x58] sm:$0xff] }
 0x420   :  { %v1244_v55 = vld [vmem:[#allocation11 + $0x50] sm:$0xff] }
 0x421   :  { %v980_v62 = vadd.f32 %v2334_v61, %v912_v58  ;;  %v1130_v58 = vld [vmem:[#allocation10 + $0xa0] sm:$0xff] }
 0x422   :  { %v2825_v61 = vpack.c.bf16 %v1132_v60, %v1130_v58  ;;  %v1246_v58 = vld [vmem:[#allocation11 + $0x60] sm:$0xff]  ;;  %v1247_v60 = vld [vmem:[#allocation11 + $0x68] sm:$0xff] }
 0x423   :  { %v983_v63 = vmax.f32 %v980_v62, 0.0  ;;  %v1135_v62 = vld [vmem:[#allocation10 + $0xc8] sm:$0xff] }
 0x425   :  { %v984_v0 = vrot.slane %v983_v63, 4 }
 0x427   :  { %v985_v1 = vadd.f32 %v984_v0, %v983_v63  ;;  %v1134_v0 = vld [vmem:[#allocation10 + $0xc0] sm:$0xff] }
 0x429   :  { %v986_v2 = vrot.slane %v985_v1, 2 }
 0x42b   :  { %v987_v48 = vadd.f32 %v986_v2, %v985_v1  ;;  %v1136_v2 = vld [vmem:[#allocation10 + $0xd0] sm:$0xff] }
 0x42d   :  { %v988_v45 = vrot.slane %v987_v48, 1 }
 0x42f   :  { %v989_v3 = vadd.f32 %v988_v45, %v987_v48  ;;  %v1139_v48 = vld [vmem:[#allocation10 + $0xe8] sm:$0xff]  ;;  %v1141_v45 = vld [vmem:[#allocation10 + $0xf8] sm:$0xff] }
 0x431   :  { %v990_v4 = vmul.f32 0.125, %v989_v3  ;;  %v2829_v3 = vpack.c.bf16 %v1136_v2, %v1134_v0 }
 0x433   :  { %v991_v5 = vsub.f32 %v983_v63, %v990_v4  ;;  %v1137_v63 = vld [vmem:[#allocation10 + $0xd8] sm:$0xff]  ;;  %v2831_v4 = vpack.c.bf16 %v1141_v45, %v1139_v48 }
 0x434   :  { %v2827_v1 = vpack.c.bf16 %v1137_v63, %v1135_v62  ;;  %v1248_v62 = vld [vmem:[#allocation11 + $0x70] sm:$0xff]  ;;  %v1249_v63 = vld [vmem:[#allocation11 + $0x78] sm:$0xff] }
 0x435   :  { %v992_v6 = vmul.f32 %v991_v5, %v991_v5  ;;  %v2857_v0 = vpack.c.bf16 %v1249_v63, %v1248_v62 }
 0x437   :  { %v993_v40 = vrot.slane %v992_v6, 4 }
 0x439   :  { %v994_v7 = vadd.f32 %v993_v40, %v992_v6  ;;  %v1140_v6 = vld [vmem:[#allocation10 + $0xf0] sm:$0xff] }
 0x43b   :  { %v995_v8 = vrot.slane %v994_v7, 2 }
 0x43d   :  { %v996_v9 = vadd.f32 %v995_v8, %v994_v7  ;;  %v1019_v7 = vld [vmem:[#allocation2 + $0x3] ss:$0 sm:$0xff] }
 0x43f   :  { %v997_v10 = vrot.slane %v996_v9, 1 }
 0x441   :  { %v998_v11 = vadd.f32 %v997_v10, %v996_v9 }
 0x443   :  { %v999_v12 = vmul.f32 0.125, %v998_v11 }
 0x445   :  { %v1000_v13 = vadd.f32 1e-05, %v999_v12 }
 0x447   :  { %3211 = vrsqrt.f32 %v1000_v13 }
 0x451   :  { %v3212_v14 = vpop.eup %3211 }
 0x452   :  { %v1002_v15 = vmul.f32 %v3212_v14, %v991_v5  ;;  %v1138_v5 = vld [vmem:[#allocation10 + $0xe0] sm:$0xff] }
 0x453   :  { %v2833_v40 = vpack.c.bf16 %v1140_v6, %v1138_v5 }
 0x454   :  { %2419 = vmatmul.mubr.f32.vlgmr.msra.gmra.mrb[6].mxu1 %v1002_v15 }
 0x455   :  { %1219 = vmatprep.mubr.f32.mxu1 %v3515_v52  ;;  %2806 = vmatpush1.bf16.msra.mxu1 %v2805_v20 }
 0x456   :  { %2808 = vmatprep.subr.bf16.mxu1 %v2807_v23 }
 0x459   :  { %2810 = vmatpush1.bf16.msra.mxu1 %v2809_v27 }
 0x45a   :  { %2812 = vmatprep.subr.bf16.mxu1 %v2811_v30  ;;  %v1235_v30 = vld [vmem:[#allocation11 + $0x8] sm:$0xff] }
 0x45b   :  { %v2836_v32 = vpack.c.bf16 %v1235_v30, %v1234_v29  ;;  %v1354_v29 = vld [vmem:[#allocation13 + $0x68] sm:$0xff] }
 0x45d   :  { %2814 = vmatpush1.bf16.msra.mxu1 %v2813_v33 }
 0x45e   :  { %2816 = vmatprep.subr.bf16.mxu1 %v2815_v59  ;;  %v2839_v59 = vpack.c.bf16 %v1237_v35, %v1236_v34  ;;  %v1250_v34 = vld [vmem:[#allocation2 + $0x5] ss:$0 sm:$0xff] }
 0x461   :  { %2818 = vmatpush1.bf16.msra.mxu1 %v2817_v44  ;;  %v2842_v44 = vpack.c.bf16 %v1239_v37, %v1238_v36 }
 0x462   :  { %2820 = vmatprep.subr.bf16.mxu1 %v2819_v50  ;;  %v2845_v50 = vpack.c.bf16 %v1241_v49, %v1240_v47 }
 0x465   :  { %2822 = vmatpush1.bf16.msra.mxu1 %v2821_v54  ;;  %v2848_v54 = vpack.c.bf16 %v1243_v53, %v1242_v51 }
 0x466   :  { %2824 = vmatprep.subr.bf16.mxu1 %v2823_v57  ;;  %v2851_v57 = vpack.c.bf16 %v1245_v56, %v1244_v55 }
 0x469   :  { %2826 = vmatpush1.bf16.msra.mxu1 %v2825_v61  ;;  %v2854_v61 = vpack.c.bf16 %v1247_v60, %v1246_v58 }
 0x46a   :  { %2828 = vmatprep.subr.bf16.mxu1 %v2827_v1  ;;  %v1143_v1 = vld [vmem:[#allocation2 + $0x4] ss:$8 sm:$0x3] }
 0x46b   :  { %v1148_v2 = vrot.slane %v1143_v1, %v3766_v39  ;;  %v1152_v48 = vrot.slane %v1143_v1, %v3771_v42 }
 0x46d   :  { %2830 = vmatpush1.bf16.msra.mxu1 %v2829_v3 }
 0x46e   :  { %2832 = vmatprep.subr.bf16.mxu1 %v2831_v4 }
 0x471   :  { %2834 = vmatpush1.bf16.msra.mxu1 %v2833_v40 }
 0x472   :  { %2835 = vmatprep.subr.bf16.mxu1 %v3513_v26 }
 0x527   :  { %v1086_v8 = vpop.f32.mrb[6].mxu1 }
 0x528   :  { %v1087_v9 = vadd.f32 %v1086_v8, %v1019_v7  ;;  %v2420_v10 = vpop.f32.mrb[7].mxu1  ;;  %v1231_v7 = vld [vmem:[%s3916_s1] sm:$0xff]  ;;  %s3516_s1 = smov [#allocation19]  }
 0x52a   :  { %v1090_v11 = vmax.f32 %v1087_v9, 0.0 }
 0x52c   :  { %v1091_v12 = vrot.slane %v1090_v11, 4 }
 0x52e   :  { %v1092_v13 = vadd.f32 %v1091_v12, %v1090_v11  ;;  %v1342_v12 = vld [vmem:[#allocation13 + $0x8] sm:$0xff] }
 0x530   :  { %v1093_v14 = vrot.slane %v1092_v13, 2 }
 0x532   :  { %v1094_v15 = vadd.f32 %v1093_v14, %v1092_v13  ;;  %v1343_v14 = vld [vmem:[#allocation13 + $0x10] sm:$0xff] }
 0x534   :  { %v1095_v16 = vrot.slane %v1094_v15, 1 }
 0x536   :  { %v1096_v41 = vadd.f32 %v1095_v16, %v1094_v15  ;;  %v1344_v15 = vld [vmem:[#allocation13 + $0x18] sm:$0xff] }
 0x537   :  { %v2863_v16 = vpack.c.bf16 %v1344_v15, %v1343_v14  ;;  %v1456_v15 = vld [vmem:[#allocation14 + $0x40] sm:$0xff] }
 0x538   :  { %v1097_v17 = vmul.f32 0.125, %v1096_v41  ;;  %v1345_v41 = vld [vmem:[#allocation13 + $0x20] sm:$0xff] }
 0x53a   :  { %v1098_v18 = vsub.f32 %v1090_v11, %v1097_v17  ;;  %v1341_v11 = vld [vmem:[#allocation13] sm:$0xff]  ;;  %v1346_v17 = vld [vmem:[#allocation13 + $0x28] sm:$0xff] }
 0x53b   :  { %v2860_v13 = vpack.c.bf16 %v1342_v12, %v1341_v11  ;;  %v1457_v12 = vld [vmem:[#allocation14 + $0x48] sm:$0xff] }
 0x53c   :  { %v1099_v19 = vmul.f32 %v1098_v18, %v1098_v18 }
 0x53d   :  { %2861 = vmatpush3.bf16.msra.mxu0 %v2860_v13  ;;  %v1459_v13 = vld [vmem:[#allocation14 + $0x58] sm:$0xff] }
 0x53e   :  { %v1100_v20 = vrot.slane %v1099_v19, 4  ;;  %2862 = vmatprep.subr.bf16.mxu0 %v3513_v26  ;;  %v2891_v14 = vpack.c.bf16 %v1459_v13, %v1457_v12 }
 0x540   :  { %v1101_v21 = vadd.f32 %v1100_v20, %v1099_v19  ;;  %v1347_v19 = vld [vmem:[#allocation13 + $0x30] sm:$0xff] }
 0x541   :  { %2864 = vmatpush3.bf16.msra.mxu0 %v2863_v16  ;;  %v1458_v16 = vld [vmem:[#allocation14 + $0x50] sm:$0xff] }
 0x542   :  { %v1102_v22 = vrot.slane %v1101_v21, 2  ;;  %2865 = vmatprep.subr.bf16.mxu0 %v3513_v26 }
 0x544   :  { %v1103_v23 = vadd.f32 %v1102_v22, %v1101_v21  ;;  %v1349_v21 = vld [vmem:[#allocation13 + $0x40] sm:$0xff]  ;;  %v1350_v22 = vld [vmem:[#allocation13 + $0x48] sm:$0xff] }
 0x546   :  { %v1104_v24 = vrot.slane %v1103_v23, 1 }
 0x548   :  { %v1105_v25 = vadd.f32 %v1104_v24, %v1103_v23  ;;  %v2872_v23 = vpack.c.bf16 %v1350_v22, %v1349_v21  ;;  %v1351_v24 = vld [vmem:[#allocation13 + $0x50] sm:$0xff]  ;;  %v1465_v22 = vld [vmem:[#allocation14 + $0x88] sm:$0xff] }
 0x54a   :  { %v1106_v27 = vmul.f32 0.125, %v1105_v25  ;;  %v1352_v25 = vld [vmem:[#allocation13 + $0x58] sm:$0xff] }
 0x54c   :  { %v1107_v28 = vadd.f32 1e-05, %v1106_v27  ;;  %v2875_v27 = vpack.c.bf16 %v1352_v25, %v1351_v24  ;;  %v1464_v25 = vld [vmem:[#allocation14 + $0x80] sm:$0xff] }
 0x54e   :  { %3213 = vrsqrt.f32 %v1107_v28  ;;  %v1353_v28 = vld [vmem:[#allocation13 + $0x60] sm:$0xff] }
 0x54f   :  { %v2878_v30 = vpack.c.bf16 %v1354_v29, %v1353_v28  ;;  %v1469_v29 = vld [vmem:[#allocation14 + $0xa8] sm:$0xff] }
 0x558   :  { %v3214_v31 = vpop.eup %3213 }
 0x559   :  { %v1109_v33 = vmul.f32 %v3214_v31, %v1098_v18  ;;  %v2866_v18 = vpack.c.bf16 %v1346_v17, %v1345_v41  ;;  %v1355_v31 = vld [vmem:[#allocation13 + $0x70] sm:$0xff]  ;;  %v2893_v41 = vpack.c.bf16 %v1458_v16, %v1456_v15  ;;  %v1461_v17 = vld [vmem:[#allocation14 + $0x68] sm:$0xff] }
 0x55b   :  { %1220 = vmatmul.mubr.f32.vlgmr.msra.gmra.mrb[8].mxu1 %v1109_v33  ;;  %2867 = vmatpush3.bf16.msra.mxu0 %v2866_v18  ;;  %v1463_v18 = vld [vmem:[#allocation14 + $0x78] sm:$0xff] }
 0x55c   :  { %2837 = vmatpush3.bf16.msra.mxu1 %v2836_v32  ;;  %2453 = vmatprep.mubr.msk.f32.mxu1 %vm3514_vm0, %v3515_v52  ;;  %v1356_v32 = vld [vmem:[#allocation13 + $0x78] sm:$0xff] }
 0x55d   :  { %2838 = vmatprep.subr.bf16.mxu1 %v3513_v26  ;;  %2868 = vmatprep.subr.bf16.mxu0 %v3513_v26  ;;  %v2881_v33 = vpack.c.bf16 %v1356_v32, %v1355_v31  ;;  %v1468_v32 = vld [vmem:[#allocation14 + $0xa0] sm:$0xff] }
 0x560   :  { %2840 = vmatpush3.bf16.msra.mxu1 %v2839_v59 }
 0x561   :  { %2841 = vmatprep.subr.bf16.mxu1 %v3513_v26 }
 0x564   :  { %2843 = vmatpush3.bf16.msra.mxu1 %v2842_v44 }
 0x565   :  { %2844 = vmatprep.subr.bf16.mxu1 %v3513_v26 }
 0x568   :  { %2846 = vmatpush3.bf16.msra.mxu1 %v2845_v50 }
 0x569   :  { %2847 = vmatprep.subr.bf16.mxu1 %v3513_v26 }
 0x56c   :  { %2849 = vmatpush3.bf16.msra.mxu1 %v2848_v54 }
 0x56d   :  { %2850 = vmatprep.subr.bf16.mxu1 %v3513_v26 }
 0x570   :  { %2852 = vmatpush3.bf16.msra.mxu1 %v2851_v57 }
 0x571   :  { %2853 = vmatprep.subr.bf16.mxu1 %v3513_v26 }
 0x574   :  { %2855 = vmatpush3.bf16.msra.mxu1 %v2854_v61 }
 0x575   :  { %2856 = vmatprep.subr.bf16.mxu1 %v3513_v26 }
 0x578   :  { %2858 = vmatpush3.bf16.msra.mxu1 %v2857_v0 }
 0x62e   :  { %v1221_v45 = vpop.f32.mrb[8].mxu1 }
 0x62f   :  { %v1222_v3 = vadd.f32 %v1221_v45, %v1148_v2  ;;  %v1223_v4 = vpop.f32.mrb[9].mxu1  ;;  %v1451_v45 = vld [vmem:[#allocation14 + $0x18] sm:$0xff] }
 0x630   :  { %v1224_v5 = vadd.f32 %v1223_v4, %v1152_v48  ;;  %v1449_v48 = vld [vmem:[#allocation14 + $0x8] sm:$0xff]  ;;  %v1448_v4 = vld [vmem:[#allocation14] sm:$0xff] }
 0x631   :  { %1226 = vst [vmem:[%s3929_s14] sm:$0xff] %v1222_v3 }
 0x632   :  { %1227 = vst [vmem:[%s3929_s14 + $0x8] sm:$0xff] %v1224_v5  ;;  %v1228_v6 = vmul.f32 0.5, %v1224_v5  ;;  %v1450_v5 = vld [vmem:[#allocation14 + $0x10] sm:$0xff]  ;;  %s2280_s14 = sshll.u32 %s3516_s1, 4  ;;  %s2281_s14 = int_to_ptr.vmem [resolvable:$true] %s2280_s14 }
 0x633   :  { %s3461_s3 = scalar_lea.vmem %s2281_s14, 256  ;;  %p3466_p11 = scmp.lt.s32.totalorder %s2281_s14, %s2281_s14 }
 0x634   :  { %v1229_v40 = vmul.f32 1.442695, %v1228_v6  ;;  %v2885_v6 = vpack.c.bf16 %v1450_v5, %v1448_v4  ;;  %v1621_v5 = vld [vmem:[#allocation16 + $0x88] sm:$0xff]  ;;  %p3462_p10 = scmp.ne.s32.totalorder %s2281_s14, %s3461_s3  ;;  %p3467_p12 = scmp.lt.s32.totalorder %s3461_s3, %s3461_s3 }
 0x636   :  { %3215 = vpow2.f32 %v1229_v40  ;;  %v1453_v40 = vld [vmem:[#allocation14 + $0x28] sm:$0xff]  ;;  %p3468_p13 = por %p3467_p12, %p3466_p11 }
 0x638   :  { %p3469_p0 = pnand %p3468_p13, %p3462_p10 }
 0x640   :  { %v3216_v8 = vpop.eup %3215 }
 0x641   :  { %v1232_v9 = vmul.f32 %v3216_v8, %v1231_v7  ;;  %v1455_v7 = vld [vmem:[#allocation14 + $0x38] sm:$0xff] }
 0x642   :  { %v2887_v8 = vpack.c.bf16 %v1455_v7, %v1453_v40  ;;  %v1620_v7 = vld [vmem:[#allocation16 + $0x80] sm:$0xff] }
 0x643   :  { %v1233_v10 = vadd.f32 %v1232_v9, %v1222_v3  ;;  %v2883_v3 = vpack.c.bf16 %v1451_v45, %v1449_v48  ;;  %v1452_v9 = vld [vmem:[#allocation14 + $0x20] sm:$0xff] }
 0x644   :  { %v1612_v45 = vld [vmem:[#allocation16 + $0x40] sm:$0xff] }
 0x645   :  { %2454 = vmatmul.mubr.f32.vlgmr.msra.gmra.mrb[10].mxu1 %v1233_v10  ;;  %2884 = vmatprep.subr.bf16.mxu1 %v2883_v3  ;;  %v1454_v10 = vld [vmem:[#allocation14 + $0x30] sm:$0xff]  ;;  %v1616_v3 = vld [vmem:[#allocation16 + $0x60] sm:$0xff] }
 0x646   :  { %1557 = vmatprep.mubr.f32.mxu1 %v3515_v52  ;;  %v1348_v52 = vld [vmem:[#allocation13 + $0x38] sm:$0xff]  ;;  %2886 = vmatpush1.bf16.msra.mxu1 %v2885_v6  ;;  %v2889_v11 = vpack.c.bf16 %v1454_v10, %v1452_v9  ;;  %v2921_v4 = vpack.c.bf16 %v1616_v3, %v1612_v45  ;;  %v1625_v6 = vld [vmem:[#allocation16 + $0xa8] sm:$0xff]  ;;  %v1357_v10 = vld [vmem:[#allocation2 + $0x6] ss:$0 sm:$0xff] }
 0x647   :  { %v2869_v20 = vpack.c.bf16 %v1348_v52, %v1347_v19  ;;  %2888 = vmatprep.subr.bf16.mxu1 %v2887_v8  ;;  %v2895_v19 = vpack.c.bf16 %v1463_v18, %v1461_v17  ;;  %v1460_v52 = vld [vmem:[#allocation14 + $0x60] sm:$0xff]  ;;  %v2923_v40 = vpack.c.bf16 %v1625_v6, %v1621_v5  ;;  %v1637_v3 = vld [vmem:[#allocation16 + $0x108] sm:$0xff]  ;;  %v1639_v5 = vld [vmem:[#allocation16 + $0x118] sm:$0xff] }
 0x648   :  { %v1624_v8 = vld [vmem:[#allocation16 + $0xa0] sm:$0xff] }
 0x649   :  { %2870 = vmatpush3.bf16.msra.mxu0 %v2869_v20  ;;  %v1462_v20 = vld [vmem:[#allocation14 + $0x70] sm:$0xff]  ;;  %v2925_v9 = vpack.c.bf16 %v1624_v8, %v1620_v7  ;;  %v1636_v7 = vld [vmem:[#allocation16 + $0x100] sm:$0xff] }
 0x64a   :  { %2871 = vmatprep.subr.bf16.mxu0 %v3513_v26  ;;  %2890 = vmatpush1.bf16.msra.mxu1 %v2889_v11  ;;  %v2897_v21 = vpack.c.bf16 %v1462_v20, %v1460_v52  ;;  %v1640_v8 = vld [vmem:[#allocation16 + $0x120] sm:$0xff] }
 0x64b   :  { %2892 = vmatprep.subr.bf16.mxu1 %v2891_v14 }
 0x64d   :  { %2873 = vmatpush3.bf16.msra.mxu0 %v2872_v23  ;;  %v1467_v23 = vld [vmem:[#allocation14 + $0x98] sm:$0xff] }
 0x64e   :  { %2874 = vmatprep.subr.bf16.mxu0 %v3513_v26  ;;  %2894 = vmatpush1.bf16.msra.mxu1 %v2893_v41  ;;  %v2899_v24 = vpack.c.bf16 %v1467_v23, %v1465_v22 }
 0x64f   :  { %2896 = vmatprep.subr.bf16.mxu1 %v2895_v19 }
 0x651   :  { %2876 = vmatpush3.bf16.msra.mxu0 %v2875_v27  ;;  %v1466_v27 = vld [vmem:[#allocation14 + $0x90] sm:$0xff] }
 0x652   :  { %2877 = vmatprep.subr.bf16.mxu0 %v3513_v26  ;;  %2898 = vmatpush1.bf16.msra.mxu1 %v2897_v21  ;;  %v2901_v28 = vpack.c.bf16 %v1466_v27, %v1464_v25 }
 0x653   :  { %2900 = vmatprep.subr.bf16.mxu1 %v2899_v24 }
 0x655   :  { %2879 = vmatpush3.bf16.msra.mxu0 %v2878_v30  ;;  %v1471_v30 = vld [vmem:[#allocation14 + $0xb8] sm:$0xff] }
 0x656   :  { %2880 = vmatprep.subr.bf16.mxu0 %v3513_v26  ;;  %2902 = vmatpush1.bf16.msra.mxu1 %v2901_v28  ;;  %v2903_v31 = vpack.c.bf16 %v1471_v30, %v1469_v29 }
 0x658   :  { %2904 = vmatprep.subr.bf16.mxu1 %v2903_v31  ;;  %v1606_v31 = vld [vmem:[#allocation16 + $0x10] sm:$0xff] }
 0x659   :  { %2882 = vmatpush3.bf16.msra.mxu0 %v2881_v33  ;;  %v1470_v33 = vld [vmem:[#allocation14 + $0xb0] sm:$0xff] }
 0x718   :  { %v1317_v35 = vpop.f32.mrb[10].mxu1 }
 0x719   :  { %v1318_v59 = vadd.f32 %v1317_v35, %v1250_v34  ;;  %v2455_v36 = vpop.f32.mrb[11].mxu1  ;;  %v2905_v34 = vpack.c.bf16 %v1470_v33, %v1468_v32  ;;  %v1473_v35 = vld [vmem:[#allocation14 + $0xc8] sm:$0xff]  ;;  %v1610_v32 = vld [vmem:[#allocation16 + $0x30] sm:$0xff]  ;;  %v1615_v33 = vld [vmem:[#allocation16 + $0x58] sm:$0xff] }
 0x71a   :  { %v1472_v36 = vld [vmem:[#allocation14 + $0xc0] sm:$0xff] }
 0x71b   :  { %v1321_v37 = vmax.f32 %v1318_v59, 0.0  ;;  %v1475_v59 = vld [vmem:[#allocation14 + $0xd8] sm:$0xff]  ;;  %2906 = vmatpush1.bf16.msra.mxu1 %v2905_v34 }
 0x71c   :  { %v1619_v34 = vld [vmem:[#allocation16 + $0x78] sm:$0xff] }
 0x71d   :  { %v1322_v44 = vrot.slane %v1321_v37, 4 }
 0x71f   :  { %v1323_v47 = vadd.f32 %v1322_v44, %v1321_v37  ;;  %v1474_v44 = vld [vmem:[#allocation14 + $0xd0] sm:$0xff] }
 0x721   :  { %v1324_v49 = vrot.slane %v1323_v47, 2 }
 0x723   :  { %v1325_v50 = vadd.f32 %v1324_v49, %v1323_v47  ;;  %v1477_v47 = vld [vmem:[#allocation14 + $0xe8] sm:$0xff]  ;;  %v1479_v49 = vld [vmem:[#allocation14 + $0xf8] sm:$0xff] }
 0x725   :  { %v1326_v51 = vrot.slane %v1325_v50, 1 }
 0x727   :  { %v1327_v53 = vadd.f32 %v1326_v51, %v1325_v50  ;;  %v2909_v50 = vpack.c.bf16 %v1474_v44, %v1472_v36  ;;  %v2911_v51 = vpack.c.bf16 %v1479_v49, %v1477_v47  ;;  %v1614_v44 = vld [vmem:[#allocation16 + $0x50] sm:$0xff]  ;;  %v1623_v49 = vld [vmem:[#allocation16 + $0x98] sm:$0xff] }
 0x728   :  { %v1618_v47 = vld [vmem:[#allocation16 + $0x70] sm:$0xff] }
 0x729   :  { %v1328_v54 = vmul.f32 0.125, %v1327_v53  ;;  %v1476_v53 = vld [vmem:[#allocation14 + $0xe0] sm:$0xff] }
 0x72b   :  { %v1329_v55 = vsub.f32 %v1321_v37, %v1328_v54  ;;  %v2907_v37 = vpack.c.bf16 %v1475_v59, %v1473_v35  ;;  %v1478_v54 = vld [vmem:[#allocation14 + $0xf0] sm:$0xff]  ;;  %v2981_v59 = vpack.c.bf16 %v1610_v32, %v1606_v31  ;;  %v1656_v31 = vld [vmem:[#allocation16 + $0x1a0] sm:$0xff] }
 0x72d   :  { %v1330_v56 = vmul.f32 %v1329_v55, %v1329_v55  ;;  %2908 = vmatprep.subr.bf16.mxu1 %v2907_v37  ;;  %v2983_v37 = vpack.c.bf16 %v1619_v34, %v1615_v33  ;;  %v1654_v34 = vld [vmem:[#allocation16 + $0x190] sm:$0xff] }
 0x72e   :  { %2910 = vmatpush1.bf16.msra.mxu1 %v2909_v50  ;;  %v1627_v50 = vld [vmem:[#allocation16 + $0xb8] sm:$0xff] }
 0x72f   :  { %v1331_v57 = vrot.slane %v1330_v56, 4  ;;  %2912 = vmatprep.subr.bf16.mxu1 %v2911_v51  ;;  %v2985_v51 = vpack.c.bf16 %v1618_v47, %v1614_v44  ;;  %v1663_v44 = vld [vmem:[#allocation16 + $0x1d8] sm:$0xff] }
 0x731   :  { %v1332_v58 = vadd.f32 %v1331_v57, %v1330_v56  ;;  %v1605_v56 = vld [vmem:[#allocation16 + $0x8] sm:$0xff] }
 0x732   :  { %v1609_v57 = vld [vmem:[#allocation16 + $0x28] sm:$0xff] }
 0x733   :  { %v1333_v60 = vrot.slane %v1332_v58, 2 }
 0x735   :  { %v1334_v61 = vadd.f32 %v1333_v60, %v1332_v58  ;;  %v1607_v58 = vld [vmem:[#allocation16 + $0x18] sm:$0xff]  ;;  %v2915_v60 = vpack.c.bf16 %v1609_v57, %v1605_v56  ;;  %v1629_v57 = vld [vmem:[#allocation16 + $0xc8] sm:$0xff] }
 0x737   :  { %v1335_v26 = vrot.slane %v1334_v61, 1  ;;  %2916 = vmatprep.subr.bf16.mxu0 %v2915_v60  ;;  %v1631_v60 = vld [vmem:[#allocation16 + $0xd8] sm:$0xff] }
 0x739   :  { %v1336_v62 = vadd.f32 %v1335_v26, %v1334_v61  ;;  %v1611_v61 = vld [vmem:[#allocation16 + $0x38] sm:$0xff]  ;;  %v1604_v26 = vld [vmem:[#allocation16] sm:$0xff] }
 0x73b   :  { %v1337_v63 = vmul.f32 0.125, %v1336_v62  ;;  %v1608_v62 = vld [vmem:[#allocation16 + $0x20] sm:$0xff] }
 0x73d   :  { %v1338_v0 = vadd.f32 1e-05, %v1337_v63  ;;  %v2979_v63 = vpack.c.bf16 %v1611_v61, %v1607_v58  ;;  %v1633_v58 = vld [vmem:[#allocation16 + $0xe8] sm:$0xff] }
 0x73e   :  { %v2927_v61 = vpack.c.bf16 %v1633_v58, %v1629_v57  ;;  %v1669_v58 = vld [vmem:[#allocation16 + $0x208] sm:$0xff] }
 0x73f   :  { %3217 = vrsqrt.f32 %v1338_v0  ;;  %v2917_v0 = vpack.c.bf16 %v1608_v62, %v1604_v26  ;;  %v1635_v26 = vld [vmem:[#allocation16 + $0xf8] sm:$0xff]  ;;  %v1628_v62 = vld [vmem:[#allocation16 + $0xc0] sm:$0xff] }
 0x749   :  { %v3218_v1 = vpop.eup %3217 }
 0x74a   :  { %v1340_v2 = vmul.f32 %v3218_v1, %v1329_v55  ;;  %v2913_v55 = vpack.c.bf16 %v1478_v54, %v1476_v53  ;;  %v1613_v1 = vld [vmem:[#allocation16 + $0x48] sm:$0xff]  ;;  %v2987_v53 = vpack.c.bf16 %v1627_v50, %v1623_v49  ;;  %v1622_v54 = vld [vmem:[#allocation16 + $0x90] sm:$0xff]  ;;  %v1667_v49 = vld [vmem:[#allocation16 + $0x1f8] sm:$0xff] }
 0x74b   :  { %v1660_v50 = vld [vmem:[#allocation16 + $0x1c0] sm:$0xff] }
 0x74c   :  { %2489 = vmatmul.mubr.f32.vlgmr.msra.gmra.mrb[2].mxu0 %v1340_v2  ;;  %2914 = vmatpush1.bf16.msra.mxu1 %v2913_v55  ;;  %v1617_v2 = vld [vmem:[#allocation16 + $0x68] sm:$0xff]  ;;  %v1626_v55 = vld [vmem:[#allocation16 + $0xb0] sm:$0xff] }
 0x74d   :  { %2980 = vmatprep.subr.bf16.mxu1 %v2979_v63  ;;  %2918 = vmatpush1.bf16.msra.mxu0 %v2917_v0  ;;  %v2919_v48 = vpack.c.bf16 %v1617_v2, %v1613_v1  ;;  %v2989_v56 = vpack.c.bf16 %v1626_v55, %v1622_v54  ;;  %v1632_v63 = vld [vmem:[#allocation16 + $0xe0] sm:$0xff]  ;;  %v2991_v0 = vpack.c.bf16 %v1635_v26, %v1631_v60  ;;  %v1630_v2 = vld [vmem:[#allocation16 + $0xd0] sm:$0xff]  ;;  %v1673_v60 = vld [vmem:[#allocation16 + $0x228] sm:$0xff] }
 0x74e   :  { %v2929_v1 = vpack.c.bf16 %v1632_v63, %v1628_v62  ;;  %v1662_v55 = vld [vmem:[#allocation16 + $0x1d0] sm:$0xff]  ;;  %v2947_v26 = vpack.c.bf16 %v1673_v60, %v1669_v58  ;;  %v1675_v62 = vld [vmem:[#allocation16 + $0x238] sm:$0xff]  ;;  %v1668_v63 = vld [vmem:[#allocation16 + $0x200] sm:$0xff] }
 0x74f   :  { %2920 = vmatprep.subr.bf16.mxu0 %v2919_v48  ;;  %v1634_v48 = vld [vmem:[#allocation16 + $0xf0] sm:$0xff]  ;;  %v1709_v60 = vld [vmem:[#allocation16 + $0x348] sm:$0xff] }
 0x750   :  { %v2993_v45 = vpack.c.bf16 %v1634_v48, %v1630_v2  ;;  %v1670_v48 = vld [vmem:[#allocation16 + $0x210] sm:$0xff] }
 0x751   :  { %2922 = vmatpush1.bf16.msra.mxu0 %v2921_v4  ;;  %v1641_v4 = vld [vmem:[#allocation16 + $0x128] sm:$0xff] }
 0x752   :  { %2924 = vmatprep.subr.bf16.mxu0 %v2923_v40  ;;  %v2931_v6 = vpack.c.bf16 %v1641_v4, %v1637_v3  ;;  %v1643_v40 = vld [vmem:[#allocation16 + $0x138] sm:$0xff]  ;;  %v1677_v4 = vld [vmem:[#allocation16 + $0x248] sm:$0xff] }
 0x755   :  { %2926 = vmatpush1.bf16.msra.mxu0 %v2925_v9  ;;  %v2995_v9 = vpack.c.bf16 %v1643_v40, %v1639_v5  ;;  %v1681_v5 = vld [vmem:[#allocation16 + $0x268] sm:$0xff] }
 0x756   :  { %2928 = vmatprep.subr.bf16.mxu0 %v2927_v61  ;;  %v1671_v61 = vld [vmem:[#allocation16 + $0x218] sm:$0xff]  ;;  %v2951_v40 = vpack.c.bf16 %v1681_v5, %v1677_v4  ;;  %v1717_v4 = vld [vmem:[#allocation16 + $0x388] sm:$0xff] }
 0x759   :  { %2930 = vmatpush1.bf16.msra.mxu0 %v2929_v1  ;;  %v3011_v1 = vpack.c.bf16 %v1675_v62, %v1671_v61  ;;  %v1713_v61 = vld [vmem:[#allocation16 + $0x368] sm:$0xff] }
 0x75a   :  { %2932 = vmatprep.subr.bf16.mxu0 %v2931_v6  ;;  %v1679_v6 = vld [vmem:[#allocation16 + $0x258] sm:$0xff]  ;;  %v2967_v62 = vpack.c.bf16 %v1713_v61, %v1709_v60 }
 0x81f   :  { %v1424_v11 = vpop.f32.mrb[2].mxu0 }
 0x820   :  { %v1425_v12 = vadd.f32 %v1424_v11, %v1357_v10  ;;  %v2490_v13 = vpop.f32.mrb[3].mxu0  ;;  %v2933_v10 = vpack.c.bf16 %v1640_v8, %v1636_v7  ;;  %v1638_v11 = vld [vmem:[#allocation16 + $0x110] sm:$0xff]  ;;  %v1683_v7 = vld [vmem:[#allocation16 + $0x278] sm:$0xff]  ;;  %v1676_v8 = vld [vmem:[#allocation16 + $0x240] sm:$0xff] }
 0x822   :  { %v1428_v14 = vmax.f32 %v1425_v12, 0.0  ;;  %v1642_v12 = vld [vmem:[#allocation16 + $0x130] sm:$0xff]  ;;  %2934 = vmatpush1.bf16.msra.mxu0 %v2933_v10  ;;  %v3015_v10 = vpack.c.bf16 %v1683_v7, %v1679_v6  ;;  %v1721_v6 = vld [vmem:[#allocation16 + $0x3a8] sm:$0xff]  ;;  %v1723_v7 = vld [vmem:[#allocation16 + $0x3b8] sm:$0xff] }
 0x823   :  { %v2997_v13 = vpack.c.bf16 %v1642_v12, %v1638_v11  ;;  %v1678_v12 = vld [vmem:[#allocation16 + $0x250] sm:$0xff] }
 0x824   :  { %v1429_v15 = vrot.slane %v1428_v14, 4 }
 0x826   :  { %v1430_v16 = vadd.f32 %v1429_v15, %v1428_v14  ;;  %v1649_v15 = vld [vmem:[#allocation16 + $0x168] sm:$0xff] }
 0x828   :  { %v1431_v41 = vrot.slane %v1430_v16, 2 }
 0x82a   :  { %v1432_v17 = vadd.f32 %v1431_v41, %v1430_v16  ;;  %v1647_v16 = vld [vmem:[#allocation16 + $0x158] sm:$0xff] }
 0x82c   :  { %v1433_v18 = vrot.slane %v1432_v17, 1 }
 0x82e   :  { %v1434_v19 = vadd.f32 %v1433_v18, %v1432_v17  ;;  %v1651_v17 = vld [vmem:[#allocation16 + $0x178] sm:$0xff]  ;;  %v1644_v18 = vld [vmem:[#allocation16 + $0x140] sm:$0xff] }
 0x830   :  { %v1435_v52 = vmul.f32 0.125, %v1434_v19  ;;  %v1648_v19 = vld [vmem:[#allocation16 + $0x160] sm:$0xff] }
 0x832   :  { %v1436_v20 = vsub.f32 %v1428_v14, %v1435_v52  ;;  %v1645_v14 = vld [vmem:[#allocation16 + $0x148] sm:$0xff]  ;;  %v2999_v52 = vpack.c.bf16 %v1651_v17, %v1647_v16 }
 0x833   :  { %v2935_v41 = vpack.c.bf16 %v1649_v15, %v1645_v14  ;;  %v1685_v15 = vld [vmem:[#allocation16 + $0x288] sm:$0xff] }
 0x834   :  { %v1437_v21 = vmul.f32 %v1436_v20, %v1436_v20  ;;  %v1689_v16 = vld [vmem:[#allocation16 + $0x2a8] sm:$0xff] }
 0x835   :  { %2936 = vmatprep.subr.bf16.mxu0 %v2935_v41  ;;  %v1687_v41 = vld [vmem:[#allocation16 + $0x298] sm:$0xff]  ;;  %v2955_v17 = vpack.c.bf16 %v1689_v16, %v1685_v15  ;;  %v1725_v15 = vld [vmem:[#allocation16 + $0x3c8] sm:$0xff] }
 0x836   :  { %v1438_v22 = vrot.slane %v1437_v21, 4  ;;  %v1729_v16 = vld [vmem:[#allocation16 + $0x3e8] sm:$0xff] }
 0x838   :  { %v1439_v23 = vadd.f32 %v1438_v22, %v1437_v21  ;;  %v1646_v21 = vld [vmem:[#allocation16 + $0x150] sm:$0xff] }
 0x839   :  { %v1650_v22 = vld [vmem:[#allocation16 + $0x170] sm:$0xff] }
 0x83a   :  { %v1440_v24 = vrot.slane %v1439_v23, 2 }
 0x83c   :  { %v1441_v25 = vadd.f32 %v1440_v24, %v1439_v23  ;;  %v3001_v23 = vpack.c.bf16 %v1650_v22, %v1646_v21  ;;  %v1653_v24 = vld [vmem:[#allocation16 + $0x188] sm:$0xff]  ;;  %v1686_v22 = vld [vmem:[#allocation16 + $0x290] sm:$0xff] }
 0x83e   :  { %v1442_v27 = vrot.slane %v1441_v25, 1 }
 0x840   :  { %v1443_v28 = vadd.f32 %v1442_v27, %v1441_v25  ;;  %v1657_v25 = vld [vmem:[#allocation16 + $0x1a8] sm:$0xff]  ;;  %v1655_v27 = vld [vmem:[#allocation16 + $0x198] sm:$0xff] }
 0x842   :  { %v1444_v29 = vmul.f32 0.125, %v1443_v28  ;;  %v2939_v28 = vpack.c.bf16 %v1657_v25, %v1653_v24  ;;  %v1693_v25 = vld [vmem:[#allocation16 + $0x2c8] sm:$0xff] }
 0x844   :  { %v1445_v30 = vadd.f32 1e-05, %v1444_v29  ;;  %v1659_v29 = vld [vmem:[#allocation16 + $0x1b8] sm:$0xff] }
 0x845   :  { %v3003_v32 = vpack.c.bf16 %v1659_v29, %v1655_v27  ;;  %v1697_v27 = vld [vmem:[#allocation16 + $0x2e8] sm:$0xff] }
 0x846   :  { %3219 = vrsqrt.f32 %v1445_v30  ;;  %v1652_v30 = vld [vmem:[#allocation16 + $0x180] sm:$0xff]  ;;  %v2959_v29 = vpack.c.bf16 %v1697_v27, %v1693_v25  ;;  %v1978_v27 = vld [vmem:[#allocation17 + $0x8] sm:$0xff] }
 0x847   :  { %v2941_v33 = vpack.c.bf16 %v1656_v31, %v1652_v30  ;;  %v1699_v30 = vld [vmem:[#allocation16 + $0x2f8] sm:$0xff]  ;;  %v1692_v31 = vld [vmem:[#allocation16 + $0x2c0] sm:$0xff] }
 0x850   :  { %v3220_v35 = vpop.eup %3219 }
 0x851   :  { %v1447_v36 = vmul.f32 %v3220_v35, %v1436_v20  ;;  %v2937_v20 = vpack.c.bf16 %v1648_v19, %v1644_v18  ;;  %v1658_v35 = vld [vmem:[#allocation16 + $0x1b0] sm:$0xff]  ;;  %v1691_v18 = vld [vmem:[#allocation16 + $0x2b8] sm:$0xff]  ;;  %v1684_v19 = vld [vmem:[#allocation16 + $0x280] sm:$0xff] }
 0x853   :  { %1558 = vmatmul.mubr.f32.vlgmr.msra.gmra.mrb[12].mxu1 %v1447_v36  ;;  %2938 = vmatpush1.bf16.msra.mxu0 %v2937_v20  ;;  %v1661_v36 = vld [vmem:[#allocation16 + $0x1c8] sm:$0xff]  ;;  %v3019_v20 = vpack.c.bf16 %v1691_v18, %v1687_v41  ;;  %v1727_v18 = vld [vmem:[#allocation16 + $0x3d8] sm:$0xff] }
 0x854   :  { %2982 = vmatpush1.bf16.msra.mxu1 %v2981_v59  ;;  %2940 = vmatprep.subr.bf16.mxu0 %v2939_v28  ;;  %v3005_v59 = vpack.c.bf16 %v1658_v35, %v1654_v34  ;;  %v1695_v28 = vld [vmem:[#allocation16 + $0x2d8] sm:$0xff]  ;;  %v1694_v35 = vld [vmem:[#allocation16 + $0x2d0] sm:$0xff] }
 0x855   :  { %2984 = vmatprep.subr.bf16.mxu1 %v2983_v37  ;;  %v1665_v37 = vld [vmem:[#allocation16 + $0x1e8] sm:$0xff] }
 0x856   :  { %v2943_v47 = vpack.c.bf16 %v1665_v37, %v1661_v36  ;;  %v1701_v37 = vld [vmem:[#allocation16 + $0x308] sm:$0xff] }
 0x857   :  { %2942 = vmatpush1.bf16.msra.mxu0 %v2941_v33  ;;  %v3023_v33 = vpack.c.bf16 %v1699_v30, %v1695_v28  ;;  %v1980_v28 = vld [vmem:[#allocation17 + $0x18] sm:$0xff]  ;;  %v1481_v30 = vld [vmem:[#allocation2 + $0x7] ss:$8 sm:$0x3] }
 0x858   :  { %2986 = vmatpush1.bf16.msra.mxu1 %v2985_v51  ;;  %v1664_v51 = vld [vmem:[#allocation16 + $0x1e0] sm:$0xff]  ;;  %2944 = vmatprep.subr.bf16.mxu0 %v2943_v47  ;;  %v1703_v47 = vld [vmem:[#allocation16 + $0x318] sm:$0xff] }
 0x859   :  { %2988 = vmatprep.subr.bf16.mxu1 %v2987_v53  ;;  %v3007_v53 = vpack.c.bf16 %v1667_v49, %v1663_v44  ;;  %v2945_v54 = vpack.c.bf16 %v1664_v51, %v1660_v50  ;;  %v1705_v44 = vld [vmem:[#allocation16 + $0x328] sm:$0xff]  ;;  %v1707_v50 = vld [vmem:[#allocation16 + $0x338] sm:$0xff]  ;;  %v1700_v51 = vld [vmem:[#allocation16 + $0x300] sm:$0xff] }
 0x85a   :  { %v2963_v49 = vpack.c.bf16 %v1705_v44, %v1701_v37 }
 0x85b   :  { %2946 = vmatpush1.bf16.msra.mxu0 %v2945_v54  ;;  %v3027_v54 = vpack.c.bf16 %v1707_v50, %v1703_v47 }
 0x85c   :  { %2990 = vmatpush1.bf16.msra.mxu1 %v2989_v56  ;;  %v1666_v56 = vld [vmem:[#allocation16 + $0x1f0] sm:$0xff]  ;;  %2948 = vmatprep.subr.bf16.mxu0 %v2947_v26  ;;  %v1711_v26 = vld [vmem:[#allocation16 + $0x358] sm:$0xff] }
 0x85d   :  { %2992 = vmatprep.subr.bf16.mxu1 %v2991_v0  ;;  %v3009_v57 = vpack.c.bf16 %v1666_v56, %v1662_v55  ;;  %v1672_v0 = vld [vmem:[#allocation16 + $0x220] sm:$0xff]  ;;  %v1702_v56 = vld [vmem:[#allocation16 + $0x310] sm:$0xff] }
 0x85e   :  { %v2949_v2 = vpack.c.bf16 %v1672_v0, %v1668_v63  ;;  %v1715_v63 = vld [vmem:[#allocation16 + $0x378] sm:$0xff]  ;;  %v1708_v0 = vld [vmem:[#allocation16 + $0x340] sm:$0xff] }
 0x860   :  { %2994 = vmatpush1.bf16.msra.mxu1 %v2993_v45  ;;  %v1674_v45 = vld [vmem:[#allocation16 + $0x230] sm:$0xff]  ;;  %2950 = vmatpush1.bf16.msra.mxu0 %v2949_v2  ;;  %v3031_v2 = vpack.c.bf16 %v1715_v63, %v1711_v26 }
 0x861   :  { %2996 = vmatprep.subr.bf16.mxu1 %v2995_v9  ;;  %v3013_v3 = vpack.c.bf16 %v1674_v45, %v1670_v48  ;;  %v1680_v9 = vld [vmem:[#allocation16 + $0x260] sm:$0xff]  ;;  %2952 = vmatprep.subr.bf16.mxu0 %v2951_v40  ;;  %v1710_v45 = vld [vmem:[#allocation16 + $0x350] sm:$0xff]  ;;  %v1719_v40 = vld [vmem:[#allocation16 + $0x398] sm:$0xff] }
 0x862   :  { %v2953_v11 = vpack.c.bf16 %v1680_v9, %v1676_v8  ;;  %v2971_v8 = vpack.c.bf16 %v1721_v6, %v1717_v4  ;;  %v3035_v9 = vpack.c.bf16 %v1723_v7, %v1719_v40 }
 0x864   :  { %2998 = vmatpush1.bf16.msra.mxu1 %v2997_v13  ;;  %v1682_v13 = vld [vmem:[#allocation16 + $0x270] sm:$0xff]  ;;  %2954 = vmatpush1.bf16.msra.mxu0 %v2953_v11  ;;  %v1720_v11 = vld [vmem:[#allocation16 + $0x3a0] sm:$0xff] }
 0x865   :  { %3000 = vmatprep.subr.bf16.mxu1 %v2999_v52  ;;  %v3017_v14 = vpack.c.bf16 %v1682_v13, %v1678_v12  ;;  %v1688_v52 = vld [vmem:[#allocation16 + $0x2a0] sm:$0xff]  ;;  %2956 = vmatprep.subr.bf16.mxu0 %v2955_v17  ;;  %v1718_v12 = vld [vmem:[#allocation16 + $0x390] sm:$0xff]  ;;  %v2975_v17 = vpack.c.bf16 %v1729_v16, %v1725_v15 }
 0x866   :  { %v2957_v21 = vpack.c.bf16 %v1688_v52, %v1684_v19  ;;  %v1731_v19 = vld [vmem:[#allocation16 + $0x3f8] sm:$0xff]  ;;  %v1724_v52 = vld [vmem:[#allocation16 + $0x3c0] sm:$0xff]  ;;  %v1979_v16 = vld [vmem:[#allocation17 + $0x10] sm:$0xff] }
 0x867   :  { %v1977_v15 = vld [vmem:[#allocation17] sm:$0xff] }
 0x868   :  { %3002 = vmatpush1.bf16.msra.mxu1 %v3001_v23  ;;  %v1690_v23 = vld [vmem:[#allocation16 + $0x2b0] sm:$0xff]  ;;  %2958 = vmatpush1.bf16.msra.mxu0 %v2957_v21  ;;  %v1728_v21 = vld [vmem:[#allocation16 + $0x3e0] sm:$0xff] }
 0x869   :  { %3004 = vmatprep.subr.bf16.mxu1 %v3003_v32  ;;  %v3021_v24 = vpack.c.bf16 %v1690_v23, %v1686_v22  ;;  %v1696_v32 = vld [vmem:[#allocation16 + $0x2e0] sm:$0xff]  ;;  %2960 = vmatprep.subr.bf16.mxu0 %v2959_v29  ;;  %v1726_v22 = vld [vmem:[#allocation16 + $0x3d0] sm:$0xff]  ;;  %v3043_v29 = vpack.c.bf16 %v1980_v28, %v1978_v27  ;;  %v1988_v27 = vld [vmem:[#allocation17 + $0x58] sm:$0xff] }
 0x86a   :  { %v2961_v34 = vpack.c.bf16 %v1696_v32, %v1692_v31  ;;  %v1730_v23 = vld [vmem:[#allocation16 + $0x3f0] sm:$0xff]  ;;  %v1486_v31 = vrot.slane %v1481_v30, %v3766_v39  ;;  %v1490_v32 = vrot.slane %v1481_v30, %v3771_v42  ;;  %v1985_v30 = vld [vmem:[#allocation17 + $0x40] sm:$0xff] }
 0x86b   :  { %v3041_v25 = vpack.c.bf16 %v1730_v23, %v1726_v22  ;;  %v1981_v23 = vld [vmem:[#allocation17 + $0x20] sm:$0xff] }
 0x86c   :  { %3006 = vmatpush1.bf16.msra.mxu1 %v3005_v59  ;;  %v1698_v59 = vld [vmem:[#allocation16 + $0x2f0] sm:$0xff]  ;;  %2962 = vmatpush1.bf16.msra.mxu0 %v2961_v34 }
 0x86d   :  { %3008 = vmatprep.subr.bf16.mxu1 %v3007_v53  ;;  %v3025_v36 = vpack.c.bf16 %v1698_v59, %v1694_v35  ;;  %v1704_v53 = vld [vmem:[#allocation16 + $0x320] sm:$0xff]  ;;  %2964 = vmatprep.subr.bf16.mxu0 %v2963_v49 }
 0x86e   :  { %v2965_v55 = vpack.c.bf16 %v1704_v53, %v1700_v51 }
 0x870   :  { %3010 = vmatpush1.bf16.msra.mxu1 %v3009_v57  ;;  %v1706_v57 = vld [vmem:[#allocation16 + $0x330] sm:$0xff]  ;;  %2966 = vmatpush1.bf16.msra.mxu0 %v2965_v55 }
 0x871   :  { %3012 = vmatprep.subr.bf16.mxu1 %v3011_v1  ;;  %v3029_v58 = vpack.c.bf16 %v1706_v57, %v1702_v56  ;;  %v1712_v1 = vld [vmem:[#allocation16 + $0x360] sm:$0xff]  ;;  %2968 = vmatprep.subr.bf16.mxu0 %v2967_v62 }
 0x872   :  { %v2969_v48 = vpack.c.bf16 %v1712_v1, %v1708_v0 }
 0x874   :  { %3014 = vmatpush1.bf16.msra.mxu1 %v3013_v3  ;;  %v1714_v3 = vld [vmem:[#allocation16 + $0x370] sm:$0xff]  ;;  %2970 = vmatpush1.bf16.msra.mxu0 %v2969_v48 }
 0x875   :  { %3016 = vmatprep.subr.bf16.mxu1 %v3015_v10  ;;  %v3033_v5 = vpack.c.bf16 %v1714_v3, %v1710_v45  ;;  %v1716_v10 = vld [vmem:[#allocation16 + $0x380] sm:$0xff]  ;;  %2972 = vmatprep.subr.bf16.mxu0 %v2971_v8 }
 0x876   :  { %v2973_v13 = vpack.c.bf16 %v1720_v11, %v1716_v10 }
 0x878   :  { %3018 = vmatpush1.bf16.msra.mxu1 %v3017_v14  ;;  %v1722_v14 = vld [vmem:[#allocation16 + $0x3b0] sm:$0xff]  ;;  %2974 = vmatpush1.bf16.msra.mxu0 %v2973_v13 }
 0x879   :  { %3020 = vmatprep.subr.bf16.mxu1 %v3019_v20  ;;  %v3037_v41 = vpack.c.bf16 %v1722_v14, %v1718_v12  ;;  %v3039_v20 = vpack.c.bf16 %v1731_v19, %v1727_v18  ;;  %2976 = vmatprep.subr.bf16.mxu0 %v2975_v17  ;;  %v1982_v17 = vld [vmem:[#allocation17 + $0x28] sm:$0xff]  ;;  %v1984_v18 = vld [vmem:[#allocation17 + $0x38] sm:$0xff] }
 0x87a   :  { %v3047_v22 = vpack.c.bf16 %v1984_v18, %v1982_v17  ;;  %v2020_v17 = vld [vmem:[#allocation17 + $0x158] sm:$0xff] }
 0x87c   :  { %3022 = vmatpush1.bf16.msra.mxu1 %v3021_v24  ;;  %v2977_v24 = vpack.c.bf16 %v1728_v21, %v1724_v52 }
 0x87d   :  { %3024 = vmatprep.subr.bf16.mxu1 %v3023_v33 }
 0x87e   :  { %2978 = vmatpush1.bf16.msra.mxu0 %v2977_v24  ;;  %v1983_v24 = vld [vmem:[#allocation17 + $0x30] sm:$0xff] }
 0x87f   :  { %3044 = vmatprep.subr.bf16.mxu0 %v3043_v29  ;;  %v3049_v28 = vpack.c.bf16 %v1983_v24, %v1981_v23  ;;  %v2021_v24 = vld [vmem:[#allocation17 + $0x160] sm:$0xff] }
 0x880   :  { %3026 = vmatpush1.bf16.msra.mxu1 %v3025_v36 }
 0x881   :  { %3028 = vmatprep.subr.bf16.mxu1 %v3027_v54 }
 0x884   :  { %3030 = vmatpush1.bf16.msra.mxu1 %v3029_v58 }
 0x885   :  { %3032 = vmatprep.subr.bf16.mxu1 %v3031_v2 }
 0x888   :  { %3034 = vmatpush1.bf16.msra.mxu1 %v3033_v5 }
 0x889   :  { %3036 = vmatprep.subr.bf16.mxu1 %v3035_v9 }
 0x88c   :  { %3038 = vmatpush1.bf16.msra.mxu1 %v3037_v41 }
 0x88d   :  { %3040 = vmatprep.subr.bf16.mxu1 %v3039_v20  ;;  %v3045_v20 = vpack.c.bf16 %v1979_v16, %v1977_v15  ;;  %v2015_v15 = vld [vmem:[#allocation17 + $0x130] sm:$0xff] }
 0x890   :  { %3042 = vmatpush1.bf16.msra.mxu1 %v3041_v25  ;;  %v1986_v25 = vld [vmem:[#allocation17 + $0x48] sm:$0xff] }
 0x891   :  { %v3051_v29 = vpack.c.bf16 %v1988_v27, %v1986_v25  ;;  %v2023_v25 = vld [vmem:[#allocation17 + $0x170] sm:$0xff] }
 0x892   :  { %v3089_v27 = vpack.c.bf16 %v2023_v25, %v2021_v24 }
 0x926   :  { %v1559_v33 = vpop.f32.mrb[12].mxu1 }
 0x927   :  { %v1560_v34 = vadd.f32 %v1559_v33, %v1486_v31  ;;  %v1561_v35 = vpop.f32.mrb[13].mxu1  ;;  %v1987_v31 = vld [vmem:[#allocation17 + $0x50] sm:$0xff]  ;;  %v1990_v33 = vld [vmem:[#allocation17 + $0x68] sm:$0xff] }
 0x928   :  { %v1562_v59 = vadd.f32 %v1561_v35, %v1490_v32  ;;  %v3053_v32 = vpack.c.bf16 %v1987_v31, %v1985_v30  ;;  %v2025_v31 = vld [vmem:[#allocation17 + $0x180] sm:$0xff] }
 0x929   :  { %v1564_v36 = vmax.f32 %v1560_v34, 0.0  ;;  %v1992_v34 = vld [vmem:[#allocation17 + $0x78] sm:$0xff] }
 0x92a   :  { %v1565_v37 = vmax.f32 %v1562_v59, 0.0  ;;  %v3055_v35 = vpack.c.bf16 %v1992_v34, %v1990_v33  ;;  %v1989_v59 = vld [vmem:[#allocation17 + $0x60] sm:$0xff]  ;;  %v2030_v34 = vld [vmem:[#allocation17 + $0x1a8] sm:$0xff] }
 0x92b   :  { %v1566_v44 = vrot.slane %v1564_v36, 4 }
 0x92c   :  { %v1572_v47 = vrot.slane %v1565_v37, 4 }
 0x92d   :  { %v1567_v49 = vadd.f32 %v1566_v44, %v1564_v36  ;;  %v1994_v44 = vld [vmem:[#allocation17 + $0x88] sm:$0xff] }
 0x92e   :  { %v1573_v50 = vadd.f32 %v1572_v47, %v1565_v37  ;;  %v1996_v47 = vld [vmem:[#allocation17 + $0x98] sm:$0xff] }
 0x92f   :  { %v1568_v51 = vrot.slane %v1567_v49, 2 }
 0x930   :  { %v1574_v53 = vrot.slane %v1573_v50, 2 }
 0x931   :  { %v1569_v54 = vadd.f32 %v1568_v51, %v1567_v49  ;;  %v3059_v49 = vpack.c.bf16 %v1996_v47, %v1994_v44  ;;  %v1995_v51 = vld [vmem:[#allocation17 + $0x90] sm:$0xff]  ;;  %v2034_v44 = vld [vmem:[#allocation17 + $0x1c8] sm:$0xff] }
 0x932   :  { %v1575_v55 = vadd.f32 %v1574_v53, %v1573_v50  ;;  %v1993_v50 = vld [vmem:[#allocation17 + $0x80] sm:$0xff] }
 0x933   :  { %v1570_v56 = vrot.slane %v1569_v54, 1  ;;  %v3061_v53 = vpack.c.bf16 %v1995_v51, %v1993_v50  ;;  %v2033_v50 = vld [vmem:[#allocation17 + $0x1c0] sm:$0xff]  ;;  %v2035_v51 = vld [vmem:[#allocation17 + $0x1d0] sm:$0xff] }
 0x934   :  { %v1576_v57 = vrot.slane %v1575_v55, 1 }
 0x935   :  { %v1571_v58 = vadd.f32 %v1570_v56, %v1569_v54  ;;  %v1998_v54 = vld [vmem:[#allocation17 + $0xa8] sm:$0xff] }
 0x936   :  { %v1577_v60 = vadd.f32 %v1576_v57, %v1575_v55  ;;  %v2000_v55 = vld [vmem:[#allocation17 + $0xb8] sm:$0xff]  ;;  %v1997_v57 = vld [vmem:[#allocation17 + $0xa0] sm:$0xff] }
 0x937   :  { %v1578_v61 = vmul.f32 0.125, %v1571_v58  ;;  %v3063_v56 = vpack.c.bf16 %v2000_v55, %v1998_v54  ;;  %v1999_v58 = vld [vmem:[#allocation17 + $0xb0] sm:$0xff]  ;;  %v2038_v54 = vld [vmem:[#allocation17 + $0x1e8] sm:$0xff]  ;;  %v2040_v55 = vld [vmem:[#allocation17 + $0x1f8] sm:$0xff] }
 0x938   :  { %v1579_v26 = vmul.f32 0.125, %v1577_v60  ;;  %v3065_v60 = vpack.c.bf16 %v1999_v58, %v1997_v57  ;;  %v3103_v57 = vpack.c.bf16 %v2040_v55, %v2038_v54  ;;  %v2037_v58 = vld [vmem:[#allocation17 + $0x1e0] sm:$0xff] }
 0x939   :  { %v1580_v62 = vsub.f32 %v1564_v36, %v1578_v61  ;;  %v1991_v36 = vld [vmem:[#allocation17 + $0x70] sm:$0xff]  ;;  %v2002_v61 = vld [vmem:[#allocation17 + $0xc8] sm:$0xff] }
 0x93a   :  { %v1581_v63 = vsub.f32 %v1565_v37, %v1579_v26  ;;  %v3057_v37 = vpack.c.bf16 %v1991_v36, %v1989_v59  ;;  %v2004_v26 = vld [vmem:[#allocation17 + $0xd8] sm:$0xff]  ;;  %v2029_v36 = vld [vmem:[#allocation17 + $0x1a0] sm:$0xff] }
 0x93b   :  { %v1582_v0 = vmul.f32 %v1580_v62, %v1580_v62 }
 0x93c   :  { %v1583_v1 = vmul.f32 %v1581_v63, %v1581_v63 }
 0x93d   :  { %v1584_v2 = vrot.slane %v1582_v0, 4 }
 0x93e   :  { %v1590_v48 = vrot.slane %v1583_v1, 4 }
 0x93f   :  { %v1585_v45 = vadd.f32 %v1584_v2, %v1582_v0  ;;  %v2003_v0 = vld [vmem:[#allocation17 + $0xd0] sm:$0xff]  ;;  %v2006_v2 = vld [vmem:[#allocation17 + $0xe8] sm:$0xff] }
 0x940   :  { %v1591_v3 = vadd.f32 %v1590_v48, %v1583_v1  ;;  %v2008_v48 = vld [vmem:[#allocation17 + $0xf8] sm:$0xff] }
 0x941   :  { %v1586_v4 = vrot.slane %v1585_v45, 2 }
 0x942   :  { %v1592_v5 = vrot.slane %v1591_v3, 2 }
 0x943   :  { %v1587_v6 = vadd.f32 %v1586_v4, %v1585_v45  ;;  %v3071_v45 = vpack.c.bf16 %v2008_v48, %v2006_v2  ;;  %v2007_v4 = vld [vmem:[#allocation17 + $0xf0] sm:$0xff] }
 0x944   :  { %v1593_v40 = vadd.f32 %v1592_v5, %v1591_v3  ;;  %v2005_v3 = vld [vmem:[#allocation17 + $0xe0] sm:$0xff] }
 0x945   :  { %v1588_v7 = vrot.slane %v1587_v6, 1  ;;  %v3073_v5 = vpack.c.bf16 %v2007_v4, %v2005_v3 }
 0x946   :  { %v1594_v8 = vrot.slane %v1593_v40, 1 }
 0x947   :  { %v1589_v9 = vadd.f32 %v1588_v7, %v1587_v6  ;;  %v2010_v6 = vld [vmem:[#allocation17 + $0x108] sm:$0xff] }
 0x948   :  { %v1595_v10 = vadd.f32 %v1594_v8, %v1593_v40  ;;  %v2012_v40 = vld [vmem:[#allocation17 + $0x118] sm:$0xff]  ;;  %v2009_v8 = vld [vmem:[#allocation17 + $0x100] sm:$0xff] }
 0x949   :  { %v1596_v11 = vmul.f32 0.125, %v1589_v9  ;;  %v3075_v7 = vpack.c.bf16 %v2012_v40, %v2010_v6  ;;  %v2011_v9 = vld [vmem:[#allocation17 + $0x110] sm:$0xff] }
 0x94a   :  { %v1597_v12 = vmul.f32 0.125, %v1595_v10  ;;  %v3077_v10 = vpack.c.bf16 %v2011_v9, %v2009_v8 }
 0x94b   :  { %v1598_v13 = vadd.f32 1e-05, %v1596_v11  ;;  %v2014_v11 = vld [vmem:[#allocation17 + $0x128] sm:$0xff] }
 0x94c   :  { %v1599_v14 = vadd.f32 1e-05, %v1597_v12  ;;  %v2016_v12 = vld [vmem:[#allocation17 + $0x138] sm:$0xff] }
 0x94d   :  { %3221 = vrsqrt.f32 %v1598_v13  ;;  %v3079_v13 = vpack.c.bf16 %v2016_v12, %v2014_v11 }
 0x94e   :  { %3223 = vrsqrt.f32 %v1599_v14  ;;  %v2013_v14 = vld [vmem:[#allocation17 + $0x120] sm:$0xff] }
 0x94f   :  { %v3081_v16 = vpack.c.bf16 %v2015_v15, %v2013_v14 }
 0x957   :  { %v3222_v41 = vpop.eup %3221 }
 0x958   :  { %v3224_v19 = vpop.eup %3223  ;;  %v1602_v21 = vmul.f32 %v3222_v41, %v1580_v62  ;;  %v3067_v62 = vpack.c.bf16 %v2004_v26, %v2002_v61  ;;  %v2018_v41 = vld [vmem:[#allocation17 + $0x148] sm:$0xff] }
 0x959   :  { %v1603_v52 = vmul.f32 %v3224_v19, %v1581_v63  ;;  %v2001_v63 = vld [vmem:[#allocation17 + $0xc0] sm:$0xff]  ;;  %v3083_v18 = vpack.c.bf16 %v2020_v17, %v2018_v41  ;;  %v2042_v26 = vld [vmem:[#allocation17 + $0x208] sm:$0xff] }
 0x95a   :  { %v3069_v1 = vpack.c.bf16 %v2003_v0, %v2001_v63  ;;  %v2017_v19 = vld [vmem:[#allocation17 + $0x140] sm:$0xff] }
 0x95b   :  { %1819 = vmatprep.mubr.f32.mxu0 %v1603_v52  ;;  %1890 = vmatprep.mubr.f32.mxu1 %v1603_v52  ;;  %v2019_v52 = vld [vmem:[#allocation17 + $0x150] sm:$0xff] }
 0x95c   :  { %1820 = vmatmul.mubr.f32.vlgmr.msra.gmra.mrb[4].mxu0 %v1602_v21  ;;  %1891 = vmatmul.mubr.f32.vlgmr.msra.gmra.mrb[14].mxu1 %v1602_v21  ;;  %v2022_v21 = vld [vmem:[#allocation17 + $0x168] sm:$0xff] }
 0x95d   :  { %3046 = vmatpush1.bf16.msra.mxu0 %v3045_v20  ;;  %v3085_v20 = vpack.c.bf16 %v2019_v52, %v2017_v19  ;;  %v1733_v0 = vld [vmem:[#allocation2 + $0x20] ss:$8 sm:$0xf] }
 0x95e   :  { %3048 = vmatprep.subr.bf16.mxu0 %v3047_v22  ;;  %v2024_v22 = vld [vmem:[#allocation17 + $0x178] sm:$0xff]  ;;  %v1742_v2 = vrot.slane %v1733_v0, %v3771_v42  ;;  %v1750_v48 = vrot.slane %v1733_v0, %v329_v46 }
 0x95f   :  { %v3087_v23 = vpack.c.bf16 %v2024_v22, %v2022_v21 }
 0x961   :  { %3050 = vmatpush1.bf16.msra.mxu0 %v3049_v28  ;;  %v2026_v28 = vld [vmem:[#allocation17 + $0x188] sm:$0xff] }
 0x962   :  { %3052 = vmatprep.subr.bf16.mxu0 %v3051_v29  ;;  %v2028_v29 = vld [vmem:[#allocation17 + $0x198] sm:$0xff] }
 0x963   :  { %v3091_v30 = vpack.c.bf16 %v2028_v29, %v2026_v28 }
 0x965   :  { %3054 = vmatpush1.bf16.msra.mxu0 %v3053_v32  ;;  %v2027_v32 = vld [vmem:[#allocation17 + $0x190] sm:$0xff] }
 0x966   :  { %3056 = vmatprep.subr.bf16.mxu0 %v3055_v35  ;;  %v3093_v33 = vpack.c.bf16 %v2027_v32, %v2025_v31  ;;  %v2032_v35 = vld [vmem:[#allocation17 + $0x1b8] sm:$0xff] }
 0x967   :  { %v3095_v59 = vpack.c.bf16 %v2032_v35, %v2030_v34 }
 0x969   :  { %3058 = vmatpush1.bf16.msra.mxu0 %v3057_v37  ;;  %v2031_v37 = vld [vmem:[#allocation17 + $0x1b0] sm:$0xff] }
 0x96a   :  { %3060 = vmatprep.subr.bf16.mxu0 %v3059_v49  ;;  %v3097_v47 = vpack.c.bf16 %v2031_v37, %v2029_v36  ;;  %v2036_v49 = vld [vmem:[#allocation17 + $0x1d8] sm:$0xff]  ;;  %v1746_v36 = vrot.slane %v1733_v0, %v325_v43 }
 0x96d   :  { %3062 = vmatpush1.bf16.msra.mxu0 %v3061_v53  ;;  %v3099_v53 = vpack.c.bf16 %v2036_v49, %v2034_v44 }
 0x96e   :  { %3064 = vmatprep.subr.bf16.mxu0 %v3063_v56  ;;  %v3101_v56 = vpack.c.bf16 %v2035_v51, %v2033_v50 }
 0x971   :  { %3066 = vmatpush1.bf16.msra.mxu0 %v3065_v60  ;;  %v2039_v60 = vld [vmem:[#allocation17 + $0x1f0] sm:$0xff] }
 0x972   :  { %3068 = vmatprep.subr.bf16.mxu0 %v3067_v62  ;;  %v3105_v61 = vpack.c.bf16 %v2039_v60, %v2037_v58  ;;  %v2044_v62 = vld [vmem:[#allocation17 + $0x218] sm:$0xff] }
 0x973   :  { %v3107_v63 = vpack.c.bf16 %v2044_v62, %v2042_v26 }
 0x975   :  { %3070 = vmatpush1.bf16.msra.mxu0 %v3069_v1  ;;  %v1738_v1 = vrot.slane %v1733_v0, %v3766_v39 }
 0x976   :  { %3072 = vmatprep.subr.bf16.mxu0 %v3071_v45 }
 0x979   :  { %3074 = vmatpush1.bf16.msra.mxu0 %v3073_v5 }
 0x97a   :  { %3076 = vmatprep.subr.bf16.mxu0 %v3075_v7 }
 0x97d   :  { %3078 = vmatpush1.bf16.msra.mxu0 %v3077_v10 }
 0x97e   :  { %3080 = vmatprep.subr.bf16.mxu0 %v3079_v13 }
 0x981   :  { %3082 = vmatpush1.bf16.msra.mxu0 %v3081_v16 }
 0x982   :  { %3084 = vmatprep.subr.bf16.mxu0 %v3083_v18 }
 0x985   :  { %3086 = vmatpush1.bf16.msra.mxu0 %v3085_v20 }
 0x986   :  { %3088 = vmatprep.subr.bf16.mxu0 %v3087_v23 }
 0x989   :  { %3090 = vmatpush1.bf16.msra.mxu0 %v3089_v27 }
 0x98a   :  { %3092 = vmatprep.subr.bf16.mxu0 %v3091_v30 }
 0x98d   :  { %3094 = vmatpush1.bf16.msra.mxu0 %v3093_v33 }
 0x98e   :  { %3096 = vmatprep.subr.bf16.mxu0 %v3095_v59 }
 0x991   :  { %3098 = vmatpush1.bf16.msra.mxu0 %v3097_v47 }
 0x992   :  { %3100 = vmatprep.subr.bf16.mxu0 %v3099_v53 }
 0x995   :  { %3102 = vmatpush1.bf16.msra.mxu0 %v3101_v56 }
 0x996   :  { %3104 = vmatprep.subr.bf16.mxu0 %v3103_v57 }
 0x999   :  { %3106 = vmatpush1.bf16.msra.mxu0 %v3105_v61 }
 0x99a   :  { %3108 = vmatprep.subr.bf16.mxu0 %v3107_v63 }
 0xa2f   :  { %v1821_v45 = vpop.f32.mrb[4].mxu0  ;;  %v1892_v3 = vpop.f32.mrb[14].mxu1 }
 0xa30   :  { %v1822_v4 = vadd.f32 %v1821_v45, %v1738_v1  ;;  %v1823_v5 = vpop.f32.mrb[5].mxu0  ;;  %v1894_v6 = vpop.f32.mrb[15].mxu1  ;;  %v1893_v53 = vadd.f32 %v1892_v3, %v1746_v36 }
 0xa31   :  { %v1824_v40 = vadd.f32 %v1823_v5, %v1742_v2  ;;  %v1895_v7 = vadd.f32 %v1894_v6, %v1750_v48 }
 0xa32   :  { %v1897_v8 = vmax.f32 %v1822_v4, 0.0  ;;  %v1899_v61 = vmax.f32 %v1893_v53, 0.0 }
 0xa33   :  { %v1898_v9 = vmax.f32 %v1824_v40, 0.0  ;;  %v1900_v10 = vmax.f32 %v1895_v7, 0.0  ;;  %v2041_v7 = vld [vmem:[#allocation17 + $0x200] sm:$0xff] }
 0xa34   :  { %v1901_v11 = vrot.slane %v1897_v8, 4  ;;  %v1913_v0 = vrot.slane %v1899_v61, 4 }
 0xa35   :  { %v1907_v12 = vrot.slane %v1898_v9, 4  ;;  %v1919_v13 = vrot.slane %v1900_v10, 4 }
 0xa36   :  { %v1902_v14 = vadd.f32 %v1901_v11, %v1897_v8  ;;  %v1914_v3 = vadd.f32 %v1913_v0, %v1899_v61  ;;  %v2048_v11 = vld [vmem:[#allocation17 + $0x238] sm:$0xff] }
 0xa37   :  { %v1908_v15 = vadd.f32 %v1907_v12, %v1898_v9  ;;  %v1920_v16 = vadd.f32 %v1919_v13, %v1900_v10 }
 0xa38   :  { %v1903_v41 = vrot.slane %v1902_v14, 2  ;;  %v1915_v6 = vrot.slane %v1914_v3, 2 }
 0xa39   :  { %v1909_v17 = vrot.slane %v1908_v15, 2  ;;  %v1921_v18 = vrot.slane %v1920_v16, 2 }
 0xa3a   :  { %v1904_v46 = vadd.f32 %v1903_v41, %v1902_v14  ;;  %v1916_v40 = vadd.f32 %v1915_v6, %v1914_v3 }
 0xa3b   :  { %v1910_v19 = vadd.f32 %v1909_v17, %v1908_v15  ;;  %v1922_v52 = vadd.f32 %v1921_v18, %v1920_v16  ;;  %v2045_v18 = vld [vmem:[#allocation17 + $0x220] sm:$0xff] }
 0xa3c   :  { %v1905_v20 = vrot.slane %v1904_v46, 1  ;;  %v1917_v14 = vrot.slane %v1916_v40, 1 }
 0xa3d   :  { %v1911_v21 = vrot.slane %v1910_v19, 1  ;;  %v1923_v22 = vrot.slane %v1922_v52, 1 }
 0xa3e   :  { %v1906_v23 = vadd.f32 %v1905_v20, %v1904_v46  ;;  %v2047_v46 = vld [vmem:[#allocation17 + $0x230] sm:$0xff]  ;;  %v2052_v20 = vld [vmem:[#allocation17 + $0x258] sm:$0xff] }
 0xa3f   :  { %v1912_v24 = vadd.f32 %v1911_v21, %v1910_v19  ;;  %v1924_v25 = vadd.f32 %v1923_v22, %v1922_v52  ;;  %v2050_v52 = vld [vmem:[#allocation17 + $0x248] sm:$0xff]  ;;  %v1918_v21 = vadd.f32 %v1917_v14, %v1916_v40  ;;  %v3113_v22 = vpack.c.bf16 %v2047_v46, %v2045_v18  ;;  %v2077_v14 = vld [vmem:[#allocation17 + $0x320] sm:$0xff] }
 0xa40   :  { %v1925_v27 = vmul.f32 0.125, %v1906_v23  ;;  %v3115_v23 = vpack.c.bf16 %v2052_v20, %v2050_v52  ;;  %v2083_v52 = vld [vmem:[#allocation17 + $0x350] sm:$0xff]  ;;  %v2086_v20 = vld [vmem:[#allocation17 + $0x368] sm:$0xff] }
 0xa41   :  { %v1926_v28 = vmul.f32 0.125, %v1912_v24  ;;  %v1928_v29 = vmul.f32 0.125, %v1924_v25  ;;  %v2049_v24 = vld [vmem:[#allocation17 + $0x240] sm:$0xff]  ;;  %v2051_v25 = vld [vmem:[#allocation17 + $0x250] sm:$0xff] }
 0xa42   :  { %v1929_v30 = vsub.f32 %v1897_v8, %v1925_v27  ;;  %v2043_v8 = vld [vmem:[#allocation17 + $0x210] sm:$0xff]  ;;  %v2054_v27 = vld [vmem:[#allocation17 + $0x268] sm:$0xff] }
 0xa43   :  { %v1930_v31 = vsub.f32 %v1898_v9, %v1926_v28  ;;  %v1932_v32 = vsub.f32 %v1900_v10, %v1928_v29  ;;  %v2046_v10 = vld [vmem:[#allocation17 + $0x228] sm:$0xff]  ;;  %v3109_v16 = vpack.c.bf16 %v2043_v8, %v2041_v7  ;;  %v2056_v28 = vld [vmem:[#allocation17 + $0x278] sm:$0xff]  ;;  %v1927_v29 = vmul.f32 0.125, %v1918_v21  ;;  %v2073_v7 = vld [vmem:[#allocation17 + $0x300] sm:$0xff] }
 0xa44   :  { %v1933_v33 = vmul.f32 %v1929_v30, %v1929_v30  ;;  %v3111_v17 = vpack.c.bf16 %v2048_v11, %v2046_v10  ;;  %v2075_v8 = vld [vmem:[#allocation17 + $0x310] sm:$0xff]  ;;  %v2080_v10 = vld [vmem:[#allocation17 + $0x338] sm:$0xff] }
 0xa45   :  { %v1934_v34 = vmul.f32 %v1930_v31, %v1930_v31  ;;  %v1936_v35 = vmul.f32 %v1932_v32, %v1932_v32  ;;  %v2088_v21 = vld [vmem:[#allocation17 + $0x378] sm:$0xff] }
 0xa46   :  { %v1937_v59 = vrot.slane %v1933_v33, 4 }
 0xa47   :  { %v1943_v37 = vrot.slane %v1934_v34, 4  ;;  %v1955_v44 = vrot.slane %v1936_v35, 4 }
 0xa48   :  { %v1938_v47 = vadd.f32 %v1937_v59, %v1933_v33  ;;  %v2053_v33 = vld [vmem:[#allocation17 + $0x260] sm:$0xff]  ;;  %v3896_v59 = vsub.f32 %v1899_v61, %v1927_v29  ;;  %v2092_v29 = vld [vmem:[#allocation17 + $0x398] sm:$0xff] }
 0xa49   :  { %v1944_v49 = vadd.f32 %v1943_v37, %v1934_v34  ;;  %v1956_v50 = vadd.f32 %v1955_v44, %v1936_v35  ;;  %v2058_v34 = vld [vmem:[#allocation17 + $0x288] sm:$0xff]  ;;  %v2060_v35 = vld [vmem:[#allocation17 + $0x298] sm:$0xff]  ;;  %v2057_v44 = vld [vmem:[#allocation17 + $0x280] sm:$0xff] }
 0xa4a   :  { %v1939_v51 = vrot.slane %v1938_v47, 2  ;;  %v3123_v37 = vpack.c.bf16 %v2060_v35, %v2058_v34  ;;  %v2091_v34 = vld [vmem:[#allocation17 + $0x390] sm:$0xff]  ;;  %v2094_v35 = vld [vmem:[#allocation17 + $0x3a8] sm:$0xff] }
 0xa4b   :  { %v1945_v54 = vrot.slane %v1944_v49, 2  ;;  %v1957_v55 = vrot.slane %v1956_v50, 2 }
 0xa4c   :  { %v1940_v56 = vadd.f32 %v1939_v51, %v1938_v47  ;;  %v2059_v47 = vld [vmem:[#allocation17 + $0x290] sm:$0xff]  ;;  %v1935_v51 = vmul.f32 %v3896_v59, %v3896_v59 }
 0xa4d   :  { %v1946_v57 = vadd.f32 %v1945_v54, %v1944_v49  ;;  %v1958_v58 = vadd.f32 %v1957_v55, %v1956_v50  ;;  %v2062_v49 = vld [vmem:[#allocation17 + $0x2a8] sm:$0xff]  ;;  %v2064_v50 = vld [vmem:[#allocation17 + $0x2b8] sm:$0xff]  ;;  %v3125_v53 = vpack.c.bf16 %v2059_v47, %v2057_v44  ;;  %v2061_v55 = vld [vmem:[#allocation17 + $0x2a0] sm:$0xff] }
 0xa4e   :  { %v1941_v60 = vrot.slane %v1940_v56, 1  ;;  %v3127_v54 = vpack.c.bf16 %v2064_v50, %v2062_v49  ;;  %v2093_v49 = vld [vmem:[#allocation17 + $0x3a0] sm:$0xff]  ;;  %v2095_v50 = vld [vmem:[#allocation17 + $0x3b0] sm:$0xff] }
 0xa4f   :  { %v1947_v26 = vrot.slane %v1946_v57, 1  ;;  %v1959_v62 = vrot.slane %v1958_v58, 1 }
 0xa50   :  { %v1942_v63 = vadd.f32 %v1941_v60, %v1940_v56  ;;  %v2063_v56 = vld [vmem:[#allocation17 + $0x2b0] sm:$0xff]  ;;  %v1949_v60 = vrot.slane %v1935_v51, 4 }
 0xa51   :  { %v1948_v1 = vadd.f32 %v1947_v26, %v1946_v57  ;;  %v1960_v38 = vadd.f32 %v1959_v62, %v1958_v58  ;;  %v2066_v57 = vld [vmem:[#allocation17 + $0x2c8] sm:$0xff]  ;;  %v2068_v58 = vld [vmem:[#allocation17 + $0x2d8] sm:$0xff]  ;;  %v3129_v61 = vpack.c.bf16 %v2063_v56, %v2061_v55  ;;  %v2065_v62 = vld [vmem:[#allocation17 + $0x2c0] sm:$0xff] }
 0xa52   :  { %v1961_v43 = vmul.f32 0.125, %v1942_v63  ;;  %v3131_v26 = vpack.c.bf16 %v2068_v58, %v2066_v57  ;;  %v2067_v63 = vld [vmem:[#allocation17 + $0x2d0] sm:$0xff]  ;;  %v2097_v56 = vld [vmem:[#allocation17 + $0x3c0] sm:$0xff]  ;;  %v2102_v58 = vld [vmem:[#allocation17 + $0x3e8] sm:$0xff] }
 0xa53   :  { %v1962_v2 = vmul.f32 0.125, %v1948_v1  ;;  %v1964_v48 = vmul.f32 0.125, %v1960_v38  ;;  %v2070_v1 = vld [vmem:[#allocation17 + $0x2e8] sm:$0xff]  ;;  %v2072_v38 = vld [vmem:[#allocation17 + $0x2f8] sm:$0xff]  ;;  %v3133_v0 = vpack.c.bf16 %v2067_v63, %v2065_v62  ;;  %v2099_v57 = vld [vmem:[#allocation17 + $0x3d0] sm:$0xff] }
 0xa54   :  { %v1965_v45 = vadd.f32 1e-05, %v1961_v43  ;;  %v1950_v43 = vadd.f32 %v1949_v60, %v1935_v51  ;;  %v2098_v51 = vld [vmem:[#allocation17 + $0x3c8] sm:$0xff]  ;;  %v2104_v60 = vld [vmem:[#allocation17 + $0x3f8] sm:$0xff]  ;;  %v2101_v62 = vld [vmem:[#allocation17 + $0x3e0] sm:$0xff] }
 0xa55   :  { %v1966_v4 = vadd.f32 1e-05, %v1962_v2  ;;  %v1968_v5 = vadd.f32 1e-05, %v1964_v48  ;;  %v3135_v2 = vpack.c.bf16 %v2072_v38, %v2070_v1  ;;  %v2069_v48 = vld [vmem:[#allocation17 + $0x2e0] sm:$0xff]  ;;  %v2103_v63 = vld [vmem:[#allocation17 + $0x3f0] sm:$0xff] }
 0xa56   :  { %3225 = vrsqrt.f32 %v1965_v45  ;;  %v2071_v45 = vld [vmem:[#allocation17 + $0x2f0] sm:$0xff]  ;;  %v1951_v3 = vrot.slane %v1950_v43, 2  ;;  %v3169_v1 = vpack.c.bf16 %v2103_v63, %v2101_v62 }
 0xa57   :  { %3227 = vrsqrt.f32 %v1966_v4  ;;  %v2074_v4 = vld [vmem:[#allocation17 + $0x308] sm:$0xff]  ;;  %v3137_v6 = vpack.c.bf16 %v2071_v45, %v2069_v48 }
 0xa58   :  { %3229 = vrsqrt.f32 %v1968_v5  ;;  %v2076_v5 = vld [vmem:[#allocation17 + $0x318] sm:$0xff]  ;;  %v1952_v11 = vadd.f32 %v1951_v3, %v1950_v43 }
 0xa59   :  { %v3139_v40 = vpack.c.bf16 %v2076_v5, %v2074_v4 }
 0xa60   :  { %v3226_v9 = vpop.eup %3225 }
 0xa61   :  { %v3228_v12 = vpop.eup %3227  ;;  %v1973_v41 = vmul.f32 %v3226_v9, %v1929_v30  ;;  %v3117_v30 = vpack.c.bf16 %v2051_v25, %v2049_v24  ;;  %v2078_v9 = vld [vmem:[#allocation17 + $0x328] sm:$0xff]  ;;  %v3151_v24 = vpack.c.bf16 %v2088_v21, %v2086_v20  ;;  %v2085_v25 = vld [vmem:[#allocation17 + $0x360] sm:$0xff] }
 0xa62   :  { %v3230_v13 = vpop.eup %3229  ;;  %v1974_v15 = vmul.f32 %v3228_v12, %v1930_v31  ;;  %v3119_v31 = vpack.c.bf16 %v2056_v28, %v2054_v27  ;;  %v3141_v12 = vpack.c.bf16 %v2075_v8, %v2073_v7  ;;  %v2087_v27 = vld [vmem:[#allocation17 + $0x370] sm:$0xff]  ;;  %v2090_v28 = vld [vmem:[#allocation17 + $0x388] sm:$0xff] }
 0xa63   :  { %v1976_v19 = vmul.f32 %v3230_v13, %v1932_v32  ;;  %v2055_v32 = vld [vmem:[#allocation17 + $0x270] sm:$0xff]  ;;  %v3143_v13 = vpack.c.bf16 %v2080_v10, %v2078_v9 }
 0xa64   :  { %2182 = vmatprep.mubr.f32.mxu0 %v1974_v15  ;;  %v3121_v36 = vpack.c.bf16 %v2055_v32, %v2053_v33  ;;  %v2079_v15 = vld [vmem:[#allocation17 + $0x330] sm:$0xff]  ;;  %v3155_v33 = vpack.c.bf16 %v2092_v29, %v2090_v28  ;;  %v2089_v32 = vld [vmem:[#allocation17 + $0x380] sm:$0xff] }
 0xa65   :  { %2183 = vmatmul.mubr.f32.vlgmr.msra.gmra.mrb[6].mxu0 %v1973_v41  ;;  %v2084_v41 = vld [vmem:[#allocation17 + $0x358] sm:$0xff]  ;;  %v3145_v18 = vpack.c.bf16 %v2079_v15, %v2077_v14  ;;  %v3157_v44 = vpack.c.bf16 %v2091_v34, %v2089_v32 }
 0xa66   :  { %3110 = vmatpush1.bf16.msra.mxu0 %v3109_v16  ;;  %2253 = vmatprep.mubr.f32.mxu0 %v1976_v19  ;;  %v2082_v16 = vld [vmem:[#allocation17 + $0x348] sm:$0xff]  ;;  %v2081_v19 = vld [vmem:[#allocation17 + $0x340] sm:$0xff] }
 0xa67   :  { %3112 = vmatprep.subr.bf16.mxu0 %v3111_v17  ;;  %v1953_v17 = vrot.slane %v1952_v11, 1  ;;  %v3147_v46 = vpack.c.bf16 %v2084_v41, %v2082_v16 }
 0xa6a   :  { %3114 = vmatpush1.bf16.msra.mxu0 %v3113_v22  ;;  %v1954_v22 = vadd.f32 %v1953_v17, %v1952_v11 }
 0xa6b   :  { %3116 = vmatprep.subr.bf16.mxu0 %v3115_v23  ;;  %v3149_v23 = vpack.c.bf16 %v2083_v52, %v2081_v19 }
 0xa6e   :  { %3118 = vmatpush1.bf16.msra.mxu0 %v3117_v30  ;;  %v1963_v30 = vmul.f32 0.125, %v1954_v22 }
 0xa6f   :  { %3120 = vmatprep.subr.bf16.mxu0 %v3119_v31  ;;  %v3153_v31 = vpack.c.bf16 %v2087_v27, %v2085_v25 }
 0xa72   :  { %3122 = vmatpush1.bf16.msra.mxu0 %v3121_v36  ;;  %v2096_v36 = vld [vmem:[#allocation17 + $0x3b8] sm:$0xff] }
 0xa73   :  { %3124 = vmatprep.subr.bf16.mxu0 %v3123_v37  ;;  %v1967_v37 = vadd.f32 1e-05, %v1963_v30  ;;  %v3159_v47 = vpack.c.bf16 %v2096_v36, %v2094_v35 }
 0xa75   :  { %3231 = vrsqrt.f32 %v1967_v37 }
 0xa76   :  { %3126 = vmatpush1.bf16.msra.mxu0 %v3125_v53  ;;  %v2100_v53 = vld [vmem:[#allocation17 + $0x3d8] sm:$0xff] }
 0xa77   :  { %3128 = vmatprep.subr.bf16.mxu0 %v3127_v54  ;;  %v3161_v54 = vpack.c.bf16 %v2095_v50, %v2093_v49  ;;  %v3163_v55 = vpack.c.bf16 %v2100_v53, %v2098_v51 }
 0xa7a   :  { %3130 = vmatpush1.bf16.msra.mxu0 %v3129_v61  ;;  %v3165_v61 = vpack.c.bf16 %v2099_v57, %v2097_v56 }
 0xa7b   :  { %3132 = vmatprep.subr.bf16.mxu0 %v3131_v26  ;;  %v3167_v26 = vpack.c.bf16 %v2104_v60, %v2102_v58 }
 0xa7e   :  { %3134 = vmatpush1.bf16.msra.mxu0 %v3133_v0  ;;  %v2106_v0 = vld [vmem:[#allocation2 + $0x21] ss:$8 sm:$0x3] }
 0xa7f   :  { %3136 = vmatprep.subr.bf16.mxu0 %v3135_v2  ;;  %v3232_v38 = vpop.eup %3231  ;;  %v2111_v2 = vrot.slane %v2106_v0, %v3766_v39  ;;  %v2115_v48 = vrot.slane %v2106_v0, %v3771_v42 }
 0xa80   :  { %v1975_v43 = vmul.f32 %v3232_v38, %v3896_v59 }
 0xa82   :  { %3138 = vmatpush1.bf16.msra.mxu0 %v3137_v6 }
 0xa83   :  { %3140 = vmatprep.subr.bf16.mxu0 %v3139_v40 }
 0xa86   :  { %3142 = vmatpush1.bf16.msra.mxu0 %v3141_v12 }
 0xa87   :  { %3144 = vmatprep.subr.bf16.mxu0 %v3143_v13 }
 0xa8a   :  { %3146 = vmatpush1.bf16.msra.mxu0 %v3145_v18 }
 0xa8b   :  { %3148 = vmatprep.subr.bf16.mxu0 %v3147_v46 }
 0xa8e   :  { %3150 = vmatpush1.bf16.msra.mxu0 %v3149_v23 }
 0xa8f   :  { %3152 = vmatprep.subr.bf16.mxu0 %v3151_v24 }
 0xa92   :  { %3154 = vmatpush1.bf16.msra.mxu0 %v3153_v31 }
 0xa93   :  { %3156 = vmatprep.subr.bf16.mxu0 %v3155_v33 }
 0xa96   :  { %3158 = vmatpush1.bf16.msra.mxu0 %v3157_v44 }
 0xa97   :  { %3160 = vmatprep.subr.bf16.mxu0 %v3159_v47 }
 0xa9a   :  { %3162 = vmatpush1.bf16.msra.mxu0 %v3161_v54 }
 0xa9b   :  { %3164 = vmatprep.subr.bf16.mxu0 %v3163_v55 }
 0xa9e   :  { %3166 = vmatpush1.bf16.msra.mxu0 %v3165_v61 }
 0xa9f   :  { %3168 = vmatprep.subr.bf16.mxu0 %v3167_v26 }
 0xaa2   :  { %3170 = vmatpush1.bf16.msra.mxu0 %v3169_v1 }
 0xaa5   :  { %2254 = vmatmul.mubr.f32.vlgmr.msra.gmra.mrb[6].mxu0 %v1975_v43 }
 0xb78   :  { %v2255_v45 = vpop.f32.mrb[6].mxu0 }
 0xb79   :  { %v3173_v4 = vadd.f32 %v2255_v45, %v2111_v2  ;;  %v2257_v5 = vpop.f32.mrb[7].mxu0 }
 0xb7a   :  { %v3174_v3 = vadd.f32 %v2257_v5, %v2115_v48 }
 0xb7b   :  { %v2298_v6 = vmul.f32 -1.442695, %v3173_v4 }
 0xb7c   :  { %v2299_v40 = vmul.f32 -1.442695, %v3174_v3 }
 0xb7d   :  { %3233 = vpow2.f32 %v2298_v6 }
 0xb7e   :  { %3235 = vpow2.f32 %v2299_v40 }
 0xb87   :  { %v3234_v7 = vpop.eup %3233 }
 0xb88   :  { %v3236_v8 = vpop.eup %3235  ;;  %v2266_v9 = vadd.f32 1.0, %v3234_v7 }
 0xb89   :  { %v2267_v10 = vadd.f32 1.0, %v3236_v8 }
 0xb8a   :  { %3237 = vrcp.f32 %v2266_v9 }
 0xb8b   :  { %3239 = vrcp.f32 %v2267_v10 }
 0xb94   :  { %v3238_v59 = vpop.eup %3237 }
 0xb95   :  { %v3240_v39 = vpop.eup %3239  ;;  %2272 = vst [vmem:[#allocation19] sm:$0xff] %v3238_v59 }
 0xb96   :  { %2273 = vst [vmem:[#allocation19 + $0x8] sm:$0xff] %v3240_v39 }
 0xb97   :  { %3472 = shalt.err (!%p3469_p0)
}
 0xb98   :  { %s3473_s23 = scalar_lea.hbm %s3928_s13, 256 }
 0xb99   :  { %p3474_p1 = scmp.ne.s32.totalorder %s3928_s13, %s3473_s23  ;;  %p3477_p2 = scmp.lt.u32.totalorder %s3473_s23, %s3928_s13 }
 0xb9b   :  { %p3479_p3 = pnand %p3477_p2, %p3474_p1 }
 0xb9d   :  { %3482 = shalt.err (!%p3479_p3)
}
 0xb9e   :  { %2283 = dma.vmem_to_hbm [thread:$0]  %s2281_s14, 256, %s3928_s13, [#allocation4]  }
 0xb9f   :  { %3495 = dma.done.wait [#allocation4], 256  }
 0xba0   :  { %3496 = vsyncadd [#allocation4], 4294967040 }
 0xba1   :  { %2291 = vsyncpa [#allocation3], 1 }
 0xba2   :  { %2292 = vsyncpa [#allocation6], 1 }
 0xba3   :  { %2293 = vsyncpa [#allocation9], 1 }
 0xba4   :  { %2294 = vsyncpa [#allocation12], 1 }
 0xba5   :  { %2295 = vsyncpa [#allocation15], 1 }
 0xba6   :  { %2296 = vsyncpa [#allocation18], 1 }
 0xba7   :  { %2297 = vsyncpa [#allocation4], 1 }

</bundles_post_ra>
